<compile_context>
chip_gen: v7x
topology: tpu7x:2x2x1
jax: 0.10.0
libtpu: 0.0.40
codegen_flags: <defaults>
</compile_context>

<pallas_src>
import functools

import jax
import jax.numpy as jnp
from jax.experimental import pallas as pl
from jax.experimental.pallas import tpu as pltpu


PAD = 16       # halo rows before/after every sequence (multiple of 16 so bf16
               # scratch rows stay (16,128)-tile aligned; >= max conv halo of 2)
CLS_PAD = 128  # class dim padded to one full lane group for dense stores


def _conv5_taps(src, w_ref, b_ref, R):
  """'same' 5-tap conv over packed rows.

  Per tap: one fully aligned (R, C) x (C, Cout) matmul, then the f32 result is
  rotated along the sublane axis with pltpu.roll so row i picks up
  src[i + k - 2] @ w[k].  Wrap-around / cross-sequence garbage lands only on
  non-live rows (halo guarantees this), which the caller masks to zero.
  """
  P = 2
  acc = None
  for k in range(5):
    y = jnp.dot(src, w_ref[k], preferred_element_type=jnp.float32)
    s = (P - k) % R                      # rolled[i] = y[i + k - P]
    if s:
      y = pltpu.roll(y, shift=s, axis=0)
    acc = y if acc is None else acc + y
  return acc + b_ref[...]


# ----------------------------------------------------------------------------
# Fused kernel: one grid step = one packed block of Bt sequences (R rows).
# ----------------------------------------------------------------------------
def _decnn_fused_kernel(
    x_ref,                       # (R, cpad)      bf16  packed, halo'd embeddings
    w12_ref, b12_ref,            # (5, cpad, 256) bf16 / (1, 256) f32  (conv1||conv2)
    w3_ref, b3_ref,              # (5, 256, 256)  bf16 / (1, 256) f32
    w4_ref, b4_ref,
    w5_ref, b5_ref,
    wl_ref, bl_ref,              # (256, 128) bf16 / (1, 128) f32 (-1e9 on pad classes)
    o_ref,                       # (R, 128) f32 softmax probs (non-live rows unused)
    act_a, act_b,                # (R, 256) bf16 VMEM scratch (ping / pong)
    *, R, Lc, L):
  # 0/1 mask of rows carrying a real token; everything else is forced to zero
  # so halo / inter-sequence rows never contaminate the next conv stage.
  pos = jax.lax.broadcasted_iota(jnp.int32, (R, 1), 0) % Lc
  live = jnp.logical_and(pos >= PAD, pos < PAD + L).astype(jnp.float32)

  # conv1 (k=3) || conv2 (k=5) fused into one 5-tap, N=256 conv; relu(cat)==cat(relu)
  h = jnp.maximum(_conv5_taps(x_ref[...], w12_ref, b12_ref, R), 0.0) * live
  act_a[...] = h.astype(jnp.bfloat16)

  # conv3/4/5 (k=5, 256->256) + relu, ping-pong entirely inside VMEM
  h = jnp.maximum(_conv5_taps(act_a[...], w3_ref, b3_ref, R), 0.0) * live
  act_b[...] = h.astype(jnp.bfloat16)
  h = jnp.maximum(_conv5_taps(act_b[...], w4_ref, b4_ref, R), 0.0) * live
  act_a[...] = h.astype(jnp.bfloat16)
  h = jnp.maximum(_conv5_taps(act_a[...], w5_ref, b5_ref, R), 0.0) * live

  # linear_ae256 + softmax on a lane-dense 128-wide class slab
  logits = jnp.dot(h.astype(jnp.bfloat16), wl_ref[...],
                   preferred_element_type=jnp.float32) + bl_ref[...]
  m = jnp.max(logits, axis=-1, keepdims=True)
  e = jnp.exp(logits - m)
  o_ref[...] = e * pl.reciprocal(jnp.sum(e, axis=-1, keepdims=True), approx=True)


# ----------------------------------------------------------------------------
# Wrapper: embedding gather + packing in XLA, one pallas_call, unpack.
# ----------------------------------------------------------------------------
def decnn_pallas_forward(params, tokens, *, class_num, rows_per_step=768):
  B, L = tokens.shape
  Lc = ((L + 2 * PAD + 15) // 16) * 16       # packed stride per sequence (16-aligned)
  # Sequences per grid step: target ~rows_per_step packed rows, but keep
  # Bg >= 2 whenever B >= 2 so both v7x TensorCores get work.
  Bt = max(1, min(rows_per_step // Lc, (B + 1) // 2)) if B >= 2 else 1
  Bg = -(-B // Bt)                           # grid steps
  Bp = Bg * Bt
  R = Bt * Lc                                # packed rows per grid step

  # --- embeddings (gather + concat) in XLA, then ONE fused pad into the
  #     packed / halo'd / channel-padded bf16 layout the kernel consumes.
  g = jnp.take(params["global_emb"], tokens, axis=0)
  d = jnp.take(params["domain_emb"], tokens, axis=0)
  x = jnp.concatenate([g, d], axis=-1)                       # (B, L, 400) f32
  cin = x.shape[-1]
  cpad = ((cin + 127) // 128) * 128                          # 400 -> 512
  x = x.astype(jnp.bfloat16)
  x = jnp.pad(x, ((0, Bp - B), (PAD, Lc - L - PAD), (0, cpad - cin)))
  x = x.reshape(Bg, R, cpad)

  # --- weights -> bf16; conv1 (k=3,pad=1) embedded into 5 taps (zero edges)
  #     and fused with conv2 along Cout; biases -> f32 (1, Cout).
  w1 = jnp.pad(params["conv1_w"], ((1, 1), (0, cpad - cin), (0, 0)))
  w2 = jnp.pad(params["conv2_w"], ((0, 0), (0, cpad - cin), (0, 0)))
  w12 = jnp.concatenate([w1, w2], axis=-1).astype(jnp.bfloat16)     # (5, cpad, 256)
  b12 = jnp.concatenate([params["conv1_b"], params["conv2_b"]]
                        ).reshape(1, 256).astype(jnp.float32)
  w3 = params["conv3_w"].astype(jnp.bfloat16)
  w4 = params["conv4_w"].astype(jnp.bfloat16)
  w5 = params["conv5_w"].astype(jnp.bfloat16)
  b3 = params["conv3_b"].reshape(1, -1).astype(jnp.float32)
  b4 = params["conv4_b"].reshape(1, -1).astype(jnp.float32)
  b5 = params["conv5_b"].reshape(1, -1).astype(jnp.float32)
  wl = jnp.pad(params["ae_w"], ((0, 0), (0, CLS_PAD - class_num))).astype(jnp.bfloat16)
  bl = jnp.full((CLS_PAD,), -1e9, jnp.float32)
  bl = bl.at[:class_num].set(params["ae_b"].astype(jnp.float32)).reshape(1, CLS_PAD)

  def wspec(shape):
    n = len(shape)
    return pl.BlockSpec(shape, lambda i, n=n: (0,) * n)

  # VMEM budget from actual block sizes: double-buffered weights + x/out
  # blocks, scratch, plus headroom for the f32 conv intermediates.  Capped at
  # 48 MiB to stay comfortable on v7x (64 MiB physical).
  weight_bytes = sum(int(a.size) * a.dtype.itemsize
                     for a in (w12, b12, w3, b3, w4, b4, w5, b5, wl, bl))
  block_bytes = R * cpad * 2 + R * CLS_PAD * 4
  scratch_bytes = 2 * R * 256 * 2
  interm_bytes = 8 * R * 256 * 4
  vmem_bytes = 2 * (weight_bytes + block_bytes) + scratch_bytes + interm_bytes
  vmem_limit = min(48 * 1024 * 1024, max(32 * 1024 * 1024, int(1.25 * vmem_bytes)))

  kern = functools.partial(_decnn_fused_kernel, R=R, Lc=Lc, L=L)
  out = pl.pallas_call(
      kern,
      out_shape=jax.ShapeDtypeStruct((Bg, R, CLS_PAD), jnp.float32),
      grid=(Bg,),
      in_specs=[
          pl.BlockSpec((None, R, cpad), lambda i: (i, 0, 0)),
          wspec((5, cpad, 256)), wspec((1, 256)),
          wspec((5, 256, 256)), wspec((1, 256)),
          wspec((5, 256, 256)), wspec((1, 256)),
          wspec((5, 256, 256)), wspec((1, 256)),
          wspec((256, CLS_PAD)), wspec((1, CLS_PAD)),
      ],
      out_specs=pl.BlockSpec((None, R, CLS_PAD), lambda i: (i, 0, 0)),
      scratch_shapes=[pltpu.VMEM((R, 256), jnp.bfloat16),
                      pltpu.VMEM((R, 256), jnp.bfloat16)],
      compiler_params=pltpu.CompilerParams(
          dimension_semantics=("parallel",),
          vmem_limit_bytes=vmem_limit),
  )(x, w12, b12, w3, b3, w4, b4, w5, b5, wl, bl)

  # Unpack packed rows: (Bg, Bt*Lc, 128) -> (Bp, Lc, 128) -> live tokens/classes.
  out = out.reshape(Bp, Lc, CLS_PAD)
  return out[:B, PAD:PAD + L, :class_num]


# ----------------------------------------------------------------------------
# Pure-JAX f32 reference (mirrors PyTorch Conv1d / Linear / softmax semantics)
# ----------------------------------------------------------------------------
def decnn_reference(params, tokens):
  hi = jax.lax.Precision.HIGHEST
  g = jnp.take(params["global_emb"], tokens, axis=0)
  d = jnp.take(params["domain_emb"], tokens, axis=0)
  x = jnp.concatenate([g, d], axis=-1)

  def conv(x, w, b):
    K = w.shape[0]
    P = (K - 1) // 2
    Lx = x.shape[1]
    xp = jnp.pad(x, ((0, 0), (P, P), (0, 0)))
    out = b.reshape(1, 1, -1)
    for k in range(K):
      out = out + jnp.einsum("blc,cd->bld", xp[:, k:k + Lx, :], w[k], precision=hi)
    return out

  c1 = conv(x, params["conv1_w"], params["conv1_b"])
  c2 = conv(x, params["conv2_w"], params["conv2_b"])
  h = jnp.maximum(jnp.concatenate([c1, c2], axis=-1), 0.0)
  h = jnp.maximum(conv(h, params["conv3_w"], params["conv3_b"]), 0.0)
  h = jnp.maximum(conv(h, params["conv4_w"], params["conv4_b"]), 0.0)
  h = jnp.maximum(conv(h, params["conv5_w"], params["conv5_b"]), 0.0)
  logits = jnp.einsum("bld,dc->blc", h, params["ae_w"], precision=hi) + params["ae_b"]
  return jax.nn.softmax(logits, axis=-1)


# ----------------------------------------------------------------------------
# Deterministic parameter construction
# ----------------------------------------------------------------------------
def init_params(key, vocab, class_num):
  ks = jax.random.split(key, 14)
  s = 0.05

  def w(i, shape):
    return (s * jax.random.normal(ks[i], shape)).astype(jnp.float32)

  return {
      "global_emb": w(0, (vocab, 300)),
      "domain_emb": w(1, (vocab, 100)),
      # conv weights stored as (K, Cin, Cout) == Conv1d weight.permute(2,1,0)
      "conv1_w": w(2, (3, 400, 128)), "conv1_b": w(3, (128,)),
      "conv2_w": w(4, (5, 400, 128)), "conv2_b": w(5, (128,)),
      "conv3_w": w(6, (5, 256, 256)), "conv3_b": w(7, (256,)),
      "conv4_w": w(8, (5, 256, 256)), "conv4_b": w(9, (256,)),
      "conv5_w": w(10, (5, 256, 256)), "conv5_b": w(11, (256,)),
      "ae_w": w(12, (256, class_num)), "ae_b": w(13, (class_num,)),
  }


if __name__ == "__main__":
  key = jax.random.PRNGKey(0)
  kp, kx = jax.random.split(key)

  VOCAB, B, L, CLASS_NUM = 50, 2, 16, 3
  params = init_params(kp, VOCAB, CLASS_NUM)
  x_tokens = jax.random.randint(kx, (B, L), 0, VOCAB, dtype=jnp.int32)
  # NOTE: the `mask` input of DECNN.forward is unused in the lm='None' path.

  fwd = jax.jit(functools.partial(decnn_pallas_forward, class_num=CLASS_NUM))
  probs = fwd(params, x_tokens)
  jax.block_until_ready(probs)

  ref = decnn_reference(params, x_tokens)

  assert probs.shape == (B, L, CLASS_NUM)
  assert bool(jnp.all(jnp.isfinite(probs)))
  assert bool(jnp.allclose(jnp.sum(probs, axis=-1), 1.0, atol=1e-2))
  assert bool(jnp.allclose(probs, ref, atol=3e-2)), float(jnp.max(jnp.abs(probs - ref)))
  print("KERNEL_OK")
</pallas_src>

<mosaic_0001>
module attributes {stable_mosaic.version = 11 : i64} {
  func.func @_decnn_fused_kernel(%arg0: i32, %arg1: memref<1x48x512xbf16, #tpu.memory_space<vmem>>, %arg2: memref<5x512x256xbf16, #tpu.memory_space<vmem>>, %arg3: memref<1x256xf32, #tpu.memory_space<vmem>>, %arg4: memref<5x256x256xbf16, #tpu.memory_space<vmem>>, %arg5: memref<1x256xf32, #tpu.memory_space<vmem>>, %arg6: memref<5x256x256xbf16, #tpu.memory_space<vmem>>, %arg7: memref<1x256xf32, #tpu.memory_space<vmem>>, %arg8: memref<5x256x256xbf16, #tpu.memory_space<vmem>>, %arg9: memref<1x256xf32, #tpu.memory_space<vmem>>, %arg10: memref<256x128xbf16, #tpu.memory_space<vmem>>, %arg11: memref<1x128xf32, #tpu.memory_space<vmem>>, %arg12: memref<1x48x128xf32, #tpu.memory_space<vmem>>, %arg13: memref<48x256xbf16, #tpu.memory_space<vmem>>, %arg14: memref<48x256xbf16, #tpu.memory_space<vmem>>) attributes {dimension_semantics = [#tpu.dimension_semantics<parallel>], iteration_bounds = array<i64: 2>, scalar_prefetch = 0 : i64, scratch_operands = 2 : i64, tpu.core_type = #tpu.core_type<tc>, window_params = [{transform_indices = @transform_0, window_bounds = array<i64: 1, 48, 512>}, {pipeline_mode = #tpu.pipeline_mode<synchronous>, transform_indices = @transform_1, window_bounds = array<i64: 5, 512, 256>}, {pipeline_mode = #tpu.pipeline_mode<synchronous>, transform_indices = @transform_2, window_bounds = array<i64: 1, 256>}, {pipeline_mode = #tpu.pipeline_mode<synchronous>, transform_indices = @transform_3, window_bounds = array<i64: 5, 256, 256>}, {pipeline_mode = #tpu.pipeline_mode<synchronous>, transform_indices = @transform_4, window_bounds = array<i64: 1, 256>}, {pipeline_mode = #tpu.pipeline_mode<synchronous>, transform_indices = @transform_5, window_bounds = array<i64: 5, 256, 256>}, {pipeline_mode = #tpu.pipeline_mode<synchronous>, transform_indices = @transform_6, window_bounds = array<i64: 1, 256>}, {pipeline_mode = #tpu.pipeline_mode<synchronous>, transform_indices = @transform_7, window_bounds = array<i64: 5, 256, 256>}, {pipeline_mode = #tpu.pipeline_mode<synchronous>, transform_indices = @transform_8, window_bounds = array<i64: 1, 256>}, {pipeline_mode = #tpu.pipeline_mode<synchronous>, transform_indices = @transform_9, window_bounds = array<i64: 256, 128>}, {pipeline_mode = #tpu.pipeline_mode<synchronous>, transform_indices = @transform_10, window_bounds = array<i64: 1, 128>}, {transform_indices = @transform_11, window_bounds = array<i64: 1, 48, 128>}]} {
    %0 = tpu.iota {dimensions = array<i32: 0>} : vector<48x1xi32>
    %c48_i32 = arith.constant 48 : i32
    %c0_i32 = arith.constant 0 : i32
    %1 = arith.cmpi eq, %c48_i32, %c0_i32 : i32
    %c1_i32 = arith.constant 1 : i32
    %2 = arith.select %1, %c1_i32, %c48_i32 : i32
    %3 = vector.broadcast %2 : i32 to vector<48x1xi32>
    %4 = arith.remsi %0, %3 : vector<48x1xi32>
    %c0_i32_0 = arith.constant 0 : i32
    %5 = vector.broadcast %c0_i32_0 : i32 to vector<48x1xi32>
    %6 = arith.cmpi ne, %4, %5 : vector<48x1xi32>
    %c0_i32_1 = arith.constant 0 : i32
    %7 = vector.broadcast %c0_i32_1 : i32 to vector<48x1xi32>
    %8 = arith.cmpi slt, %4, %7 : vector<48x1xi32>
    %c0_i32_2 = arith.constant 0 : i32
    %9 = arith.cmpi slt, %2, %c0_i32_2 : i32
    %10 = vector.broadcast %9 : i1 to vector<48x1xi1>
    %11 = vector.broadcast %10 : vector<48x1xi1> to vector<48x1xi1>
    %12 = arith.xori %8, %11 : vector<48x1xi1>
    %13 = arith.andi %12, %6 : vector<48x1xi1>
    %14 = vector.broadcast %2 : i32 to vector<48x1xi32>
    %15 = arith.addi %4, %14 : vector<48x1xi32>
    %16 = arith.select %13, %15, %4 : vector<48x1xi1>, vector<48x1xi32>
    %c16_i32 = arith.constant 16 : i32
    %17 = vector.broadcast %c16_i32 : i32 to vector<48x1xi32>
    %18 = arith.cmpi sge, %16, %17 : vector<48x1xi32>
    %c32_i32 = arith.constant 32 : i32
    %19 = vector.broadcast %c32_i32 : i32 to vector<48x1xi32>
    %20 = arith.cmpi slt, %16, %19 : vector<48x1xi32>
    %21 = arith.andi %18, %20 : vector<48x1xi1>
    %22 = arith.extui %21 : vector<48x1xi1> to vector<48x1xi32>
    %23 = arith.sitofp %22 : vector<48x1xi32> to vector<48x1xf32>
    %c0 = arith.constant 0 : index
    %c0_3 = arith.constant 0 : index
    %c0_4 = arith.constant 0 : index
    %24 = vector.load %arg1[%c0, %c0_3, %c0_4] : memref<1x48x512xbf16, #tpu.memory_space<vmem>>, vector<1x48x512xbf16>
    %25 = vector.shape_cast %24 : vector<1x48x512xbf16> to vector<48x512xbf16>
    %c0_5 = arith.constant 0 : index
    %c0_6 = arith.constant 0 : index
    %c0_7 = arith.constant 0 : index
    %26 = vector.load %arg2[%c0_5, %c0_6, %c0_7] : memref<5x512x256xbf16, #tpu.memory_space<vmem>>, vector<1x512x256xbf16>
    %27 = vector.shape_cast %26 : vector<1x512x256xbf16> to vector<512x256xbf16>
    %cst = arith.constant dense<0.000000e+00> : vector<48x256xf32>
    %28 = tpu.matmul %25, %27, %cst {dimension_numbers = #tpu.dot_dimension_numbers<[1], [0], [0], [1], [0, 0, 1, 1], [], []>} : vector<48x512xbf16>, vector<512x256xbf16>, vector<48x256xf32> -> vector<48x256xf32>
    %c2_i32 = arith.constant 2 : i32
    %29 = tpu.dynamic_rotate %28 by %c2_i32 dim 0 : vector<48x256xf32>, i32 -> vector<48x256xf32>
    %c1 = arith.constant 1 : index
    %c0_8 = arith.constant 0 : index
    %c0_9 = arith.constant 0 : index
    %30 = vector.load %arg2[%c1, %c0_8, %c0_9] : memref<5x512x256xbf16, #tpu.memory_space<vmem>>, vector<1x512x256xbf16>
    %31 = vector.shape_cast %30 : vector<1x512x256xbf16> to vector<512x256xbf16>
    %cst_10 = arith.constant dense<0.000000e+00> : vector<48x256xf32>
    %32 = tpu.matmul %25, %31, %cst_10 {dimension_numbers = #tpu.dot_dimension_numbers<[1], [0], [0], [1], [0, 0, 1, 1], [], []>} : vector<48x512xbf16>, vector<512x256xbf16>, vector<48x256xf32> -> vector<48x256xf32>
    %c1_i32_11 = arith.constant 1 : i32
    %33 = tpu.dynamic_rotate %32 by %c1_i32_11 dim 0 : vector<48x256xf32>, i32 -> vector<48x256xf32>
    %34 = arith.addf %29, %33 : vector<48x256xf32>
    %c2 = arith.constant 2 : index
    %c0_12 = arith.constant 0 : index
    %c0_13 = arith.constant 0 : index
    %35 = vector.load %arg2[%c2, %c0_12, %c0_13] : memref<5x512x256xbf16, #tpu.memory_space<vmem>>, vector<1x512x256xbf16>
    %36 = vector.shape_cast %35 : vector<1x512x256xbf16> to vector<512x256xbf16>
    %cst_14 = arith.constant dense<0.000000e+00> : vector<48x256xf32>
    %37 = tpu.matmul %25, %36, %cst_14 {dimension_numbers = #tpu.dot_dimension_numbers<[1], [0], [0], [1], [0, 0, 1, 1], [], []>} : vector<48x512xbf16>, vector<512x256xbf16>, vector<48x256xf32> -> vector<48x256xf32>
    %38 = arith.addf %34, %37 : vector<48x256xf32>
    %c3 = arith.constant 3 : index
    %c0_15 = arith.constant 0 : index
    %c0_16 = arith.constant 0 : index
    %39 = vector.load %arg2[%c3, %c0_15, %c0_16] : memref<5x512x256xbf16, #tpu.memory_space<vmem>>, vector<1x512x256xbf16>
    %40 = vector.shape_cast %39 : vector<1x512x256xbf16> to vector<512x256xbf16>
    %cst_17 = arith.constant dense<0.000000e+00> : vector<48x256xf32>
    %41 = tpu.matmul %25, %40, %cst_17 {dimension_numbers = #tpu.dot_dimension_numbers<[1], [0], [0], [1], [0, 0, 1, 1], [], []>} : vector<48x512xbf16>, vector<512x256xbf16>, vector<48x256xf32> -> vector<48x256xf32>
    %c47_i32 = arith.constant 47 : i32
    %42 = tpu.dynamic_rotate %41 by %c47_i32 dim 0 : vector<48x256xf32>, i32 -> vector<48x256xf32>
    %43 = arith.addf %38, %42 : vector<48x256xf32>
    %c4 = arith.constant 4 : index
    %c0_18 = arith.constant 0 : index
    %c0_19 = arith.constant 0 : index
    %44 = vector.load %arg2[%c4, %c0_18, %c0_19] : memref<5x512x256xbf16, #tpu.memory_space<vmem>>, vector<1x512x256xbf16>
    %45 = vector.shape_cast %44 : vector<1x512x256xbf16> to vector<512x256xbf16>
    %cst_20 = arith.constant dense<0.000000e+00> : vector<48x256xf32>
    %46 = tpu.matmul %25, %45, %cst_20 {dimension_numbers = #tpu.dot_dimension_numbers<[1], [0], [0], [1], [0, 0, 1, 1], [], []>} : vector<48x512xbf16>, vector<512x256xbf16>, vector<48x256xf32> -> vector<48x256xf32>
    %c46_i32 = arith.constant 46 : i32
    %47 = tpu.dynamic_rotate %46 by %c46_i32 dim 0 : vector<48x256xf32>, i32 -> vector<48x256xf32>
    %48 = arith.addf %43, %47 : vector<48x256xf32>
    %c0_21 = arith.constant 0 : index
    %c0_22 = arith.constant 0 : index
    %49 = vector.load %arg3[%c0_21, %c0_22] : memref<1x256xf32, #tpu.memory_space<vmem>>, vector<1x256xf32>
    %50 = vector.broadcast %49 : vector<1x256xf32> to vector<48x256xf32>
    %51 = arith.addf %48, %50 : vector<48x256xf32>
    %cst_23 = arith.constant 0.000000e+00 : f32
    %52 = vector.broadcast %cst_23 : f32 to vector<48x256xf32>
    %53 = arith.maximumf %51, %52 : vector<48x256xf32>
    %54 = vector.broadcast %23 : vector<48x1xf32> to vector<48x256xf32>
    %55 = arith.mulf %53, %54 : vector<48x256xf32>
    %56 = arith.truncf %55 : vector<48x256xf32> to vector<48x256xbf16>
    %c0_24 = arith.constant 0 : index
    %c0_25 = arith.constant 0 : index
    %57 = vector.load %arg13[%c0_24, %c0_25] : memref<48x256xbf16, #tpu.memory_space<vmem>>, vector<48x256xbf16>
    tpu.vector_store %arg13[%c0_24, %c0_25], %56 {strides = array<i32>} : memref<48x256xbf16, #tpu.memory_space<vmem>>, vector<48x256xbf16>,
    %c0_26 = arith.constant 0 : index
    %c0_27 = arith.constant 0 : index
    %58 = vector.load %arg13[%c0_26, %c0_27] : memref<48x256xbf16, #tpu.memory_space<vmem>>, vector<48x256xbf16>
    %c0_28 = arith.constant 0 : index
    %c0_29 = arith.constant 0 : index
    %c0_30 = arith.constant 0 : index
    %59 = vector.load %arg4[%c0_28, %c0_29, %c0_30] : memref<5x256x256xbf16, #tpu.memory_space<vmem>>, vector<1x256x256xbf16>
    %60 = vector.shape_cast %59 : vector<1x256x256xbf16> to vector<256x256xbf16>
    %cst_31 = arith.constant dense<0.000000e+00> : vector<48x256xf32>
    %61 = tpu.matmul %58, %60, %cst_31 {dimension_numbers = #tpu.dot_dimension_numbers<[1], [0], [0], [1], [0, 0, 1, 1], [], []>} : vector<48x256xbf16>, vector<256x256xbf16>, vector<48x256xf32> -> vector<48x256xf32>
    %c2_i32_32 = arith.constant 2 : i32
    %62 = tpu.dynamic_rotate %61 by %c2_i32_32 dim 0 : vector<48x256xf32>, i32 -> vector<48x256xf32>
    %c1_33 = arith.constant 1 : index
    %c0_34 = arith.constant 0 : index
    %c0_35 = arith.constant 0 : index
    %63 = vector.load %arg4[%c1_33, %c0_34, %c0_35] : memref<5x256x256xbf16, #tpu.memory_space<vmem>>, vector<1x256x256xbf16>
    %64 = vector.shape_cast %63 : vector<1x256x256xbf16> to vector<256x256xbf16>
    %cst_36 = arith.constant dense<0.000000e+00> : vector<48x256xf32>
    %65 = tpu.matmul %58, %64, %cst_36 {dimension_numbers = #tpu.dot_dimension_numbers<[1], [0], [0], [1], [0, 0, 1, 1], [], []>} : vector<48x256xbf16>, vector<256x256xbf16>, vector<48x256xf32> -> vector<48x256xf32>
    %c1_i32_37 = arith.constant 1 : i32
    %66 = tpu.dynamic_rotate %65 by %c1_i32_37 dim 0 : vector<48x256xf32>, i32 -> vector<48x256xf32>
    %67 = arith.addf %62, %66 : vector<48x256xf32>
    %c2_38 = arith.constant 2 : index
    %c0_39 = arith.constant 0 : index
    %c0_40 = arith.constant 0 : index
    %68 = vector.load %arg4[%c2_38, %c0_39, %c0_40] : memref<5x256x256xbf16, #tpu.memory_space<vmem>>, vector<1x256x256xbf16>
    %69 = vector.shape_cast %68 : vector<1x256x256xbf16> to vector<256x256xbf16>
    %cst_41 = arith.constant dense<0.000000e+00> : vector<48x256xf32>
    %70 = tpu.matmul %58, %69, %cst_41 {dimension_numbers = #tpu.dot_dimension_numbers<[1], [0], [0], [1], [0, 0, 1, 1], [], []>} : vector<48x256xbf16>, vector<256x256xbf16>, vector<48x256xf32> -> vector<48x256xf32>
    %71 = arith.addf %67, %70 : vector<48x256xf32>
    %c3_42 = arith.constant 3 : index
    %c0_43 = arith.constant 0 : index
    %c0_44 = arith.constant 0 : index
    %72 = vector.load %arg4[%c3_42, %c0_43, %c0_44] : memref<5x256x256xbf16, #tpu.memory_space<vmem>>, vector<1x256x256xbf16>
    %73 = vector.shape_cast %72 : vector<1x256x256xbf16> to vector<256x256xbf16>
    %cst_45 = arith.constant dense<0.000000e+00> : vector<48x256xf32>
    %74 = tpu.matmul %58, %73, %cst_45 {dimension_numbers = #tpu.dot_dimension_numbers<[1], [0], [0], [1], [0, 0, 1, 1], [], []>} : vector<48x256xbf16>, vector<256x256xbf16>, vector<48x256xf32> -> vector<48x256xf32>
    %c47_i32_46 = arith.constant 47 : i32
    %75 = tpu.dynamic_rotate %74 by %c47_i32_46 dim 0 : vector<48x256xf32>, i32 -> vector<48x256xf32>
    %76 = arith.addf %71, %75 : vector<48x256xf32>
    %c4_47 = arith.constant 4 : index
    %c0_48 = arith.constant 0 : index
    %c0_49 = arith.constant 0 : index
    %77 = vector.load %arg4[%c4_47, %c0_48, %c0_49] : memref<5x256x256xbf16, #tpu.memory_space<vmem>>, vector<1x256x256xbf16>
    %78 = vector.shape_cast %77 : vector<1x256x256xbf16> to vector<256x256xbf16>
    %cst_50 = arith.constant dense<0.000000e+00> : vector<48x256xf32>
    %79 = tpu.matmul %58, %78, %cst_50 {dimension_numbers = #tpu.dot_dimension_numbers<[1], [0], [0], [1], [0, 0, 1, 1], [], []>} : vector<48x256xbf16>, vector<256x256xbf16>, vector<48x256xf32> -> vector<48x256xf32>
    %c46_i32_51 = arith.constant 46 : i32
    %80 = tpu.dynamic_rotate %79 by %c46_i32_51 dim 0 : vector<48x256xf32>, i32 -> vector<48x256xf32>
    %81 = arith.addf %76, %80 : vector<48x256xf32>
    %c0_52 = arith.constant 0 : index
    %c0_53 = arith.constant 0 : index
    %82 = vector.load %arg5[%c0_52, %c0_53] : memref<1x256xf32, #tpu.memory_space<vmem>>, vector<1x256xf32>
    %83 = vector.broadcast %82 : vector<1x256xf32> to vector<48x256xf32>
    %84 = arith.addf %81, %83 : vector<48x256xf32>
    %cst_54 = arith.constant 0.000000e+00 : f32
    %85 = vector.broadcast %cst_54 : f32 to vector<48x256xf32>
    %86 = arith.maximumf %84, %85 : vector<48x256xf32>
    %87 = vector.broadcast %23 : vector<48x1xf32> to vector<48x256xf32>
    %88 = arith.mulf %86, %87 : vector<48x256xf32>
    %89 = arith.truncf %88 : vector<48x256xf32> to vector<48x256xbf16>
    %c0_55 = arith.constant 0 : index
    %c0_56 = arith.constant 0 : index
    %90 = vector.load %arg14[%c0_55, %c0_56] : memref<48x256xbf16, #tpu.memory_space<vmem>>, vector<48x256xbf16>
    tpu.vector_store %arg14[%c0_55, %c0_56], %89 {strides = array<i32>} : memref<48x256xbf16, #tpu.memory_space<vmem>>, vector<48x256xbf16>,
    %c0_57 = arith.constant 0 : index
    %c0_58 = arith.constant 0 : index
    %91 = vector.load %arg14[%c0_57, %c0_58] : memref<48x256xbf16, #tpu.memory_space<vmem>>, vector<48x256xbf16>
    %c0_59 = arith.constant 0 : index
    %c0_60 = arith.constant 0 : index
    %c0_61 = arith.constant 0 : index
    %92 = vector.load %arg6[%c0_59, %c0_60, %c0_61] : memref<5x256x256xbf16, #tpu.memory_space<vmem>>, vector<1x256x256xbf16>
    %93 = vector.shape_cast %92 : vector<1x256x256xbf16> to vector<256x256xbf16>
    %cst_62 = arith.constant dense<0.000000e+00> : vector<48x256xf32>
    %94 = tpu.matmul %91, %93, %cst_62 {dimension_numbers = #tpu.dot_dimension_numbers<[1], [0], [0], [1], [0, 0, 1, 1], [], []>} : vector<48x256xbf16>, vector<256x256xbf16>, vector<48x256xf32> -> vector<48x256xf32>
    %c2_i32_63 = arith.constant 2 : i32
    %95 = tpu.dynamic_rotate %94 by %c2_i32_63 dim 0 : vector<48x256xf32>, i32 -> vector<48x256xf32>
    %c1_64 = arith.constant 1 : index
    %c0_65 = arith.constant 0 : index
    %c0_66 = arith.constant 0 : index
    %96 = vector.load %arg6[%c1_64, %c0_65, %c0_66] : memref<5x256x256xbf16, #tpu.memory_space<vmem>>, vector<1x256x256xbf16>
    %97 = vector.shape_cast %96 : vector<1x256x256xbf16> to vector<256x256xbf16>
    %cst_67 = arith.constant dense<0.000000e+00> : vector<48x256xf32>
    %98 = tpu.matmul %91, %97, %cst_67 {dimension_numbers = #tpu.dot_dimension_numbers<[1], [0], [0], [1], [0, 0, 1, 1], [], []>} : vector<48x256xbf16>, vector<256x256xbf16>, vector<48x256xf32> -> vector<48x256xf32>
    %c1_i32_68 = arith.constant 1 : i32
    %99 = tpu.dynamic_rotate %98 by %c1_i32_68 dim 0 : vector<48x256xf32>, i32 -> vector<48x256xf32>
    %100 = arith.addf %95, %99 : vector<48x256xf32>
    %c2_69 = arith.constant 2 : index
    %c0_70 = arith.constant 0 : index
    %c0_71 = arith.constant 0 : index
    %101 = vector.load %arg6[%c2_69, %c0_70, %c0_71] : memref<5x256x256xbf16, #tpu.memory_space<vmem>>, vector<1x256x256xbf16>
    %102 = vector.shape_cast %101 : vector<1x256x256xbf16> to vector<256x256xbf16>
    %cst_72 = arith.constant dense<0.000000e+00> : vector<48x256xf32>
    %103 = tpu.matmul %91, %102, %cst_72 {dimension_numbers = #tpu.dot_dimension_numbers<[1], [0], [0], [1], [0, 0, 1, 1], [], []>} : vector<48x256xbf16>, vector<256x256xbf16>, vector<48x256xf32> -> vector<48x256xf32>
    %104 = arith.addf %100, %103 : vector<48x256xf32>
    %c3_73 = arith.constant 3 : index
    %c0_74 = arith.constant 0 : index
    %c0_75 = arith.constant 0 : index
    %105 = vector.load %arg6[%c3_73, %c0_74, %c0_75] : memref<5x256x256xbf16, #tpu.memory_space<vmem>>, vector<1x256x256xbf16>
    %106 = vector.shape_cast %105 : vector<1x256x256xbf16> to vector<256x256xbf16>
    %cst_76 = arith.constant dense<0.000000e+00> : vector<48x256xf32>
    %107 = tpu.matmul %91, %106, %cst_76 {dimension_numbers = #tpu.dot_dimension_numbers<[1], [0], [0], [1], [0, 0, 1, 1], [], []>} : vector<48x256xbf16>, vector<256x256xbf16>, vector<48x256xf32> -> vector<48x256xf32>
    %c47_i32_77 = arith.constant 47 : i32
    %108 = tpu.dynamic_rotate %107 by %c47_i32_77 dim 0 : vector<48x256xf32>, i32 -> vector<48x256xf32>
    %109 = arith.addf %104, %108 : vector<48x256xf32>
    %c4_78 = arith.constant 4 : index
    %c0_79 = arith.constant 0 : index
    %c0_80 = arith.constant 0 : index
    %110 = vector.load %arg6[%c4_78, %c0_79, %c0_80] : memref<5x256x256xbf16, #tpu.memory_space<vmem>>, vector<1x256x256xbf16>
    %111 = vector.shape_cast %110 : vector<1x256x256xbf16> to vector<256x256xbf16>
    %cst_81 = arith.constant dense<0.000000e+00> : vector<48x256xf32>
    %112 = tpu.matmul %91, %111, %cst_81 {dimension_numbers = #tpu.dot_dimension_numbers<[1], [0], [0], [1], [0, 0, 1, 1], [], []>} : vector<48x256xbf16>, vector<256x256xbf16>, vector<48x256xf32> -> vector<48x256xf32>
    %c46_i32_82 = arith.constant 46 : i32
    %113 = tpu.dynamic_rotate %112 by %c46_i32_82 dim 0 : vector<48x256xf32>, i32 -> vector<48x256xf32>
    %114 = arith.addf %109, %113 : vector<48x256xf32>
    %c0_83 = arith.constant 0 : index
    %c0_84 = arith.constant 0 : index
    %115 = vector.load %arg7[%c0_83, %c0_84] : memref<1x256xf32, #tpu.memory_space<vmem>>, vector<1x256xf32>
    %116 = vector.broadcast %115 : vector<1x256xf32> to vector<48x256xf32>
    %117 = arith.addf %114, %116 : vector<48x256xf32>
    %cst_85 = arith.constant 0.000000e+00 : f32
    %118 = vector.broadcast %cst_85 : f32 to vector<48x256xf32>
    %119 = arith.maximumf %117, %118 : vector<48x256xf32>
    %120 = vector.broadcast %23 : vector<48x1xf32> to vector<48x256xf32>
    %121 = arith.mulf %119, %120 : vector<48x256xf32>
    %122 = arith.truncf %121 : vector<48x256xf32> to vector<48x256xbf16>
    %c0_86 = arith.constant 0 : index
    %c0_87 = arith.constant 0 : index
    %123 = vector.load %arg13[%c0_86, %c0_87] : memref<48x256xbf16, #tpu.memory_space<vmem>>, vector<48x256xbf16>
    tpu.vector_store %arg13[%c0_86, %c0_87], %122 {strides = array<i32>} : memref<48x256xbf16, #tpu.memory_space<vmem>>, vector<48x256xbf16>,
    %c0_88 = arith.constant 0 : index
    %c0_89 = arith.constant 0 : index
    %124 = vector.load %arg13[%c0_88, %c0_89] : memref<48x256xbf16, #tpu.memory_space<vmem>>, vector<48x256xbf16>
    %c0_90 = arith.constant 0 : index
    %c0_91 = arith.constant 0 : index
    %c0_92 = arith.constant 0 : index
    %125 = vector.load %arg8[%c0_90, %c0_91, %c0_92] : memref<5x256x256xbf16, #tpu.memory_space<vmem>>, vector<1x256x256xbf16>
    %126 = vector.shape_cast %125 : vector<1x256x256xbf16> to vector<256x256xbf16>
    %cst_93 = arith.constant dense<0.000000e+00> : vector<48x256xf32>
    %127 = tpu.matmul %124, %126, %cst_93 {dimension_numbers = #tpu.dot_dimension_numbers<[1], [0], [0], [1], [0, 0, 1, 1], [], []>} : vector<48x256xbf16>, vector<256x256xbf16>, vector<48x256xf32> -> vector<48x256xf32>
    %c2_i32_94 = arith.constant 2 : i32
    %128 = tpu.dynamic_rotate %127 by %c2_i32_94 dim 0 : vector<48x256xf32>, i32 -> vector<48x256xf32>
    %c1_95 = arith.constant 1 : index
    %c0_96 = arith.constant 0 : index
    %c0_97 = arith.constant 0 : index
    %129 = vector.load %arg8[%c1_95, %c0_96, %c0_97] : memref<5x256x256xbf16, #tpu.memory_space<vmem>>, vector<1x256x256xbf16>
    %130 = vector.shape_cast %129 : vector<1x256x256xbf16> to vector<256x256xbf16>
    %cst_98 = arith.constant dense<0.000000e+00> : vector<48x256xf32>
    %131 = tpu.matmul %124, %130, %cst_98 {dimension_numbers = #tpu.dot_dimension_numbers<[1], [0], [0], [1], [0, 0, 1, 1], [], []>} : vector<48x256xbf16>, vector<256x256xbf16>, vector<48x256xf32> -> vector<48x256xf32>
    %c1_i32_99 = arith.constant 1 : i32
    %132 = tpu.dynamic_rotate %131 by %c1_i32_99 dim 0 : vector<48x256xf32>, i32 -> vector<48x256xf32>
    %133 = arith.addf %128, %132 : vector<48x256xf32>
    %c2_100 = arith.constant 2 : index
    %c0_101 = arith.constant 0 : index
    %c0_102 = arith.constant 0 : index
    %134 = vector.load %arg8[%c2_100, %c0_101, %c0_102] : memref<5x256x256xbf16, #tpu.memory_space<vmem>>, vector<1x256x256xbf16>
    %135 = vector.shape_cast %134 : vector<1x256x256xbf16> to vector<256x256xbf16>
    %cst_103 = arith.constant dense<0.000000e+00> : vector<48x256xf32>
    %136 = tpu.matmul %124, %135, %cst_103 {dimension_numbers = #tpu.dot_dimension_numbers<[1], [0], [0], [1], [0, 0, 1, 1], [], []>} : vector<48x256xbf16>, vector<256x256xbf16>, vector<48x256xf32> -> vector<48x256xf32>
    %137 = arith.addf %133, %136 : vector<48x256xf32>
    %c3_104 = arith.constant 3 : index
    %c0_105 = arith.constant 0 : index
    %c0_106 = arith.constant 0 : index
    %138 = vector.load %arg8[%c3_104, %c0_105, %c0_106] : memref<5x256x256xbf16, #tpu.memory_space<vmem>>, vector<1x256x256xbf16>
    %139 = vector.shape_cast %138 : vector<1x256x256xbf16> to vector<256x256xbf16>
    %cst_107 = arith.constant dense<0.000000e+00> : vector<48x256xf32>
    %140 = tpu.matmul %124, %139, %cst_107 {dimension_numbers = #tpu.dot_dimension_numbers<[1], [0], [0], [1], [0, 0, 1, 1], [], []>} : vector<48x256xbf16>, vector<256x256xbf16>, vector<48x256xf32> -> vector<48x256xf32>
    %c47_i32_108 = arith.constant 47 : i32
    %141 = tpu.dynamic_rotate %140 by %c47_i32_108 dim 0 : vector<48x256xf32>, i32 -> vector<48x256xf32>
    %142 = arith.addf %137, %141 : vector<48x256xf32>
    %c4_109 = arith.constant 4 : index
    %c0_110 = arith.constant 0 : index
    %c0_111 = arith.constant 0 : index
    %143 = vector.load %arg8[%c4_109, %c0_110, %c0_111] : memref<5x256x256xbf16, #tpu.memory_space<vmem>>, vector<1x256x256xbf16>
    %144 = vector.shape_cast %143 : vector<1x256x256xbf16> to vector<256x256xbf16>
    %cst_112 = arith.constant dense<0.000000e+00> : vector<48x256xf32>
    %145 = tpu.matmul %124, %144, %cst_112 {dimension_numbers = #tpu.dot_dimension_numbers<[1], [0], [0], [1], [0, 0, 1, 1], [], []>} : vector<48x256xbf16>, vector<256x256xbf16>, vector<48x256xf32> -> vector<48x256xf32>
    %c46_i32_113 = arith.constant 46 : i32
    %146 = tpu.dynamic_rotate %145 by %c46_i32_113 dim 0 : vector<48x256xf32>, i32 -> vector<48x256xf32>
    %147 = arith.addf %142, %146 : vector<48x256xf32>
    %c0_114 = arith.constant 0 : index
    %c0_115 = arith.constant 0 : index
    %148 = vector.load %arg9[%c0_114, %c0_115] : memref<1x256xf32, #tpu.memory_space<vmem>>, vector<1x256xf32>
    %149 = vector.broadcast %148 : vector<1x256xf32> to vector<48x256xf32>
    %150 = arith.addf %147, %149 : vector<48x256xf32>
    %cst_116 = arith.constant 0.000000e+00 : f32
    %151 = vector.broadcast %cst_116 : f32 to vector<48x256xf32>
    %152 = arith.maximumf %150, %151 : vector<48x256xf32>
    %153 = vector.broadcast %23 : vector<48x1xf32> to vector<48x256xf32>
    %154 = arith.mulf %152, %153 : vector<48x256xf32>
    %155 = arith.truncf %154 : vector<48x256xf32> to vector<48x256xbf16>
    %c0_117 = arith.constant 0 : index
    %c0_118 = arith.constant 0 : index
    %156 = vector.load %arg10[%c0_117, %c0_118] : memref<256x128xbf16, #tpu.memory_space<vmem>>, vector<256x128xbf16>
    %cst_119 = arith.constant dense<0.000000e+00> : vector<48x128xf32>
    %157 = tpu.matmul %155, %156, %cst_119 {dimension_numbers = #tpu.dot_dimension_numbers<[1], [0], [0], [1], [0, 0, 1, 1], [], []>} : vector<48x256xbf16>, vector<256x128xbf16>, vector<48x128xf32> -> vector<48x128xf32>
    %c0_120 = arith.constant 0 : index
    %c0_121 = arith.constant 0 : index
    %158 = vector.load %arg11[%c0_120, %c0_121] : memref<1x128xf32, #tpu.memory_space<vmem>>, vector<1x128xf32>
    %159 = vector.broadcast %158 : vector<1x128xf32> to vector<48x128xf32>
    %160 = arith.addf %157, %159 : vector<48x128xf32>
    %cst_122 = arith.constant dense<0xFF800000> : vector<48xf32>
    %161 = vector.multi_reduction <maximumf>, %160, %cst_122 [1] : vector<48x128xf32> to vector<48xf32>
    %162 = vector.shape_cast %161 : vector<48xf32> to vector<48x1xf32>
    %163 = vector.broadcast %162 : vector<48x1xf32> to vector<48x128xf32>
    %164 = arith.subf %160, %163 : vector<48x128xf32>
    %165 = math.exp %164 : vector<48x128xf32>
    %cst_123 = arith.constant dense<0.000000e+00> : vector<48xf32>
    %166 = vector.multi_reduction <add>, %165, %cst_123 [1] : vector<48x128xf32> to vector<48xf32>
    %167 = vector.shape_cast %166 : vector<48xf32> to vector<48x1xf32>
    %168 = tpu.reciprocal %167 {approx = true} : vector<48x1xf32> -> vector<48x1xf32>
    %169 = vector.broadcast %168 : vector<48x1xf32> to vector<48x128xf32>
    %170 = arith.mulf %165, %169 : vector<48x128xf32>
    %c0_124 = arith.constant 0 : index
    %c0_125 = arith.constant 0 : index
    %c0_126 = arith.constant 0 : index
    %171 = vector.load %arg12[%c0_124, %c0_125, %c0_126] : memref<1x48x128xf32, #tpu.memory_space<vmem>>, vector<1x48x128xf32>
    %172 = vector.shape_cast %171 : vector<1x48x128xf32> to vector<48x128xf32>
    %173 = vector.shape_cast %170 : vector<48x128xf32> to vector<1x48x128xf32>
    tpu.vector_store %arg12[%c0_124, %c0_125, %c0_126], %173 {strides = array<i32>} : memref<1x48x128xf32, #tpu.memory_space<vmem>>, vector<1x48x128xf32>,
    return
  }
  func.func @transform_0(%arg0: i32) -> (i32, i32, i32) {
    %c0_i32 = arith.constant 0 : i32
    %c0_i32_0 = arith.constant 0 : i32
    %c0_i32_1 = arith.constant 0 : i32
    return %arg0, %c0_i32, %c0_i32_0 : i32, i32, i32
  }
  func.func @transform_1(%arg0: i32) -> (i32, i32, i32) {
    %c0_i32 = arith.constant 0 : i32
    %c0_i32_0 = arith.constant 0 : i32
    %c0_i32_1 = arith.constant 0 : i32
    %c0_i32_2 = arith.constant 0 : i32
    return %c0_i32, %c0_i32_0, %c0_i32_1 : i32, i32, i32
  }
  func.func @transform_2(%arg0: i32) -> (i32, i32) {
    %c0_i32 = arith.constant 0 : i32
    %c0_i32_0 = arith.constant 0 : i32
    %c0_i32_1 = arith.constant 0 : i32
    return %c0_i32, %c0_i32_0 : i32, i32
  }
  func.func @transform_3(%arg0: i32) -> (i32, i32, i32) {
    %c0_i32 = arith.constant 0 : i32
    %c0_i32_0 = arith.constant 0 : i32
    %c0_i32_1 = arith.constant 0 : i32
    %c0_i32_2 = arith.constant 0 : i32
    return %c0_i32, %c0_i32_0, %c0_i32_1 : i32, i32, i32
  }
  func.func @transform_4(%arg0: i32) -> (i32, i32) {
    %c0_i32 = arith.constant 0 : i32
    %c0_i32_0 = arith.constant 0 : i32
    %c0_i32_1 = arith.constant 0 : i32
    return %c0_i32, %c0_i32_0 : i32, i32
  }
  func.func @transform_5(%arg0: i32) -> (i32, i32, i32) {
    %c0_i32 = arith.constant 0 : i32
    %c0_i32_0 = arith.constant 0 : i32
    %c0_i32_1 = arith.constant 0 : i32
    %c0_i32_2 = arith.constant 0 : i32
    return %c0_i32, %c0_i32_0, %c0_i32_1 : i32, i32, i32
  }
  func.func @transform_6(%arg0: i32) -> (i32, i32) {
    %c0_i32 = arith.constant 0 : i32
    %c0_i32_0 = arith.constant 0 : i32
    %c0_i32_1 = arith.constant 0 : i32
    return %c0_i32, %c0_i32_0 : i32, i32
  }
  func.func @transform_7(%arg0: i32) -> (i32, i32, i32) {
    %c0_i32 = arith.constant 0 : i32
    %c0_i32_0 = arith.constant 0 : i32
    %c0_i32_1 = arith.constant 0 : i32
    %c0_i32_2 = arith.constant 0 : i32
    return %c0_i32, %c0_i32_0, %c0_i32_1 : i32, i32, i32
  }
  func.func @transform_8(%arg0: i32) -> (i32, i32) {
    %c0_i32 = arith.constant 0 : i32
    %c0_i32_0 = arith.constant 0 : i32
    %c0_i32_1 = arith.constant 0 : i32
    return %c0_i32, %c0_i32_0 : i32, i32
  }
  func.func @transform_9(%arg0: i32) -> (i32, i32) {
    %c0_i32 = arith.constant 0 : i32
    %c0_i32_0 = arith.constant 0 : i32
    %c0_i32_1 = arith.constant 0 : i32
    return %c0_i32, %c0_i32_0 : i32, i32
  }
  func.func @transform_10(%arg0: i32) -> (i32, i32) {
    %c0_i32 = arith.constant 0 : i32
    %c0_i32_0 = arith.constant 0 : i32
    %c0_i32_1 = arith.constant 0 : i32
    return %c0_i32, %c0_i32_0 : i32, i32
  }
  func.func @transform_11(%arg0: i32) -> (i32, i32, i32) {
    %c0_i32 = arith.constant 0 : i32
    %c0_i32_0 = arith.constant 0 : i32
    %c0_i32_1 = arith.constant 0 : i32
    return %arg0, %c0_i32, %c0_i32_0 : i32, i32, i32
  }
}

</mosaic_0001>

<bundles_post_ra>
// kernel: decnn_pallas_forward.1
= control target key start
LH: loop header
LB: loop body
LE: loop exit
PB: predicated region body
PF: predicated region fallthrough
CT: control target
= control target key end

     0   :  { %s11068_s17 = smov 0   ;;  %s14867_s0 = inlined_call_operand.vmem [shape: bf16[2,48,512], index: 0, kind: input, shape index: {}]   ;;  %s14868_s1 = inlined_call_operand.vmem [shape: bf16[5,512,256], index: 1, kind: input, shape index: {}]   ;;  %s14869_s2 = inlined_call_operand.vmem [shape: f32[1,256], index: 2, kind: input, shape index: {}]   ;;  %s14870_s3 = inlined_call_operand.vmem [shape: bf16[5,256,256], index: 3, kind: input, shape index: {}]   ;;  %s14871_s4 = inlined_call_operand.vmem [shape: f32[1,256], index: 4, kind: input, shape index: {}]   ;;  %s14872_s5 = inlined_call_operand.vmem [shape: bf16[5,256,256], index: 5, kind: input, shape index: {}]   ;;  %s14873_s6 = inlined_call_operand.vmem [shape: f32[1,256], index: 6, kind: input, shape index: {}]   ;;  %s14874_s7 = inlined_call_operand.vmem [shape: bf16[5,256,256], index: 7, kind: input, shape index: {}]   ;;  %s14875_s8 = inlined_call_operand.vmem [shape: f32[1,256], index: 8, kind: input, shape index: {}]   ;;  %s14876_s9 = inlined_call_operand.vmem [shape: bf16[256,128], index: 9, kind: input, shape index: {}]   ;;  %s14877_s10 = inlined_call_operand.vmem [shape: f32[1,128], index: 10, kind: input, shape index: {}]   ;;  %s14878_s11 = inlined_call_operand.vmem [shape: f32[2,48,128], index: 11, kind: output, shape index: {}]  }
   0x1 LB: > { %s8123_s18 = sadd.s32 4294967295, %s11005_s17   ;;  %p8127_p0 = scmp.ge.s32.totalorder %s11005_s17, 1  ;;  %s11005_s17 = sphi %s11068_s17, %s21_s17  }
   0x2   : > { %p337_p1 = scmp.lt.s32.totalorder %s11005_s17, 3 }
   0x4   : > { %p338_p2 = pnand %p8127_p0, %p337_p1 }
   0x5   : > { %v9724_v0 = vld [vmem:[%s14868_s1 + $0x4] ss:$8 sps:$4 sm:$0xff] (!%p338_p2)   ;;  %v9728_v2 = vld [vmem:[%s14868_s1] ss:$8 sps:$4 sm:$0xff] (!%p338_p2)   ;;  %v9730_v4 = vld [vmem:[%s14868_s1 + $0x14] ss:$8 sps:$4 sm:$0xff] (!%p338_p2)  }
   0x6   : > { %341 = sbr.rel (%p338_p2) target bundleno = 2272 (0x8e0), region = 64  ;;  %v9726_v1 = vld [vmem:[%s14868_s1 + $0x204] ss:$8 sps:$4 sm:$0xff] (!%p338_p2)   ;;  %977 = vmatprep.subr.bf16.mxu0 (!%p338_p2), %v9724_v0  ;;  %v9729_v3 = vld [vmem:[%s14868_s1 + $0x200] ss:$8 sps:$4 sm:$0xff] (!%p338_p2)   ;;  %p377_p3 = scmp.lt.s32.totalorder (!%p338_p2), %s8123_s18, 1 }
   0x7   : > { %1513 = vmatprep.subr.bf16.mxu1 (!%p338_p2), %v9726_v1  ;;  %978 = vmatpush1.bf16.msra.mxu0 (!%p338_p2), %v9728_v2  ;;  %v9732_v5 = vld [vmem:[%s14868_s1 + $0x214] ss:$8 sps:$4 sm:$0xff] (!%p338_p2)   ;;  %v9734_v6 = vld [vmem:[%s14868_s1 + $0x10] ss:$8 sps:$4 sm:$0xff] (!%p338_p2)   ;;  %v9736_v8 = vld [vmem:[%s14868_s1 + $0x24] ss:$8 sps:$4 sm:$0xff] (!%p338_p2)  }
   0x8   : > { %1514 = vmatpush1.bf16.msra.mxu1 (!%p338_p2), %v9729_v3  ;;  %979 = vmatprep.subr.bf16.mxu0 (!%p338_p2), %v9730_v4  ;;  %v9735_v7 = vld [vmem:[%s14868_s1 + $0x210] ss:$8 sps:$4 sm:$0xff] (!%p338_p2)   ;;  %v9738_v9 = vld [vmem:[%s14868_s1 + $0x224] ss:$8 sps:$4 sm:$0xff] (!%p338_p2)   ;;  %v9740_v10 = vld [vmem:[%s14868_s1 + $0x20] ss:$8 sps:$4 sm:$0xff] (!%p338_p2)  }
   0x9   : > { %1515 = vmatprep.subr.bf16.mxu1 (!%p338_p2), %v9732_v5  ;;  %v9741_v11 = vld [vmem:[%s14868_s1 + $0x220] ss:$8 sps:$4 sm:$0xff] (!%p338_p2)   ;;  %v9742_v12 = vld [vmem:[%s14868_s1 + $0x34] ss:$8 sps:$4 sm:$0xff] (!%p338_p2)   ;;  %v9746_v14 = vld [vmem:[%s14868_s1 + $0x30] ss:$8 sps:$4 sm:$0xff] (!%p338_p2)  }
   0xa   : > { %v9744_v13 = vld [vmem:[%s14868_s1 + $0x234] ss:$8 sps:$4 sm:$0xff] (!%p338_p2)   ;;  %v9747_v15 = vld [vmem:[%s14868_s1 + $0x230] ss:$8 sps:$4 sm:$0xff] (!%p338_p2)   ;;  %v9748_v16 = vld [vmem:[%s14868_s1 + $0x44] ss:$8 sps:$4 sm:$0xff] (!%p338_p2)  }
   0xb   : > { %980 = vmatpush1.bf16.msra.mxu0 (!%p338_p2), %v9734_v6  ;;  %v9750_v17 = vld [vmem:[%s14868_s1 + $0x244] ss:$8 sps:$4 sm:$0xff] (!%p338_p2)   ;;  %v9752_v18 = vld [vmem:[%s14868_s1 + $0x40] ss:$8 sps:$4 sm:$0xff] (!%p338_p2)   ;;  %v9754_v20 = vld [vmem:[%s14868_s1 + $0x54] ss:$8 sps:$4 sm:$0xff] (!%p338_p2)  }
   0xc   : > { %1516 = vmatpush1.bf16.msra.mxu1 (!%p338_p2), %v9735_v7  ;;  %981 = vmatprep.subr.bf16.mxu0 (!%p338_p2), %v9736_v8  ;;  %v9753_v19 = vld [vmem:[%s14868_s1 + $0x240] ss:$8 sps:$4 sm:$0xff] (!%p338_p2)   ;;  %v9756_v21 = vld [vmem:[%s14868_s1 + $0x254] ss:$8 sps:$4 sm:$0xff] (!%p338_p2)   ;;  %v9758_v22 = vld [vmem:[%s14868_s1 + $0x50] ss:$8 sps:$4 sm:$0xff] (!%p338_p2)  }
   0xd   : > { %1517 = vmatprep.subr.bf16.mxu1 %v9738_v9  ;;  %v9759_v23 = vld [vmem:[%s14868_s1 + $0x250] ss:$8 sps:$4 sm:$0xff]   ;;  %v9760_v24 = vld [vmem:[%s14868_s1 + $0x64] ss:$8 sps:$4 sm:$0xff]   ;;  %v9764_v26 = vld [vmem:[%s14868_s1 + $0x60] ss:$8 sps:$4 sm:$0xff]  }
   0xe   : > { %v9762_v25 = vld [vmem:[%s14868_s1 + $0x264] ss:$8 sps:$4 sm:$0xff]   ;;  %v9765_v27 = vld [vmem:[%s14868_s1 + $0x260] ss:$8 sps:$4 sm:$0xff]   ;;  %v9766_v28 = vld [vmem:[%s14868_s1 + $0x74] ss:$8 sps:$4 sm:$0xff]  }
   0xf   : > { %982 = vmatpush1.bf16.msra.mxu0 %v9740_v10  ;;  %v9768_v29 = vld [vmem:[%s14868_s1 + $0x274] ss:$8 sps:$4 sm:$0xff]   ;;  %v9770_v30 = vld [vmem:[%s14868_s1 + $0x70] ss:$8 sps:$4 sm:$0xff]   ;;  %v9772_v32 = vld [vmem:[%s14868_s1 + $0x84] ss:$8 sps:$4 sm:$0xff]  }
  0x10   : > { %1518 = vmatpush1.bf16.msra.mxu1 %v9741_v11  ;;  %983 = vmatprep.subr.bf16.mxu0 %v9742_v12  ;;  %v9771_v31 = vld [vmem:[%s14868_s1 + $0x270] ss:$8 sps:$4 sm:$0xff]   ;;  %v9774_v33 = vld [vmem:[%s14868_s1 + $0x284] ss:$8 sps:$4 sm:$0xff]   ;;  %v9776_v34 = vld [vmem:[%s14868_s1 + $0x80] ss:$8 sps:$4 sm:$0xff]  }
  0x11   : > { %1519 = vmatprep.subr.bf16.mxu1 %v9744_v13  ;;  %v9777_v35 = vld [vmem:[%s14868_s1 + $0x280] ss:$8 sps:$4 sm:$0xff]   ;;  %v9778_v36 = vld [vmem:[%s14868_s1 + $0x94] ss:$8 sps:$4 sm:$0xff]   ;;  %s14894_s18 = smov (!%p377_p3, %s8123_s18), 1 }
  0x12   : > { %v9780_v37 = vld [vmem:[%s14868_s1 + $0x294] ss:$8 sps:$4 sm:$0xff]   ;;  %v9782_v38 = vld [vmem:[%s14868_s1 + $0x90] ss:$8 sps:$4 sm:$0xff]   ;;  %v9784_v40 = vld [vmem:[%s14868_s1 + $0xa4] ss:$8 sps:$4 sm:$0xff]  }
  0x13   : > { %984 = vmatpush1.bf16.msra.mxu0 %v9746_v14  ;;  %v9783_v39 = vld [vmem:[%s14868_s1 + $0x290] ss:$8 sps:$4 sm:$0xff]   ;;  %s9701_s14 = smul.u32 96, %s14894_s18  ;;  %v9786_v41 = vld [vmem:[%s14868_s1 + $0x2a4] ss:$8 sps:$4 sm:$0xff]  }
  0x14   : > { %1520 = vmatpush1.bf16.msra.mxu1 %v9747_v15  ;;  %985 = vmatprep.subr.bf16.mxu0 %v9748_v16  ;;  %v9788_v42 = vld [vmem:[%s14868_s1 + $0xa0] ss:$8 sps:$4 sm:$0xff]   ;;  %v9790_v44 = vld [vmem:[%s14868_s1 + $0xb4] ss:$8 sps:$4 sm:$0xff]   ;;  %v9794_v46 = vld [vmem:[%s14868_s1 + $0xb0] ss:$8 sps:$4 sm:$0xff]  }
  0x15   : > { %1521 = vmatprep.subr.bf16.mxu1 %v9750_v17  ;;  %v9789_v43 = vld [vmem:[%s14868_s1 + $0x2a0] ss:$8 sps:$4 sm:$0xff]   ;;  %s11221_s27 = scalar_lea.vmem %s14867_s0, %s9701_s14  ;;  %v9792_v45 = vld [vmem:[%s14868_s1 + $0x2b4] ss:$8 sps:$4 sm:$0xff]   ;;  %v9795_v48 = vld [vmem:[%s14868_s1 + $0x2b0] ss:$8 sps:$4 sm:$0xff]  }
  0x16   : > { %v11230_v47 = vld [vmem:[%s11221_s27 + $0x4] ss:$16 sps:$4 sm:$0xff]   ;;  %v9800_v51 = vld [vmem:[%s14868_s1 + $0xc0] ss:$8 sps:$4 sm:$0xff]   ;;  %v9806_v55 = vld [vmem:[%s14868_s1 + $0xd0] ss:$8 sps:$4 sm:$0xff]  }
  0x17   : > { %986 = vmatpush1.bf16.msra.mxu0 %v9752_v18  ;;  %v9796_v49 = vld [vmem:[%s14868_s1 + $0xc4] ss:$8 sps:$4 sm:$0xff]   ;;  %1009 = vmatprep.mubr.bf16.mxu0 %v11230_v47  ;;  %v9801_v52 = vld [vmem:[%s14868_s1 + $0x2c0] ss:$8 sps:$4 sm:$0xff]   ;;  %v9802_v53 = vld [vmem:[%s14868_s1 + $0xd4] ss:$8 sps:$4 sm:$0xff]  }
  0x18   : > { %1522 = vmatpush1.bf16.msra.mxu1 %v9753_v19  ;;  %987 = vmatprep.subr.bf16.mxu0 %v9754_v20  ;;  %v9798_v50 = vld [vmem:[%s14868_s1 + $0x2c4] ss:$8 sps:$4 sm:$0xff]   ;;  %v9804_v54 = vld [vmem:[%s14868_s1 + $0x2d4] ss:$8 sps:$4 sm:$0xff]   ;;  %v9807_v56 = vld [vmem:[%s14868_s1 + $0x2d0] ss:$8 sps:$4 sm:$0xff]  }
  0x19   : > { %1523 = vmatprep.subr.bf16.mxu1 %v9756_v21  ;;  %1545 = vmatprep.mubr.bf16.mxu1 %v11230_v47  ;;  %v9808_v57 = vld [vmem:[%s14868_s1 + $0xe4] ss:$8 sps:$4 sm:$0xff]   ;;  %v9812_v59 = vld [vmem:[%s14868_s1 + $0xe0] ss:$8 sps:$4 sm:$0xff]   ;;  %v9814_v61 = vld [vmem:[%s14868_s1 + $0xf4] ss:$8 sps:$4 sm:$0xff]  }
  0x1a   : > { %v9810_v58 = vld [vmem:[%s14868_s1 + $0x2e4] ss:$8 sps:$4 sm:$0xff]   ;;  %v9813_v60 = vld [vmem:[%s14868_s1 + $0x2e0] ss:$8 sps:$4 sm:$0xff]   ;;  %v9816_v62 = vld [vmem:[%s14868_s1 + $0x2f4] ss:$8 sps:$4 sm:$0xff]  }
  0x1b   : > { %988 = vmatpush1.bf16.msra.mxu0 %v9758_v22  ;;  %v9818_v63 = vld [vmem:[%s14868_s1 + $0xf0] ss:$8 sps:$4 sm:$0xff]   ;;  %v9824_v1 = vld [vmem:[%s14868_s1 + $0x104] ss:$8 sps:$4 sm:$0xff]   ;;  %v9822_v3 = vld [vmem:[%s14868_s1 + $0x100] ss:$8 sps:$4 sm:$0xff]  }
  0x1c   : > { %1524 = vmatpush1.bf16.msra.mxu1 %v9759_v23  ;;  %989 = vmatprep.subr.bf16.mxu0 %v9760_v24  ;;  %v9819_v0 = vld [vmem:[%s14868_s1 + $0x2f0] ss:$8 sps:$4 sm:$0xff]   ;;  %v9827_v2 = vld [vmem:[%s14868_s1 + $0x304] ss:$8 sps:$4 sm:$0xff]   ;;  %v9825_v4 = vld [vmem:[%s14868_s1 + $0x300] ss:$8 sps:$4 sm:$0xff]  }
  0x1d   : > { %1525 = vmatprep.subr.bf16.mxu1 %v9762_v25  ;;  %v11298_v5 = vld [vmem:[%s11221_s27] ss:$16 sps:$4 sm:$0xff]   ;;  %v9831_v6 = vld [vmem:[%s14868_s1 + $0x114] ss:$8 sps:$4 sm:$0xff]   ;;  %v9837_v10 = vld [vmem:[%s14868_s1 + $0x124] ss:$8 sps:$4 sm:$0xff]  }
  0x1e   : > { %v9834_v7 = vld [vmem:[%s14868_s1 + $0x314] ss:$8 sps:$4 sm:$0xff]   ;;  %v9829_v8 = vld [vmem:[%s14868_s1 + $0x110] ss:$8 sps:$4 sm:$0xff]   ;;  %v9840_v11 = vld [vmem:[%s14868_s1 + $0x324] ss:$8 sps:$4 sm:$0xff]  }
  0x1f   : > { %990 = vmatpush1.bf16.msra.mxu0 %v9764_v26  ;;  %v9832_v9 = vld [vmem:[%s14868_s1 + $0x310] ss:$8 sps:$4 sm:$0xff]   ;;  %v9835_v12 = vld [vmem:[%s14868_s1 + $0x120] ss:$8 sps:$4 sm:$0xff]   ;;  %v9843_v14 = vld [vmem:[%s14868_s1 + $0x134] ss:$8 sps:$4 sm:$0xff]  }
  0x20   : > { %1526 = vmatpush1.bf16.msra.mxu1 %v9765_v27  ;;  %991 = vmatprep.subr.bf16.mxu0 %v9766_v28  ;;  %v9838_v13 = vld [vmem:[%s14868_s1 + $0x320] ss:$8 sps:$4 sm:$0xff]   ;;  %v9846_v15 = vld [vmem:[%s14868_s1 + $0x334] ss:$8 sps:$4 sm:$0xff]   ;;  %v9841_v16 = vld [vmem:[%s14868_s1 + $0x130] ss:$8 sps:$4 sm:$0xff]  }
  0x21   : > { %1527 = vmatprep.subr.bf16.mxu1 %v9768_v29  ;;  %v9844_v17 = vld [vmem:[%s14868_s1 + $0x330] ss:$8 sps:$4 sm:$0xff]   ;;  %v9849_v18 = vld [vmem:[%s14868_s1 + $0x144] ss:$8 sps:$4 sm:$0xff]   ;;  %v9847_v22 = vld [vmem:[%s14868_s1 + $0x140] ss:$8 sps:$4 sm:$0xff]  }
  0x22   : > { %v9852_v19 = vld [vmem:[%s14868_s1 + $0x344] ss:$8 sps:$4 sm:$0xff]   ;;  %v11348_v21 = vld [vmem:[%s11221_s27 + $0x20] ss:$16 sps:$4 sm:$0xff]   ;;  %v9855_v24 = vld [vmem:[%s14868_s1 + $0x154] ss:$8 sps:$4 sm:$0xff]  }
  0x23   : > { %992 = vmatpush1.bf16.msra.mxu0 %v9770_v30  ;;  %v11345_v20 = vld [vmem:[%s11221_s27 + $0x24] ss:$16 sps:$4 sm:$0xff]   ;;  %v9850_v23 = vld [vmem:[%s14868_s1 + $0x340] ss:$8 sps:$4 sm:$0xff]   ;;  %v9853_v26 = vld [vmem:[%s14868_s1 + $0x150] ss:$8 sps:$4 sm:$0xff]  }
  0x24   : > { %1528 = vmatpush1.bf16.msra.mxu1 %v9771_v31  ;;  %993 = vmatprep.subr.bf16.mxu0 %v9772_v32  ;;  %v9858_v25 = vld [vmem:[%s14868_s1 + $0x354] ss:$8 sps:$4 sm:$0xff]   ;;  %v9856_v27 = vld [vmem:[%s14868_s1 + $0x350] ss:$8 sps:$4 sm:$0xff]   ;;  %v9861_v30 = vld [vmem:[%s14868_s1 + $0x164] ss:$8 sps:$4 sm:$0xff]  }
  0x25   : > { %1529 = vmatprep.subr.bf16.mxu1 %v9774_v33  ;;  %v11373_v28 = vld [vmem:[%s11221_s27 + $0x44] ss:$16 sps:$4 sm:$0xff]   ;;  %v11376_v29 = vld [vmem:[%s11221_s27 + $0x40] ss:$16 sps:$4 sm:$0xff]   ;;  %s9702_s20 = smul.u32 48, %s14894_s18 }
  0x26   : > { %v9864_v31 = vld [vmem:[%s14868_s1 + $0x364] ss:$8 sps:$4 sm:$0xff]   ;;  %v9859_v32 = vld [vmem:[%s14868_s1 + $0x160] ss:$8 sps:$4 sm:$0xff]  }
  0x27   : > { %994 = vmatpush1.bf16.msra.mxu0 %v9776_v34  ;;  %v9862_v33 = vld [vmem:[%s14868_s1 + $0x360] ss:$8 sps:$4 sm:$0xff]   ;;  %v9867_v34 = vld [vmem:[%s14868_s1 + $0x174] ss:$8 sps:$4 sm:$0xff]   ;;  %s386_s23 = scalar_lea.vmem %s14878_s11, %s9702_s20 }
  0x28   : > { %1530 = vmatpush1.bf16.msra.mxu1 %v9777_v35  ;;  %995 = vmatprep.subr.bf16.mxu0 %v9778_v36  ;;  %v9870_v35 = vld [vmem:[%s14868_s1 + $0x374] ss:$8 sps:$4 sm:$0xff]  }
  0x29   : > { %1531 = vmatprep.subr.bf16.mxu1 %v9780_v37  ;;  %v11401_v36 = vld [vmem:[%s11221_s27 + $0xc] ss:$16 sps:$4 sm:$0xff]   ;;  %v9865_v37 = vld [vmem:[%s14868_s1 + $0x170] ss:$8 sps:$4 sm:$0xff]  }
  0x2b   : > { %996 = vmatpush1.bf16.msra.mxu0 %v9782_v38  ;;  %v9868_v38 = vld [vmem:[%s14868_s1 + $0x370] ss:$8 sps:$4 sm:$0xff]  }
  0x2c   : > { %1532 = vmatpush1.bf16.msra.mxu1 %v9783_v39  ;;  %997 = vmatprep.subr.bf16.mxu0 %v9784_v40  ;;  %v9873_v39 = vld [vmem:[%s14868_s1 + $0x184] ss:$8 sps:$4 sm:$0xff]  }
  0x2d   : > { %1533 = vmatprep.subr.bf16.mxu1 %v9786_v41  ;;  %v9876_v40 = vld [vmem:[%s14868_s1 + $0x384] ss:$8 sps:$4 sm:$0xff]   ;;  %v9871_v41 = vld [vmem:[%s14868_s1 + $0x180] ss:$8 sps:$4 sm:$0xff]  }
  0x2f   : > { %998 = vmatpush1.bf16.msra.mxu0 %v9788_v42  ;;  %v9874_v42 = vld [vmem:[%s14868_s1 + $0x380] ss:$8 sps:$4 sm:$0xff]  }
  0x30   : > { %1534 = vmatpush1.bf16.msra.mxu1 %v9789_v43  ;;  %999 = vmatprep.subr.bf16.mxu0 %v9790_v44  ;;  %v9879_v43 = vld [vmem:[%s14868_s1 + $0x194] ss:$8 sps:$4 sm:$0xff]  }
  0x31   : > { %1535 = vmatprep.subr.bf16.mxu1 %v9792_v45  ;;  %v9882_v44 = vld [vmem:[%s14868_s1 + $0x394] ss:$8 sps:$4 sm:$0xff]   ;;  %v9877_v45 = vld [vmem:[%s14868_s1 + $0x190] ss:$8 sps:$4 sm:$0xff]  }
  0x33   : > { %1000 = vmatpush1.bf16.msra.mxu0 %v9794_v46  ;;  %v9880_v46 = vld [vmem:[%s14868_s1 + $0x390] ss:$8 sps:$4 sm:$0xff]  }
  0x34   : > { %1536 = vmatpush1.bf16.msra.mxu1 %v9795_v48  ;;  %1001 = vmatprep.subr.bf16.mxu0 %v9796_v49  ;;  %v9885_v48 = vld [vmem:[%s14868_s1 + $0x1a4] ss:$8 sps:$4 sm:$0xff]  }
  0x35   : > { %1537 = vmatprep.subr.bf16.mxu1 %v9798_v50  ;;  %v9888_v49 = vld [vmem:[%s14868_s1 + $0x3a4] ss:$8 sps:$4 sm:$0xff]   ;;  %v9883_v50 = vld [vmem:[%s14868_s1 + $0x1a0] ss:$8 sps:$4 sm:$0xff]  }
  0x37   : > { %1002 = vmatpush1.bf16.msra.mxu0 %v9800_v51  ;;  %v9886_v51 = vld [vmem:[%s14868_s1 + $0x3a0] ss:$8 sps:$4 sm:$0xff]  }
  0x38   : > { %1538 = vmatpush1.bf16.msra.mxu1 %v9801_v52  ;;  %1003 = vmatprep.subr.bf16.mxu0 %v9802_v53  ;;  %v9891_v52 = vld [vmem:[%s14868_s1 + $0x1b4] ss:$8 sps:$4 sm:$0xff]  }
  0x39   : > { %1539 = vmatprep.subr.bf16.mxu1 %v9804_v54  ;;  %v9894_v53 = vld [vmem:[%s14868_s1 + $0x3b4] ss:$8 sps:$4 sm:$0xff]   ;;  %v9889_v54 = vld [vmem:[%s14868_s1 + $0x1b0] ss:$8 sps:$4 sm:$0xff]  }
  0x3b   : > { %1004 = vmatpush1.bf16.msra.mxu0 %v9806_v55  ;;  %v9892_v55 = vld [vmem:[%s14868_s1 + $0x3b0] ss:$8 sps:$4 sm:$0xff]  }
  0x3c   : > { %1540 = vmatpush1.bf16.msra.mxu1 %v9807_v56  ;;  %1005 = vmatprep.subr.bf16.mxu0 %v9808_v57  ;;  %v9900_v56 = vld [vmem:[%s14868_s1 + $0x1c4] ss:$8 sps:$4 sm:$0xff]  }
  0x3d   : > { %1541 = vmatprep.subr.bf16.mxu1 %v9810_v58  ;;  %v9903_v57 = vld [vmem:[%s14868_s1 + $0x3c4] ss:$8 sps:$4 sm:$0xff]   ;;  %v9898_v58 = vld [vmem:[%s14868_s1 + $0x1c0] ss:$8 sps:$4 sm:$0xff]  }
  0x3f   : > { %1006 = vmatpush1.bf16.msra.mxu0 %v9812_v59  ;;  %v9901_v59 = vld [vmem:[%s14868_s1 + $0x3c0] ss:$8 sps:$4 sm:$0xff]  }
  0x40   : > { %1542 = vmatpush1.bf16.msra.mxu1 %v9813_v60  ;;  %1007 = vmatprep.subr.bf16.mxu0 %v9814_v61  ;;  %v9906_v60 = vld [vmem:[%s14868_s1 + $0x1d4] ss:$8 sps:$4 sm:$0xff]  }
  0x41   : > { %1543 = vmatprep.subr.bf16.mxu1 %v9816_v62  ;;  %v9909_v61 = vld [vmem:[%s14868_s1 + $0x3d4] ss:$8 sps:$4 sm:$0xff]   ;;  %v9904_v62 = vld [vmem:[%s14868_s1 + $0x1d0] ss:$8 sps:$4 sm:$0xff]  }
  0x43   : > { %1008 = vmatpush1.bf16.msra.mxu0 %v9818_v63  ;;  %v9907_v63 = vld [vmem:[%s14868_s1 + $0x3d0] ss:$8 sps:$4 sm:$0xff]  }
  0x44   : > { %1544 = vmatpush1.bf16.msra.mxu1 %v9819_v0  ;;  %1040 = vmatprep.subr.bf16.mxu0 %v9824_v1  ;;  %v9915_v0 = vld [vmem:[%s14868_s1 + $0x1e4] ss:$8 sps:$4 sm:$0xff]  }
  0x45   : > { %1576 = vmatprep.subr.bf16.mxu1 %v9827_v2  ;;  %v9918_v1 = vld [vmem:[%s14868_s1 + $0x3e4] ss:$8 sps:$4 sm:$0xff]   ;;  %v9913_v2 = vld [vmem:[%s14868_s1 + $0x1e0] ss:$8 sps:$4 sm:$0xff]  }
  0x46   : > { %1010 = vmatmul.mubr.bf16.vlgmr.msra.gmra.mrb[0].mxu0 %v11298_v5 }
  0x47   : > { %1546 = vmatmul.mubr.bf16.vlgmr.msra.gmra.mrb[0].mxu1 %v11298_v5  ;;  %1041 = vmatpush1.bf16.msra.mxu0 %v9822_v3  ;;  %v9916_v3 = vld [vmem:[%s14868_s1 + $0x3e0] ss:$8 sps:$4 sm:$0xff]  }
  0x48   : > { %1577 = vmatpush1.bf16.msra.mxu1 %v9825_v4  ;;  %1042 = vmatprep.subr.bf16.mxu0 %v9831_v6  ;;  %v9921_v4 = vld [vmem:[%s14868_s1 + $0x1f4] ss:$8 sps:$4 sm:$0xff]  }
  0x49   : > { %1578 = vmatprep.subr.bf16.mxu1 %v9834_v7  ;;  %1019 = vmatprep.mubr.bf16.mxu0 %v11345_v20  ;;  %v9924_v6 = vld [vmem:[%s14868_s1 + $0x3f4] ss:$8 sps:$4 sm:$0xff]   ;;  %v9919_v7 = vld [vmem:[%s14868_s1 + $0x1f0] ss:$8 sps:$4 sm:$0xff]  }
  0x4a   : > { %1555 = vmatprep.mubr.bf16.mxu1 %v11345_v20 }
  0x4b   : > { %1043 = vmatpush1.bf16.msra.mxu0 %v9829_v8  ;;  %v9922_v8 = vld [vmem:[%s14868_s1 + $0x3f0] ss:$8 sps:$4 sm:$0xff]  }
  0x4c   : > { %1579 = vmatpush1.bf16.msra.mxu1 %v9832_v9  ;;  %1044 = vmatprep.subr.bf16.mxu0 %v9837_v10  ;;  %v9930_v9 = vld [vmem:[%s14868_s1 + $0x404] ss:$8 sps:$4 sm:$0xff]  }
  0x4d   : > { %1580 = vmatprep.subr.bf16.mxu1 %v9840_v11  ;;  %v9933_v10 = vld [vmem:[%s14868_s1 + $0x604] ss:$8 sps:$4 sm:$0xff]   ;;  %v9927_v11 = vld [vmem:[%s11221_s27 + $0x8] ss:$16 sps:$4 sm:$0xff]  }
  0x4e   : > { %1020 = vmatmul.mubr.bf16.gmra.mrb[4].mxu0 %v11348_v21 }
  0x4f   : > { %1045 = vmatpush1.bf16.msra.mxu0 %v9835_v12  ;;  %1556 = vmatmul.mubr.bf16.gmra.mrb[4].mxu1 %v11348_v21  ;;  %v9928_v12 = vld [vmem:[%s14868_s1 + $0x400] ss:$8 sps:$4 sm:$0xff]  }
  0x50   : > { %1581 = vmatpush1.bf16.msra.mxu1 %v9838_v13  ;;  %1046 = vmatprep.subr.bf16.mxu0 %v9843_v14  ;;  %v9931_v13 = vld [vmem:[%s14868_s1 + $0x600] ss:$8 sps:$4 sm:$0xff]   ;;  %v9936_v14 = vld [vmem:[%s14868_s1 + $0x414] ss:$8 sps:$4 sm:$0xff]  }
  0x51   : > { %1582 = vmatprep.subr.bf16.mxu1 %v9846_v15  ;;  %1029 = vmatprep.mubr.bf16.mxu0 %v11373_v28  ;;  %v9939_v15 = vld [vmem:[%s14868_s1 + $0x614] ss:$8 sps:$4 sm:$0xff]  }
  0x52   : > { %1565 = vmatprep.mubr.bf16.mxu1 %v11373_v28 }
  0x53   : > { %1047 = vmatpush1.bf16.msra.mxu0 %v9841_v16  ;;  %v9940_v16 = vld [vmem:[%s11221_s27 + $0x2c] ss:$16 sps:$4 sm:$0xff]  }
  0x54   : > { %1583 = vmatpush1.bf16.msra.mxu1 %v9844_v17  ;;  %1048 = vmatprep.subr.bf16.mxu0 %v9849_v18  ;;  %v9934_v17 = vld [vmem:[%s14868_s1 + $0x410] ss:$8 sps:$4 sm:$0xff]  }
  0x55   : > { %1584 = vmatprep.subr.bf16.mxu1 %v9852_v19  ;;  %v9937_v18 = vld [vmem:[%s14868_s1 + $0x610] ss:$8 sps:$4 sm:$0xff]   ;;  %v9945_v19 = vld [vmem:[%s14868_s1 + $0x424] ss:$8 sps:$4 sm:$0xff]  }
  0x56   : > { %1030 = vmatmul.mubr.bf16.gmra.mrb[8].mxu0 %v11376_v29 }
  0x57   : > { %1049 = vmatpush1.bf16.msra.mxu0 %v9847_v22  ;;  %1566 = vmatmul.mubr.bf16.gmra.mrb[8].mxu1 %v11376_v29  ;;  %v9948_v22 = vld [vmem:[%s14868_s1 + $0x624] ss:$8 sps:$4 sm:$0xff]  }
  0x58   : > { %1585 = vmatpush1.bf16.msra.mxu1 %v9850_v23  ;;  %1050 = vmatprep.subr.bf16.mxu0 %v9855_v24  ;;  %v9942_v23 = vld [vmem:[%s11221_s27 + $0x28] ss:$16 sps:$4 sm:$0xff]  }
  0x59   : > { %1586 = vmatprep.subr.bf16.mxu1 %v9858_v25  ;;  %1072 = vmatprep.mubr.bf16.mxu0 %v11401_v36  ;;  %v9943_v24 = vld [vmem:[%s14868_s1 + $0x420] ss:$8 sps:$4 sm:$0xff]  }
  0x5a   : > { %1608 = vmatprep.mubr.bf16.mxu1 %v11401_v36  ;;  %v9946_v25 = vld [vmem:[%s14868_s1 + $0x620] ss:$8 sps:$4 sm:$0xff]  }
  0x5b   : > { %1051 = vmatpush1.bf16.msra.mxu0 %v9853_v26  ;;  %v9951_v26 = vld [vmem:[%s14868_s1 + $0x434] ss:$8 sps:$4 sm:$0xff]  }
  0x5c   : > { %1587 = vmatpush1.bf16.msra.mxu1 %v9856_v27  ;;  %1052 = vmatprep.subr.bf16.mxu0 %v9861_v30  ;;  %v9954_v27 = vld [vmem:[%s14868_s1 + $0x634] ss:$8 sps:$4 sm:$0xff]  }
  0x5d   : > { %1588 = vmatprep.subr.bf16.mxu1 %v9864_v31  ;;  %v9955_v30 = vld [vmem:[%s11221_s27 + $0x4c] ss:$16 sps:$4 sm:$0xff]   ;;  %v9949_v31 = vld [vmem:[%s14868_s1 + $0x430] ss:$8 sps:$4 sm:$0xff]  }
  0x5f   : > { %1053 = vmatpush1.bf16.msra.mxu0 %v9859_v32  ;;  %v9952_v32 = vld [vmem:[%s14868_s1 + $0x630] ss:$8 sps:$4 sm:$0xff]  }
  0x60   : > { %1589 = vmatpush1.bf16.msra.mxu1 %v9862_v33  ;;  %1054 = vmatprep.subr.bf16.mxu0 %v9867_v34  ;;  %v9960_v33 = vld [vmem:[%s14868_s1 + $0x444] ss:$8 sps:$4 sm:$0xff]  }
  0x61   : > { %1590 = vmatprep.subr.bf16.mxu1 %v9870_v35  ;;  %v9963_v34 = vld [vmem:[%s14868_s1 + $0x644] ss:$8 sps:$4 sm:$0xff]   ;;  %v9957_v35 = vld [vmem:[%s11221_s27 + $0x48] ss:$16 sps:$4 sm:$0xff]  }
  0x63   : > { %1055 = vmatpush1.bf16.msra.mxu0 %v9865_v37  ;;  %v9958_v37 = vld [vmem:[%s14868_s1 + $0x440] ss:$8 sps:$4 sm:$0xff]  }
  0x64   : > { %1591 = vmatpush1.bf16.msra.mxu1 %v9868_v38  ;;  %1056 = vmatprep.subr.bf16.mxu0 %v9873_v39  ;;  %v9961_v38 = vld [vmem:[%s14868_s1 + $0x640] ss:$8 sps:$4 sm:$0xff]   ;;  %v9966_v39 = vld [vmem:[%s14868_s1 + $0x454] ss:$8 sps:$4 sm:$0xff]  }
  0x65   : > { %1592 = vmatprep.subr.bf16.mxu1 %v9876_v40  ;;  %v9969_v40 = vld [vmem:[%s14868_s1 + $0x654] ss:$8 sps:$4 sm:$0xff]  }
  0x67   : > { %1057 = vmatpush1.bf16.msra.mxu0 %v9871_v41  ;;  %v9964_v41 = vld [vmem:[%s14868_s1 + $0x450] ss:$8 sps:$4 sm:$0xff]  }
  0x68   : > { %1593 = vmatpush1.bf16.msra.mxu1 %v9874_v42  ;;  %1058 = vmatprep.subr.bf16.mxu0 %v9879_v43  ;;  %v9967_v42 = vld [vmem:[%s14868_s1 + $0x650] ss:$8 sps:$4 sm:$0xff]   ;;  %v9972_v43 = vld [vmem:[%s14868_s1 + $0x464] ss:$8 sps:$4 sm:$0xff]  }
  0x69   : > { %1594 = vmatprep.subr.bf16.mxu1 %v9882_v44  ;;  %v9975_v44 = vld [vmem:[%s14868_s1 + $0x664] ss:$8 sps:$4 sm:$0xff]  }
  0x6b   : > { %1059 = vmatpush1.bf16.msra.mxu0 %v9877_v45  ;;  %v9970_v45 = vld [vmem:[%s14868_s1 + $0x460] ss:$8 sps:$4 sm:$0xff]  }
  0x6c   : > { %1595 = vmatpush1.bf16.msra.mxu1 %v9880_v46  ;;  %1060 = vmatprep.subr.bf16.mxu0 %v9885_v48  ;;  %v9973_v46 = vld [vmem:[%s14868_s1 + $0x660] ss:$8 sps:$4 sm:$0xff]   ;;  %v9978_v48 = vld [vmem:[%s14868_s1 + $0x474] ss:$8 sps:$4 sm:$0xff]  }
  0x6d   : > { %1596 = vmatprep.subr.bf16.mxu1 %v9888_v49  ;;  %v9976_v49 = vld [vmem:[%s14868_s1 + $0x470] ss:$8 sps:$4 sm:$0xff]  }
  0x6f   : > { %1061 = vmatpush1.bf16.msra.mxu0 %v9883_v50  ;;  %v9979_v50 = vld [vmem:[%s14868_s1 + $0x670] ss:$8 sps:$4 sm:$0xff]  }
  0x70   : > { %1597 = vmatpush1.bf16.msra.mxu1 %v9886_v51  ;;  %1062 = vmatprep.subr.bf16.mxu0 %v9891_v52  ;;  %v9984_v51 = vld [vmem:[%s14868_s1 + $0x484] ss:$8 sps:$4 sm:$0xff]  }
  0x71   : > { %1598 = vmatprep.subr.bf16.mxu1 %v9894_v53  ;;  %v9987_v52 = vld [vmem:[%s14868_s1 + $0x684] ss:$8 sps:$4 sm:$0xff]   ;;  %v9982_v53 = vld [vmem:[%s14868_s1 + $0x480] ss:$8 sps:$4 sm:$0xff]  }
  0x73   : > { %1063 = vmatpush1.bf16.msra.mxu0 %v9889_v54  ;;  %v9985_v54 = vld [vmem:[%s14868_s1 + $0x680] ss:$8 sps:$4 sm:$0xff]  }
  0x74   : > { %1599 = vmatpush1.bf16.msra.mxu1 %v9892_v55  ;;  %1064 = vmatprep.subr.bf16.mxu0 %v9900_v56  ;;  %v9990_v55 = vld [vmem:[%s14868_s1 + $0x494] ss:$8 sps:$4 sm:$0xff]  }
  0x75   : > { %1600 = vmatprep.subr.bf16.mxu1 %v9903_v57  ;;  %v9993_v56 = vld [vmem:[%s14868_s1 + $0x694] ss:$8 sps:$4 sm:$0xff]   ;;  %v9988_v57 = vld [vmem:[%s14868_s1 + $0x490] ss:$8 sps:$4 sm:$0xff]  }
  0x77   : > { %1065 = vmatpush1.bf16.msra.mxu0 %v9898_v58  ;;  %v9991_v58 = vld [vmem:[%s14868_s1 + $0x690] ss:$8 sps:$4 sm:$0xff]  }
  0x78   : > { %1601 = vmatpush1.bf16.msra.mxu1 %v9901_v59  ;;  %1066 = vmatprep.subr.bf16.mxu0 %v9906_v60  ;;  %v9996_v59 = vld [vmem:[%s14868_s1 + $0x4a4] ss:$8 sps:$4 sm:$0xff]  }
  0x79   : > { %1602 = vmatprep.subr.bf16.mxu1 %v9909_v61  ;;  %v9999_v60 = vld [vmem:[%s14868_s1 + $0x6a4] ss:$8 sps:$4 sm:$0xff]   ;;  %v9994_v61 = vld [vmem:[%s14868_s1 + $0x4a0] ss:$8 sps:$4 sm:$0xff]  }
  0x7b   : > { %1067 = vmatpush1.bf16.msra.mxu0 %v9904_v62  ;;  %v9997_v62 = vld [vmem:[%s14868_s1 + $0x6a0] ss:$8 sps:$4 sm:$0xff]  }
  0x7c   : > { %1603 = vmatpush1.bf16.msra.mxu1 %v9907_v63  ;;  %1068 = vmatprep.subr.bf16.mxu0 %v9915_v0  ;;  %v10002_v63 = vld [vmem:[%s14868_s1 + $0x4b4] ss:$8 sps:$4 sm:$0xff]  }
  0x7d   : > { %1604 = vmatprep.subr.bf16.mxu1 %v9918_v1  ;;  %v10005_v0 = vld [vmem:[%s14868_s1 + $0x6b4] ss:$8 sps:$4 sm:$0xff]   ;;  %v10000_v1 = vld [vmem:[%s14868_s1 + $0x4b0] ss:$8 sps:$4 sm:$0xff]  }
  0x7f   : > { %1069 = vmatpush1.bf16.msra.mxu0 %v9913_v2  ;;  %v10003_v2 = vld [vmem:[%s14868_s1 + $0x6b0] ss:$8 sps:$4 sm:$0xff]  }
  0x80   : > { %1605 = vmatpush1.bf16.msra.mxu1 %v9916_v3  ;;  %1070 = vmatprep.subr.bf16.mxu0 %v9921_v4  ;;  %v10008_v3 = vld [vmem:[%s14868_s1 + $0x4c4] ss:$8 sps:$4 sm:$0xff]  }
  0x81   : > { %1606 = vmatprep.subr.bf16.mxu1 %v9924_v6  ;;  %v10011_v4 = vld [vmem:[%s14868_s1 + $0x6c4] ss:$8 sps:$4 sm:$0xff]   ;;  %v10006_v6 = vld [vmem:[%s14868_s1 + $0x4c0] ss:$8 sps:$4 sm:$0xff]  }
  0x83   : > { %1071 = vmatpush1.bf16.msra.mxu0 %v9919_v7  ;;  %v10009_v7 = vld [vmem:[%s14868_s1 + $0x6c0] ss:$8 sps:$4 sm:$0xff]  }
  0x84   : > { %1607 = vmatpush1.bf16.msra.mxu1 %v9922_v8  ;;  %2061 = vmatprep.subr.bf16.mxu0 %v9930_v9  ;;  %v10014_v8 = vld [vmem:[%s14868_s1 + $0x4d4] ss:$8 sps:$4 sm:$0xff]  }
  0x85   : > { %2584 = vmatprep.subr.bf16.mxu1 %v9933_v10  ;;  %v10017_v9 = vld [vmem:[%s14868_s1 + $0x6d4] ss:$8 sps:$4 sm:$0xff]   ;;  %v10012_v10 = vld [vmem:[%s14868_s1 + $0x4d0] ss:$8 sps:$4 sm:$0xff]  }
  0x86   : > { %1073 = vmatmul.mubr.bf16.vlgmr.msra.gmra.mrb[0].mxu0 %v9927_v11 }
  0x87   : > { %1609 = vmatmul.mubr.bf16.vlgmr.msra.gmra.mrb[0].mxu1 %v9927_v11  ;;  %2062 = vmatpush1.bf16.msra.mxu0 %v9928_v12  ;;  %v10015_v11 = vld [vmem:[%s14868_s1 + $0x6d0] ss:$8 sps:$4 sm:$0xff]   ;;  %v10020_v12 = vld [vmem:[%s14868_s1 + $0x4e4] ss:$8 sps:$4 sm:$0xff]  }
  0x88   : > { %2585 = vmatpush1.bf16.msra.mxu1 %v9931_v13  ;;  %2063 = vmatprep.subr.bf16.mxu0 %v9936_v14  ;;  %v10023_v13 = vld [vmem:[%s14868_s1 + $0x6e4] ss:$8 sps:$4 sm:$0xff]   ;;  %v10018_v14 = vld [vmem:[%s14868_s1 + $0x4e0] ss:$8 sps:$4 sm:$0xff]  }
  0x89   : > { %2586 = vmatprep.subr.bf16.mxu1 %v9939_v15  ;;  %1082 = vmatprep.mubr.bf16.mxu0 %v9940_v16  ;;  %v10021_v15 = vld [vmem:[%s14868_s1 + $0x6e0] ss:$8 sps:$4 sm:$0xff]  }
  0x8a   : > { %1618 = vmatprep.mubr.bf16.mxu1 %v9940_v16  ;;  %v10026_v16 = vld [vmem:[%s14868_s1 + $0x4f4] ss:$8 sps:$4 sm:$0xff]  }
  0x8b   : > { %2064 = vmatpush1.bf16.msra.mxu0 %v9934_v17  ;;  %v10029_v17 = vld [vmem:[%s14868_s1 + $0x6f4] ss:$8 sps:$4 sm:$0xff]  }
  0x8c   : > { %2587 = vmatpush1.bf16.msra.mxu1 %v9937_v18  ;;  %2065 = vmatprep.subr.bf16.mxu0 %v9945_v19  ;;  %v10024_v18 = vld [vmem:[%s14868_s1 + $0x4f0] ss:$8 sps:$4 sm:$0xff]  }
  0x8d   : > { %2588 = vmatprep.subr.bf16.mxu1 %v9948_v22  ;;  %v10027_v19 = vld [vmem:[%s14868_s1 + $0x6f0] ss:$8 sps:$4 sm:$0xff]   ;;  %v10032_v22 = vld [vmem:[%s14868_s1 + $0x504] ss:$8 sps:$4 sm:$0xff]  }
  0x8e   : > { %1083 = vmatmul.mubr.bf16.gmra.mrb[4].mxu0 %v9942_v23 }
  0x8f   : > { %1619 = vmatmul.mubr.bf16.gmra.mrb[4].mxu1 %v9942_v23  ;;  %2066 = vmatpush1.bf16.msra.mxu0 %v9943_v24  ;;  %v10035_v23 = vld [vmem:[%s14868_s1 + $0x704] ss:$8 sps:$4 sm:$0xff]   ;;  %v10030_v24 = vld [vmem:[%s14868_s1 + $0x500] ss:$8 sps:$4 sm:$0xff]  }
  0x90   : > { %2589 = vmatpush1.bf16.msra.mxu1 %v9946_v25  ;;  %2067 = vmatprep.subr.bf16.mxu0 %v9951_v26  ;;  %v10033_v25 = vld [vmem:[%s14868_s1 + $0x700] ss:$8 sps:$4 sm:$0xff]   ;;  %v10038_v26 = vld [vmem:[%s14868_s1 + $0x514] ss:$8 sps:$4 sm:$0xff]  }
  0x91   : > { %2590 = vmatprep.subr.bf16.mxu1 %v9954_v27  ;;  %1092 = vmatprep.mubr.bf16.mxu0 %v9955_v30  ;;  %v10041_v27 = vld [vmem:[%s14868_s1 + $0x714] ss:$8 sps:$4 sm:$0xff]  }
  0x92   : > { %1628 = vmatprep.mubr.bf16.mxu1 %v9955_v30  ;;  %v10036_v30 = vld [vmem:[%s14868_s1 + $0x510] ss:$8 sps:$4 sm:$0xff]  }
  0x93   : > { %2068 = vmatpush1.bf16.msra.mxu0 %v9949_v31  ;;  %v10039_v31 = vld [vmem:[%s14868_s1 + $0x710] ss:$8 sps:$4 sm:$0xff]  }
  0x94   : > { %2591 = vmatpush1.bf16.msra.mxu1 %v9952_v32  ;;  %2069 = vmatprep.subr.bf16.mxu0 %v9960_v33  ;;  %v10044_v32 = vld [vmem:[%s14868_s1 + $0x524] ss:$8 sps:$4 sm:$0xff]   ;;  %v10042_v33 = vld [vmem:[%s14868_s1 + $0x520] ss:$8 sps:$4 sm:$0xff]  }
  0x95   : > { %2592 = vmatprep.subr.bf16.mxu1 %v9963_v34  ;;  %v10045_v34 = vld [vmem:[%s14868_s1 + $0x720] ss:$8 sps:$4 sm:$0xff]  }
  0x96   : > { %1093 = vmatmul.mubr.bf16.gmra.mrb[8].mxu0 %v9957_v35 }
  0x97   : > { %1629 = vmatmul.mubr.bf16.gmra.mrb[8].mxu1 %v9957_v35  ;;  %2070 = vmatpush1.bf16.msra.mxu0 %v9958_v37  ;;  %v10050_v35 = vld [vmem:[%s14868_s1 + $0x534] ss:$8 sps:$4 sm:$0xff]   ;;  %v10048_v37 = vld [vmem:[%s14868_s1 + $0x530] ss:$8 sps:$4 sm:$0xff]  }
  0x98   : > { %2593 = vmatpush1.bf16.msra.mxu1 %v9961_v38  ;;  %2071 = vmatprep.subr.bf16.mxu0 %v9966_v39  ;;  %v10051_v38 = vld [vmem:[%s14868_s1 + $0x730] ss:$8 sps:$4 sm:$0xff]   ;;  %v10056_v39 = vld [vmem:[%s14868_s1 + $0x544] ss:$8 sps:$4 sm:$0xff]  }
  0x99   : > { %2594 = vmatprep.subr.bf16.mxu1 %v9969_v40  ;;  %2093 = vmatprep.mubr.bf16.mxu0 %v11230_v47  ;;  %v10059_v40 = vld [vmem:[%s14868_s1 + $0x744] ss:$8 sps:$4 sm:$0xff]  }
  0x9a   : > { %2616 = vmatprep.mubr.bf16.mxu1 %v11230_v47  ;;  %v9981_v47 = vld [vmem:[%s14868_s1 + $0x674] ss:$8 sps:$4 sm:$0xff]  }
  0x9b   : > { %2072 = vmatpush1.bf16.msra.mxu0 %v9964_v41  ;;  %v10054_v41 = vld [vmem:[%s14868_s1 + $0x540] ss:$8 sps:$4 sm:$0xff]  }
  0x9c   : > { %2595 = vmatpush1.bf16.msra.mxu1 %v9967_v42  ;;  %2073 = vmatprep.subr.bf16.mxu0 %v9972_v43  ;;  %v10062_v42 = vld [vmem:[%s14868_s1 + $0x554] ss:$8 sps:$4 sm:$0xff]  }
  0x9d   : > { %2596 = vmatprep.subr.bf16.mxu1 %v9975_v44  ;;  %v10065_v43 = vld [vmem:[%s14868_s1 + $0x754] ss:$8 sps:$4 sm:$0xff]   ;;  %v10060_v44 = vld [vmem:[%s14868_s1 + $0x550] ss:$8 sps:$4 sm:$0xff]  }
  0x9f   : > { %2074 = vmatpush1.bf16.msra.mxu0 %v9970_v45  ;;  %v10068_v45 = vld [vmem:[%s14868_s1 + $0x564] ss:$8 sps:$4 sm:$0xff]  }
  0xa0   : > { %2597 = vmatpush1.bf16.msra.mxu1 %v9973_v46  ;;  %2075 = vmatprep.subr.bf16.mxu0 %v9978_v48  ;;  %v10071_v46 = vld [vmem:[%s14868_s1 + $0x764] ss:$8 sps:$4 sm:$0xff]   ;;  %v10066_v48 = vld [vmem:[%s14868_s1 + $0x560] ss:$8 sps:$4 sm:$0xff]  }
  0xa1   : > { %2598 = vmatprep.subr.bf16.mxu1 %v9981_v47  ;;  %v10069_v47 = vld [vmem:[%s14868_s1 + $0x760] ss:$8 sps:$4 sm:$0xff]  }
  0xa3   : > { %2076 = vmatpush1.bf16.msra.mxu0 %v9976_v49  ;;  %v10077_v49 = vld [vmem:[%s14868_s1 + $0x774] ss:$8 sps:$4 sm:$0xff]  }
  0xa4   : > { %2599 = vmatpush1.bf16.msra.mxu1 %v9979_v50  ;;  %2077 = vmatprep.subr.bf16.mxu0 %v9984_v51  ;;  %v10072_v50 = vld [vmem:[%s14868_s1 + $0x570] ss:$8 sps:$4 sm:$0xff]   ;;  %v10080_v51 = vld [vmem:[%s14868_s1 + $0x584] ss:$8 sps:$4 sm:$0xff]  }
  0xa5   : > { %2600 = vmatprep.subr.bf16.mxu1 %v9987_v52  ;;  %v10083_v52 = vld [vmem:[%s14868_s1 + $0x784] ss:$8 sps:$4 sm:$0xff]  }
  0xa7   : > { %2078 = vmatpush1.bf16.msra.mxu0 %v9982_v53  ;;  %v10078_v53 = vld [vmem:[%s14868_s1 + $0x580] ss:$8 sps:$4 sm:$0xff]  }
  0xa8   : > { %2601 = vmatpush1.bf16.msra.mxu1 %v9985_v54  ;;  %2079 = vmatprep.subr.bf16.mxu0 %v9990_v55  ;;  %v10081_v54 = vld [vmem:[%s14868_s1 + $0x780] ss:$8 sps:$4 sm:$0xff]   ;;  %v10086_v55 = vld [vmem:[%s14868_s1 + $0x594] ss:$8 sps:$4 sm:$0xff]  }
  0xa9   : > { %2602 = vmatprep.subr.bf16.mxu1 %v9993_v56  ;;  %v10089_v56 = vld [vmem:[%s14868_s1 + $0x794] ss:$8 sps:$4 sm:$0xff]  }
  0xab   : > { %2080 = vmatpush1.bf16.msra.mxu0 %v9988_v57  ;;  %v10084_v57 = vld [vmem:[%s14868_s1 + $0x590] ss:$8 sps:$4 sm:$0xff]  }
  0xac   : > { %2603 = vmatpush1.bf16.msra.mxu1 %v9991_v58  ;;  %2081 = vmatprep.subr.bf16.mxu0 %v9996_v59  ;;  %v10087_v58 = vld [vmem:[%s14868_s1 + $0x790] ss:$8 sps:$4 sm:$0xff]   ;;  %v10092_v59 = vld [vmem:[%s14868_s1 + $0x5a4] ss:$8 sps:$4 sm:$0xff]  }
  0xad   : > { %2604 = vmatprep.subr.bf16.mxu1 %v9999_v60  ;;  %v10095_v60 = vld [vmem:[%s14868_s1 + $0x7a4] ss:$8 sps:$4 sm:$0xff]  }
  0xaf   : > { %2082 = vmatpush1.bf16.msra.mxu0 %v9994_v61  ;;  %v10090_v61 = vld [vmem:[%s14868_s1 + $0x5a0] ss:$8 sps:$4 sm:$0xff]  }
  0xb0   : > { %2605 = vmatpush1.bf16.msra.mxu1 %v9997_v62  ;;  %2083 = vmatprep.subr.bf16.mxu0 %v10002_v63  ;;  %v10093_v62 = vld [vmem:[%s14868_s1 + $0x7a0] ss:$8 sps:$4 sm:$0xff]   ;;  %v10098_v63 = vld [vmem:[%s14868_s1 + $0x5b4] ss:$8 sps:$4 sm:$0xff]  }
  0xb1   : > { %2606 = vmatprep.subr.bf16.mxu1 %v10005_v0  ;;  %v10101_v0 = vld [vmem:[%s14868_s1 + $0x7b4] ss:$8 sps:$4 sm:$0xff]  }
  0xb3   : > { %2084 = vmatpush1.bf16.msra.mxu0 %v10000_v1  ;;  %v10096_v1 = vld [vmem:[%s14868_s1 + $0x5b0] ss:$8 sps:$4 sm:$0xff]  }
  0xb4   : > { %2607 = vmatpush1.bf16.msra.mxu1 %v10003_v2  ;;  %2085 = vmatprep.subr.bf16.mxu0 %v10008_v3  ;;  %v10099_v2 = vld [vmem:[%s14868_s1 + $0x7b0] ss:$8 sps:$4 sm:$0xff]   ;;  %v10104_v3 = vld [vmem:[%s14868_s1 + $0x5c4] ss:$8 sps:$4 sm:$0xff]  }
  0xb5   : > { %2608 = vmatprep.subr.bf16.mxu1 %v10011_v4  ;;  %v10107_v4 = vld [vmem:[%s14868_s1 + $0x7c4] ss:$8 sps:$4 sm:$0xff]  }
  0xb7   : > { %2086 = vmatpush1.bf16.msra.mxu0 %v10006_v6  ;;  %v10102_v6 = vld [vmem:[%s14868_s1 + $0x5c0] ss:$8 sps:$4 sm:$0xff]  }
  0xb8   : > { %2609 = vmatpush1.bf16.msra.mxu1 %v10009_v7  ;;  %2087 = vmatprep.subr.bf16.mxu0 %v10014_v8  ;;  %v10105_v7 = vld [vmem:[%s14868_s1 + $0x7c0] ss:$8 sps:$4 sm:$0xff]   ;;  %v10110_v8 = vld [vmem:[%s14868_s1 + $0x5d4] ss:$8 sps:$4 sm:$0xff]  }
  0xb9   : > { %2610 = vmatprep.subr.bf16.mxu1 %v10017_v9  ;;  %v10113_v9 = vld [vmem:[%s14868_s1 + $0x7d4] ss:$8 sps:$4 sm:$0xff]  }
  0xbb   : > { %2088 = vmatpush1.bf16.msra.mxu0 %v10012_v10  ;;  %v10108_v10 = vld [vmem:[%s14868_s1 + $0x5d0] ss:$8 sps:$4 sm:$0xff]  }
  0xbc   : > { %2611 = vmatpush1.bf16.msra.mxu1 %v10015_v11  ;;  %2089 = vmatprep.subr.bf16.mxu0 %v10020_v12  ;;  %v10111_v11 = vld [vmem:[%s14868_s1 + $0x7d0] ss:$8 sps:$4 sm:$0xff]   ;;  %v10116_v12 = vld [vmem:[%s14868_s1 + $0x5e4] ss:$8 sps:$4 sm:$0xff]  }
  0xbd   : > { %2612 = vmatprep.subr.bf16.mxu1 %v10023_v13  ;;  %v10119_v13 = vld [vmem:[%s14868_s1 + $0x7e4] ss:$8 sps:$4 sm:$0xff]  }
  0xbf   : > { %2090 = vmatpush1.bf16.msra.mxu0 %v10018_v14  ;;  %v10114_v14 = vld [vmem:[%s14868_s1 + $0x5e0] ss:$8 sps:$4 sm:$0xff]  }
  0xc0   : > { %2613 = vmatpush1.bf16.msra.mxu1 %v10021_v15  ;;  %2091 = vmatprep.subr.bf16.mxu0 %v10026_v16  ;;  %v10117_v15 = vld [vmem:[%s14868_s1 + $0x7e0] ss:$8 sps:$4 sm:$0xff]   ;;  %v10122_v16 = vld [vmem:[%s14868_s1 + $0x5f4] ss:$8 sps:$4 sm:$0xff]  }
  0xc1   : > { %2614 = vmatprep.subr.bf16.mxu1 %v10029_v17  ;;  %v10125_v17 = vld [vmem:[%s14868_s1 + $0x7f4] ss:$8 sps:$4 sm:$0xff]  }
  0xc3   : > { %2092 = vmatpush1.bf16.msra.mxu0 %v10024_v18  ;;  %v10120_v18 = vld [vmem:[%s14868_s1 + $0x5f0] ss:$8 sps:$4 sm:$0xff]  }
  0xc4   : > { %2615 = vmatpush1.bf16.msra.mxu1 %v10027_v19  ;;  %2124 = vmatprep.subr.bf16.mxu0 %v10032_v22  ;;  %v10123_v19 = vld [vmem:[%s14868_s1 + $0x7f0] ss:$8 sps:$4 sm:$0xff]   ;;  %v10128_v22 = vld [vmem:[%s14868_s1 + $0x804] ss:$8 sps:$4 sm:$0xff]  }
  0xc5   : > { %2647 = vmatprep.subr.bf16.mxu1 %v10035_v23  ;;  %v10126_v23 = vld [vmem:[%s14868_s1 + $0x800] ss:$8 sps:$4 sm:$0xff]  }
  0xc6   : > { %2094 = vmatmul.mubr.bf16.vlgmr.msra.gmra.mrb[12].mxu0 %v11298_v5 }
  0xc7   : > { %2617 = vmatmul.mubr.bf16.vlgmr.msra.gmra.mrb[12].mxu1 %v11298_v5  ;;  %2125 = vmatpush1.bf16.msra.mxu0 %v10030_v24  ;;  %v10047_v5 = vld [vmem:[%s14868_s1 + $0x724] ss:$8 sps:$4 sm:$0xff]   ;;  %v10131_v24 = vld [vmem:[%s14868_s1 + $0x814] ss:$8 sps:$4 sm:$0xff]  }
  0xc8   : > { %2648 = vmatpush1.bf16.msra.mxu1 %v10033_v25  ;;  %2126 = vmatprep.subr.bf16.mxu0 %v10038_v26  ;;  %v10129_v25 = vld [vmem:[%s14868_s1 + $0x810] ss:$8 sps:$4 sm:$0xff]  }
  0xc9   : > { %2649 = vmatprep.subr.bf16.mxu1 %v10041_v27  ;;  %2103 = vmatprep.mubr.bf16.mxu0 %v11345_v20  ;;  %v10982_v26 = vld [vmem:[%s11221_s27 + $0x8] ss:$16 sps:$4 sm:$0xff]   ;;  %v10134_v27 = vld [vmem:[%s14868_s1 + $0x824] ss:$8 sps:$4 sm:$0xff]  }
  0xca   : > { %2626 = vmatprep.mubr.bf16.mxu1 %v11345_v20  ;;  %v10053_v20 = vld [vmem:[%s14868_s1 + $0x734] ss:$8 sps:$4 sm:$0xff]  }
  0xcb   : > { %2127 = vmatpush1.bf16.msra.mxu0 %v10036_v30  ;;  %v10983_v30 = vld [vmem:[%s11221_s27 + $0x2c] ss:$16 sps:$4 sm:$0xff]  }
  0xcc   : > { %2650 = vmatpush1.bf16.msra.mxu1 %v10039_v31  ;;  %2128 = vmatprep.subr.bf16.mxu0 %v10044_v32  ;;  %v10132_v31 = vld [vmem:[%s14868_s1 + $0x820] ss:$8 sps:$4 sm:$0xff]   ;;  %v10137_v32 = vld [vmem:[%s14868_s1 + $0x834] ss:$8 sps:$4 sm:$0xff]  }
  0xcd   : > { %2651 = vmatprep.subr.bf16.mxu1 %v10047_v5  ;;  %v10135_v5 = vld [vmem:[%s14868_s1 + $0x830] ss:$8 sps:$4 sm:$0xff]  }
  0xce   : > { %2104 = vmatmul.mubr.bf16.gmra.mrb[16].mxu0 %v11348_v21 }
  0xcf   : > { %2627 = vmatmul.mubr.bf16.gmra.mrb[16].mxu1 %v11348_v21  ;;  %2129 = vmatpush1.bf16.msra.mxu0 %v10042_v33  ;;  %v10057_v21 = vld [vmem:[%s14868_s1 + $0x740] ss:$8 sps:$4 sm:$0xff]  }
  0xd0   : > { %2652 = vmatpush1.bf16.msra.mxu1 %v10045_v34  ;;  %2130 = vmatprep.subr.bf16.mxu0 %v10050_v35  ;;  %v10984_v33 = vld [vmem:[%s11221_s27 + $0x28] ss:$16 sps:$4 sm:$0xff]   ;;  %v10140_v34 = vld [vmem:[%s14868_s1 + $0x844] ss:$8 sps:$4 sm:$0xff]  }
  0xd1   : > { %2653 = vmatprep.subr.bf16.mxu1 %v10053_v20  ;;  %2113 = vmatprep.mubr.bf16.mxu0 %v11373_v28  ;;  %v10985_v35 = vld [vmem:[%s11221_s27 + $0x4c] ss:$16 sps:$4 sm:$0xff]   ;;  %v10138_v20 = vld [vmem:[%s14868_s1 + $0x840] ss:$8 sps:$4 sm:$0xff]  }
  0xd2   : > { %2636 = vmatprep.mubr.bf16.mxu1 %v11373_v28  ;;  %v10063_v28 = vld [vmem:[%s14868_s1 + $0x750] ss:$8 sps:$4 sm:$0xff]  }
  0xd3   : > { %2131 = vmatpush1.bf16.msra.mxu0 %v10048_v37  ;;  %v10143_v37 = vld [vmem:[%s14868_s1 + $0x854] ss:$8 sps:$4 sm:$0xff]  }
  0xd4   : > { %2654 = vmatpush1.bf16.msra.mxu1 %v10051_v38  ;;  %2132 = vmatprep.subr.bf16.mxu0 %v10056_v39  ;;  %v10141_v38 = vld [vmem:[%s14868_s1 + $0x850] ss:$8 sps:$4 sm:$0xff]  }
  0xd5   : > { %2655 = vmatprep.subr.bf16.mxu1 %v10059_v40  ;;  %v10986_v39 = vld [vmem:[%s11221_s27 + $0x48] ss:$16 sps:$4 sm:$0xff]   ;;  %v10146_v40 = vld [vmem:[%s14868_s1 + $0x864] ss:$8 sps:$4 sm:$0xff]  }
  0xd6   : > { %2114 = vmatmul.mubr.bf16.gmra.mrb[20].mxu0 %v11376_v29 }
  0xd7   : > { %2637 = vmatmul.mubr.bf16.gmra.mrb[20].mxu1 %v11376_v29  ;;  %2133 = vmatpush1.bf16.msra.mxu0 %v10054_v41  ;;  %v10074_v29 = vld [vmem:[%s14868_s1 + $0x574] ss:$8 sps:$4 sm:$0xff]  }
  0xd8   : > { %2656 = vmatpush1.bf16.msra.mxu1 %v10057_v21  ;;  %2134 = vmatprep.subr.bf16.mxu0 %v10062_v42  ;;  %v10987_v41 = vld [vmem:[%s11221_s27 + $0x4] ss:$16 sps:$4 sm:$0xff]   ;;  %v10144_v21 = vld [vmem:[%s14868_s1 + $0x860] ss:$8 sps:$4 sm:$0xff]  }
  0xd9   : > { %2657 = vmatprep.subr.bf16.mxu1 %v10065_v43  ;;  %2156 = vmatprep.mubr.bf16.mxu0 %v11401_v36  ;;  %v10149_v42 = vld [vmem:[%s14868_s1 + $0x874] ss:$8 sps:$4 sm:$0xff]   ;;  %v10147_v43 = vld [vmem:[%s14868_s1 + $0x870] ss:$8 sps:$4 sm:$0xff]  }
  0xda   : > { %2679 = vmatprep.mubr.bf16.mxu1 %v11401_v36  ;;  %v10075_v36 = vld [vmem:[%s14868_s1 + $0x770] ss:$8 sps:$4 sm:$0xff]  }
  0xdb   : > { %2135 = vmatpush1.bf16.msra.mxu0 %v10060_v44  ;;  %v10152_v44 = vld [vmem:[%s14868_s1 + $0x884] ss:$8 sps:$4 sm:$0xff]  }
  0xdc   : > { %2658 = vmatpush1.bf16.msra.mxu1 %v10063_v28  ;;  %2136 = vmatprep.subr.bf16.mxu0 %v10068_v45  ;;  %v10150_v28 = vld [vmem:[%s14868_s1 + $0x880] ss:$8 sps:$4 sm:$0xff]   ;;  %v10155_v45 = vld [vmem:[%s14868_s1 + $0x894] ss:$8 sps:$4 sm:$0xff]  }
  0xdd   : > { %2659 = vmatprep.subr.bf16.mxu1 %v10071_v46  ;;  %v10153_v46 = vld [vmem:[%s14868_s1 + $0x890] ss:$8 sps:$4 sm:$0xff]  }
  0xdf   : > { %2137 = vmatpush1.bf16.msra.mxu0 %v10066_v48  ;;  %v10158_v48 = vld [vmem:[%s14868_s1 + $0x8a4] ss:$8 sps:$4 sm:$0xff]  }
  0xe0   : > { %2660 = vmatpush1.bf16.msra.mxu1 %v10069_v47  ;;  %2138 = vmatprep.subr.bf16.mxu0 %v10074_v29  ;;  %v10156_v47 = vld [vmem:[%s14868_s1 + $0x8a0] ss:$8 sps:$4 sm:$0xff]   ;;  %v10161_v29 = vld [vmem:[%s14868_s1 + $0x8b4] ss:$8 sps:$4 sm:$0xff]  }
  0xe1   : > { %2661 = vmatprep.subr.bf16.mxu1 %v10077_v49  ;;  %v10159_v49 = vld [vmem:[%s14868_s1 + $0x8b0] ss:$8 sps:$4 sm:$0xff]  }
  0xe3   : > { %2139 = vmatpush1.bf16.msra.mxu0 %v10072_v50  ;;  %v10164_v50 = vld [vmem:[%s14868_s1 + $0x8c4] ss:$8 sps:$4 sm:$0xff]  }
  0xe4   : > { %2662 = vmatpush1.bf16.msra.mxu1 %v10075_v36  ;;  %2140 = vmatprep.subr.bf16.mxu0 %v10080_v51  ;;  %v10162_v36 = vld [vmem:[%s14868_s1 + $0x8c0] ss:$8 sps:$4 sm:$0xff]   ;;  %v10167_v51 = vld [vmem:[%s14868_s1 + $0x8d4] ss:$8 sps:$4 sm:$0xff]  }
  0xe5   : > { %2663 = vmatprep.subr.bf16.mxu1 %v10083_v52  ;;  %v10165_v52 = vld [vmem:[%s14868_s1 + $0x8d0] ss:$8 sps:$4 sm:$0xff]  }
  0xe7   : > { %2141 = vmatpush1.bf16.msra.mxu0 %v10078_v53  ;;  %v10170_v53 = vld [vmem:[%s14868_s1 + $0x8e4] ss:$8 sps:$4 sm:$0xff]  }
  0xe8   : > { %2664 = vmatpush1.bf16.msra.mxu1 %v10081_v54  ;;  %2142 = vmatprep.subr.bf16.mxu0 %v10086_v55  ;;  %v10168_v54 = vld [vmem:[%s14868_s1 + $0x8e0] ss:$8 sps:$4 sm:$0xff]   ;;  %v10173_v55 = vld [vmem:[%s14868_s1 + $0x8f4] ss:$8 sps:$4 sm:$0xff]  }
  0xe9   : > { %2665 = vmatprep.subr.bf16.mxu1 %v10089_v56  ;;  %v10171_v56 = vld [vmem:[%s14868_s1 + $0x8f0] ss:$8 sps:$4 sm:$0xff]  }
  0xeb   : > { %2143 = vmatpush1.bf16.msra.mxu0 %v10084_v57  ;;  %v10176_v57 = vld [vmem:[%s14868_s1 + $0x904] ss:$8 sps:$4 sm:$0xff]  }
  0xec   : > { %2666 = vmatpush1.bf16.msra.mxu1 %v10087_v58  ;;  %2144 = vmatprep.subr.bf16.mxu0 %v10092_v59  ;;  %v10174_v58 = vld [vmem:[%s14868_s1 + $0x900] ss:$8 sps:$4 sm:$0xff]   ;;  %v10179_v59 = vld [vmem:[%s14868_s1 + $0x914] ss:$8 sps:$4 sm:$0xff]  }
  0xed   : > { %2667 = vmatprep.subr.bf16.mxu1 %v10095_v60  ;;  %v10177_v60 = vld [vmem:[%s14868_s1 + $0x910] ss:$8 sps:$4 sm:$0xff]  }
  0xef   : > { %2145 = vmatpush1.bf16.msra.mxu0 %v10090_v61  ;;  %v10988_v61 = vld [vmem:[%s11221_s27] ss:$16 sps:$4 sm:$0xff]  }
  0xf0   : > { %2668 = vmatpush1.bf16.msra.mxu1 %v10093_v62  ;;  %2146 = vmatprep.subr.bf16.mxu0 %v10098_v63  ;;  %v10182_v62 = vld [vmem:[%s14868_s1 + $0x924] ss:$8 sps:$4 sm:$0xff]  }
  0xf1   : > { %2669 = vmatprep.subr.bf16.mxu1 %v10101_v0  ;;  %v10989_v63 = vld [vmem:[%s11221_s27 + $0x24] ss:$16 sps:$4 sm:$0xff]   ;;  %v10180_v0 = vld [vmem:[%s14868_s1 + $0x920] ss:$8 sps:$4 sm:$0xff]  }
  0xf3   : > { %2147 = vmatpush1.bf16.msra.mxu0 %v10096_v1  ;;  %v10185_v1 = vld [vmem:[%s14868_s1 + $0x934] ss:$8 sps:$4 sm:$0xff]  }
  0xf4   : > { %2670 = vmatpush1.bf16.msra.mxu1 %v10099_v2  ;;  %2148 = vmatprep.subr.bf16.mxu0 %v10104_v3  ;;  %v10183_v2 = vld [vmem:[%s14868_s1 + $0x930] ss:$8 sps:$4 sm:$0xff]   ;;  %v10188_v3 = vld [vmem:[%s14868_s1 + $0x944] ss:$8 sps:$4 sm:$0xff]  }
  0xf5   : > { %2671 = vmatprep.subr.bf16.mxu1 %v10107_v4  ;;  %v10990_v4 = vld [vmem:[%s11221_s27 + $0x20] ss:$16 sps:$4 sm:$0xff]  }
  0xf7   : > { %2149 = vmatpush1.bf16.msra.mxu0 %v10102_v6  ;;  %v10991_v6 = vld [vmem:[%s11221_s27 + $0x44] ss:$16 sps:$4 sm:$0xff]  }
  0xf8   : > { %2672 = vmatpush1.bf16.msra.mxu1 %v10105_v7  ;;  %2150 = vmatprep.subr.bf16.mxu0 %v10110_v8  ;;  %v10186_v7 = vld [vmem:[%s14868_s1 + $0x940] ss:$8 sps:$4 sm:$0xff]   ;;  %v10191_v8 = vld [vmem:[%s14868_s1 + $0x954] ss:$8 sps:$4 sm:$0xff]  }
  0xf9   : > { %2673 = vmatprep.subr.bf16.mxu1 %v10113_v9  ;;  %v388_v9 = vlaneseq }
  0xfb   : > { %2151 = vmatpush1.bf16.msra.mxu0 %v10108_v10  ;;  %v10189_v10 = vld [vmem:[%s14868_s1 + $0x950] ss:$8 sps:$4 sm:$0xff]  }
  0xfc   : > { %2674 = vmatpush1.bf16.msra.mxu1 %v10111_v11  ;;  %2152 = vmatprep.subr.bf16.mxu0 %v10116_v12  ;;  %v10194_v11 = vld [vmem:[%s14868_s1 + $0x964] ss:$8 sps:$4 sm:$0xff]   ;;  %v10992_v12 = vld [vmem:[%s11221_s27 + $0x40] ss:$16 sps:$4 sm:$0xff]  }
  0xfd   : > { %2675 = vmatprep.subr.bf16.mxu1 %v10119_v13  ;;  %v12056_v13 = vshrl.u32 %v388_v9, 7 }
  0xff   : > { %2153 = vmatpush1.bf16.msra.mxu0 %v10114_v14  ;;  %v10993_v14 = vld [vmem:[%s11221_s27 + $0xc] ss:$16 sps:$4 sm:$0xff]   ;;  %vm1115_vm0 = vcmp.lt.s32.totalorder %v12056_v13, 2  ;;  %vm1651_vm1 = vcmp.lt.s32.totalorder %v12056_v13, 1  ;;  %vm2722_vm2 = vcmp.lt.s32.totalorder %v12056_v13, 7  ;;  %vm3270_vm7 = vcmp.lt.s32.totalorder %v12056_v13, 6 }
 0x100   : > { %2676 = vmatpush1.bf16.msra.mxu1 %v10117_v15  ;;  %2154 = vmatprep.subr.bf16.mxu0 %v10122_v16 }
 0x101   : > { %2677 = vmatprep.subr.bf16.mxu1 %v10125_v17  ;;  %v10192_v17 = vld [vmem:[%s14868_s1 + $0x960] ss:$8 sps:$4 sm:$0xff]  }
 0x103   : > { %2155 = vmatpush1.bf16.msra.mxu0 %v10120_v18 }
 0x104   : > { %2678 = vmatpush1.bf16.msra.mxu1 %v10123_v19  ;;  %3132 = vmatprep.subr.bf16.mxu0 %v10128_v22 }
 0x106   : > { %2157 = vmatmul.mubr.bf16.vlgmr.msra.gmra.mrb[12].mxu0 %v10982_v26 }
 0x107   : > { %2680 = vmatmul.mubr.bf16.vlgmr.msra.gmra.mrb[12].mxu1 %v10982_v26  ;;  %3133 = vmatpush1.bf16.msra.mxu0 %v10126_v23  ;;  %v10197_v23 = vld [vmem:[%s14868_s1 + $0x974] ss:$8 sps:$4 sm:$0xff]  }
 0x108   : > { %2166 = vmatprep.mubr.bf16.mxu0 %v10983_v30  ;;  %3134 = vmatprep.subr.bf16.mxu0 %v10131_v24 }
 0x109   : > { %2689 = vmatprep.mubr.bf16.mxu1 %v10983_v30 }
 0x10b   : > { %3135 = vmatpush1.bf16.msra.mxu0 %v10129_v25 }
 0x10c   : > { %3136 = vmatprep.subr.bf16.mxu0 %v10134_v27 }
 0x10e   : > { %2167 = vmatmul.mubr.bf16.gmra.mrb[16].mxu0 %v10984_v33 }
 0x10f   : > { %2690 = vmatmul.mubr.bf16.gmra.mrb[16].mxu1 %v10984_v33  ;;  %3137 = vmatpush1.bf16.msra.mxu0 %v10132_v31 }
 0x110   : > { %2176 = vmatprep.mubr.bf16.mxu0 %v10985_v35  ;;  %3138 = vmatprep.subr.bf16.mxu0 %v10137_v32 }
 0x111   : > { %2699 = vmatprep.mubr.bf16.mxu1 %v10985_v35 }
 0x113   : > { %3139 = vmatpush1.bf16.msra.mxu0 %v10135_v5 }
 0x114   : > { %3140 = vmatprep.subr.bf16.mxu0 %v10140_v34 }
 0x116   : > { %2177 = vmatmul.mubr.bf16.gmra.mrb[20].mxu0 %v10986_v39 }
 0x117   : > { %2700 = vmatmul.mubr.bf16.gmra.mrb[20].mxu1 %v10986_v39  ;;  %3141 = vmatpush1.bf16.msra.mxu0 %v10138_v20  ;;  %v10195_v20 = vld [vmem:[%s14868_s1 + $0x970] ss:$8 sps:$4 sm:$0xff]  }
 0x118   : > { %3164 = vmatprep.mubr.bf16.mxu0 %v10987_v41  ;;  %3142 = vmatprep.subr.bf16.mxu0 %v10143_v37  ;;  %v10200_v37 = vld [vmem:[%s14868_s1 + $0x984] ss:$8 sps:$4 sm:$0xff]  }
 0x11b   : > { %3143 = vmatpush1.bf16.msra.mxu0 %v10141_v38 }
 0x11c   : > { %3144 = vmatprep.subr.bf16.mxu0 %v10146_v40 }
 0x11f   : > { %3145 = vmatpush1.bf16.msra.mxu0 %v10144_v21 }
 0x120   : > { %3146 = vmatprep.subr.bf16.mxu0 %v10149_v42 }
 0x123   : > { %3147 = vmatpush1.bf16.msra.mxu0 %v10147_v43 }
 0x124   : > { %3148 = vmatprep.subr.bf16.mxu0 %v10152_v44 }
 0x127   : > { %3149 = vmatpush1.bf16.msra.mxu0 %v10150_v28  ;;  %v10198_v28 = vld [vmem:[%s14868_s1 + $0x980] ss:$8 sps:$4 sm:$0xff]  }
 0x128   : > { %3150 = vmatprep.subr.bf16.mxu0 %v10155_v45 }
 0x12b   : > { %3151 = vmatpush1.bf16.msra.mxu0 %v10153_v46 }
 0x12c   : > { %3152 = vmatprep.subr.bf16.mxu0 %v10158_v48 }
 0x12f   : > { %3153 = vmatpush1.bf16.msra.mxu0 %v10156_v47 }
 0x130   : > { %3154 = vmatprep.subr.bf16.mxu0 %v10161_v29  ;;  %v10203_v29 = vld [vmem:[%s14868_s1 + $0x994] ss:$8 sps:$4 sm:$0xff]  }
 0x133   : > { %3155 = vmatpush1.bf16.msra.mxu0 %v10159_v49 }
 0x134   : > { %3156 = vmatprep.subr.bf16.mxu0 %v10164_v50 }
 0x137   : > { %3157 = vmatpush1.bf16.msra.mxu0 %v10162_v36 }
 0x138   : > { %3158 = vmatprep.subr.bf16.mxu0 %v10167_v51 }
 0x13b   : > { %3159 = vmatpush1.bf16.msra.mxu0 %v10165_v52 }
 0x13c   : > { %3160 = vmatprep.subr.bf16.mxu0 %v10170_v53 }
 0x13f   : > { %3161 = vmatpush1.bf16.msra.mxu0 %v10168_v54 }
 0x140   : > { %3162 = vmatprep.subr.bf16.mxu0 %v10173_v55 }
 0x143   : > { %3163 = vmatpush1.bf16.msra.mxu0 %v10171_v56 }
 0x144   : > { %3195 = vmatprep.subr.bf16.mxu0 %v10176_v57 }
 0x146   : > { %3165 = vmatmul.mubr.bf16.vlgmr.msra.gmra.mrb[24].mxu0 %v10988_v61 }
 0x147   : > { %3196 = vmatpush1.bf16.msra.mxu0 %v10174_v58  ;;  %3174 = vmatprep.mubr.bf16.mxu0 %v10989_v63  ;;  %v10206_v63 = vld [vmem:[%s14868_s1 + $0x9a4] ss:$8 sps:$4 sm:$0xff]  }
 0x148   : > { %3197 = vmatprep.subr.bf16.mxu0 %v10179_v59 }
 0x14b   : > { %3198 = vmatpush1.bf16.msra.mxu0 %v10177_v60  ;;  %v10201_v60 = vld [vmem:[%s14868_s1 + $0x990] ss:$8 sps:$4 sm:$0xff]  }
 0x14c   : > { %3199 = vmatprep.subr.bf16.mxu0 %v10182_v62 }
 0x14e   : > { %3175 = vmatmul.mubr.bf16.gmra.mrb[28].mxu0 %v10990_v4 }
 0x14f   : > { %3200 = vmatpush1.bf16.msra.mxu0 %v10180_v0  ;;  %3184 = vmatprep.mubr.bf16.mxu0 %v10991_v6 }
 0x150   : > { %3201 = vmatprep.subr.bf16.mxu0 %v10185_v1 }
 0x153   : > { %3202 = vmatpush1.bf16.msra.mxu0 %v10183_v2 }
 0x154   : > { %3203 = vmatprep.subr.bf16.mxu0 %v10188_v3 }
 0x156   : > { %3185 = vmatmul.mubr.bf16.gmra.mrb[32].mxu0 %v10992_v12 }
 0x157   : > { %3204 = vmatpush1.bf16.msra.mxu0 %v10186_v7  ;;  %3227 = vmatprep.mubr.bf16.mxu0 %v10993_v14 }
 0x158   : > { %3205 = vmatprep.subr.bf16.mxu0 %v10191_v8 }
 0x159   : > { %v12059_v15 = vpop.f32.mrb[0].mxu0 }
 0x15a   : > { %v12061_v16 = vpop.f32.mrb[0].mxu1  ;;  %v12067_v19 = vpop.f32.mrb[1].mxu0  ;;  %v1103_v27 = vrot.slane %v12059_v15, 6 }
 0x15b   : > { %v1639_v18 = vrot.slane %v12061_v16, 7  ;;  %v12069_v22 = vpop.f32.mrb[1].mxu1  ;;  %v1078_v25 = vpop.f32.mrb[2].mxu0  ;;  %3206 = vmatpush1.bf16.msra.mxu0 %v10189_v10  ;;  %v1104_v33 = vrot.slane %v12067_v19, 6 }
 0x15c   : > { %v1640_v24 = vrot.slane %v12069_v22, 7  ;;  %v1614_v26 = vpop.f32.mrb[2].mxu1  ;;  %v1105_v30 = vrot.slane %v1078_v25, 6  ;;  %v1080_v32 = vpop.f32.mrb[3].mxu0  ;;  %3207 = vmatprep.subr.bf16.mxu0 %v10194_v11  ;;  %v10204_v11 = vld [vmem:[%s14868_s1 + $0x9a0] ss:$8 sps:$4 sm:$0xff]  }
 0x15d   : > { %v1641_v31 = vrot.slane %v1614_v26, 7  ;;  %v1616_v5 = vpop.f32.mrb[3].mxu1  ;;  %v1106_v34 = vrot.slane %v1080_v32, 6  ;;  %v10209_v25 = vld [vmem:[%s14868_s1 + $0x9b4] ss:$8 sps:$4 sm:$0xff]  }
 0x15e   : > { %v1642_v35 = vrot.slane %v1616_v5, 7  ;;  %v1124_v38 = vsel %vm1115_vm0, %v1103_v27, %v1105_v30 }
 0x15f   : > { %v1660_v39 = vsel %vm1651_vm1, %v1639_v18, %v1641_v31  ;;  %3208 = vmatpush1.bf16.msra.mxu0 %v10192_v17  ;;  %v1125_v41 = vsel %vm1115_vm0, %v1104_v33, %v1106_v34 }
 0x160   : > { %v12093_v40 = vadd.f32 %v1660_v39, %v1124_v38  ;;  %v1661_v21 = vsel %vm1651_vm1, %v1640_v24, %v1642_v35  ;;  %3209 = vmatprep.subr.bf16.mxu0 %v10197_v23 }
 0x161   : > { %v12103_v42 = vadd.f32 %v1661_v21, %v1125_v41  ;;  %v1084_v43 = vpop.f32.mrb[4].mxu0  ;;  %v10207_v21 = vld [vmem:[%s14868_s1 + $0x9b0] ss:$8 sps:$4 sm:$0xff]  }
 0x162   : > { %v1620_v44 = vpop.f32.mrb[4].mxu1  ;;  %v1107_v45 = vrot.slane %v1084_v43, 6  ;;  %v1086_v48 = vpop.f32.mrb[5].mxu0 }
 0x163   : > { %v1643_v46 = vrot.slane %v1620_v44, 7  ;;  %v1622_v47 = vpop.f32.mrb[5].mxu1  ;;  %v1108_v49 = vrot.slane %v1086_v48, 6  ;;  %v1088_v36 = vpop.f32.mrb[6].mxu0  ;;  %3210 = vmatpush1.bf16.msra.mxu0 %v10195_v20 }
 0x164   : > { %v1644_v50 = vrot.slane %v1622_v47, 7  ;;  %v1624_v51 = vpop.f32.mrb[6].mxu1  ;;  %v1109_v52 = vrot.slane %v1088_v36, 6  ;;  %v1090_v54 = vpop.f32.mrb[7].mxu0  ;;  %3211 = vmatprep.subr.bf16.mxu0 %v10200_v37  ;;  %v1122_v56 = vsel %vm1115_vm0, %v1105_v30, %v1107_v45 }
 0x165   : > { %v1645_v53 = vrot.slane %v1624_v51, 7  ;;  %v1626_v55 = vpop.f32.mrb[7].mxu1  ;;  %v1658_v57 = vsel %vm1651_vm1, %v1641_v31, %v1643_v46  ;;  %v1110_v58 = vrot.slane %v1090_v54, 6  ;;  %v1123_v62 = vsel %vm1115_vm0, %v1106_v34, %v1108_v49  ;;  %v10230_v51 = vld [vmem:[%s14870_s3 + $0x14] ss:$8 sps:$4 sm:$0xff]  }
 0x166   : > { %v1646_v59 = vrot.slane %v1626_v55, 7  ;;  %v12118_v61 = vadd.f32 %v1658_v57, %v1122_v56  ;;  %v1659_v0 = vsel %vm1651_vm1, %v1642_v35, %v1644_v50  ;;  %v1120_v1 = vsel %vm1115_vm0, %v1107_v45, %v1109_v52  ;;  %v10215_v54 = vld [vmem:[%s14868_s1 + $0x9d4] ss:$8 sps:$4 sm:$0xff]   ;;  %v10236_v55 = vld [vmem:[%s14870_s3 + $0x24] ss:$8 sps:$4 sm:$0xff]  }
 0x167   : > { %v1656_v2 = vsel %vm1651_vm1, %v1643_v46, %v1645_v53  ;;  %3212 = vmatpush1.bf16.msra.mxu0 %v10198_v28  ;;  %v12131_v3 = vadd.f32 %v1659_v0, %v1123_v62  ;;  %v1121_v6 = vsel %vm1115_vm0, %v1108_v49, %v1110_v58  ;;  %v10224_v49 = vld [vmem:[%s14870_s3 + $0x4] ss:$8 sps:$4 sm:$0xff]   ;;  %v10213_v56 = vld [vmem:[%s14868_s1 + $0x9d0] ss:$8 sps:$4 sm:$0xff]   ;;  %v10234_v57 = vld [vmem:[%s14870_s3 + $0x20] ss:$8 sps:$4 sm:$0xff]  }
 0x168   : > { %v12133_v4 = vadd.f32 %v1656_v2, %v1120_v1  ;;  %v1657_v7 = vsel %vm1651_vm1, %v1644_v50, %v1646_v59  ;;  %3213 = vmatprep.subr.bf16.mxu0 %v10203_v29  ;;  %3553 = vmatprep.subr.bf16.mxu1 %v10224_v49  ;;  %v10240_v62 = vld [vmem:[%s14870_s3 + $0x30] ss:$8 sps:$4 sm:$0xff]   ;;  %v10248_v0 = vld [vmem:[%s14870_s3 + $0x44] ss:$8 sps:$4 sm:$0xff]   ;;  %v10281_v49 = vld [vmem:[%s14870_s3 + $0x294] ss:$8 sps:$4 sm:$0xff]  }
 0x169   : > { %v12139_v8 = vadd.f32 %v1657_v7, %v1121_v6  ;;  %v1094_v9 = vpop.f32.mrb[8].mxu0  ;;  %v10219_v1 = vld [vmem:[%s14868_s1 + $0x9f0] ss:$8 sps:$4 sm:$0xff]   ;;  %v10227_v2 = vld [vmem:[%s14870_s3 + $0x204] ss:$8 sps:$4 sm:$0xff]  }
 0x16a   : > { %v1630_v10 = vpop.f32.mrb[8].mxu1  ;;  %v1111_v12 = vrot.slane %v1094_v9, 6  ;;  %v1096_v17 = vpop.f32.mrb[9].mxu0  ;;  %v10246_v6 = vld [vmem:[%s14870_s3 + $0x40] ss:$8 sps:$4 sm:$0xff]  }
 0x16b   : > { %v1647_v14 = vrot.slane %v1630_v10, 7  ;;  %v1632_v23 = vpop.f32.mrb[9].mxu1  ;;  %v1112_v26 = vrot.slane %v1096_v17, 6  ;;  %v1098_v31 = vpop.f32.mrb[10].mxu0  ;;  %3214 = vmatpush1.bf16.msra.mxu0 %v10201_v60  ;;  %v10216_v60 = vld [vmem:[%s14868_s1 + $0x9e0] ss:$8 sps:$4 sm:$0xff]  }
 0x16c   : > { %v1648_v30 = vrot.slane %v1632_v23, 7  ;;  %v1634_v32 = vpop.f32.mrb[10].mxu1  ;;  %v1113_v5 = vrot.slane %v1098_v31, 6  ;;  %v1100_v35 = vpop.f32.mrb[11].mxu0  ;;  %3215 = vmatprep.subr.bf16.mxu0 %v10206_v63  ;;  %v1118_v37 = vsel %vm1115_vm0, %v1109_v52, %v1111_v12  ;;  %v10210_v52 = vld [vmem:[%s14868_s1 + $0x9c0] ss:$8 sps:$4 sm:$0xff]  }
 0x16d   : > { %v1649_v34 = vrot.slane %v1634_v32, 7  ;;  %v1636_v20 = vpop.f32.mrb[11].mxu1  ;;  %v1654_v38 = vsel %vm1651_vm1, %v1645_v53, %v1647_v14  ;;  %v1114_v39 = vrot.slane %v1100_v35, 6  ;;  %v1119_v44 = vsel %vm1115_vm0, %v1110_v58, %v1112_v26  ;;  %v10228_v53 = vld [vmem:[%s14870_s3 + $0x10] ss:$8 sps:$4 sm:$0xff]  }
 0x16e   : > { %v1650_v41 = vrot.slane %v1636_v20, 7  ;;  %v12154_v43 = vadd.f32 %v1654_v38, %v1118_v37  ;;  %v1126_v28 = vsel %vm1115_vm0, %v1113_v5, %v1103_v27  ;;  %v1655_v46 = vsel %vm1651_vm1, %v1646_v59, %v1648_v30  ;;  %v10212_v27 = vld [vmem:[%s14868_s1 + $0x9c4] ss:$8 sps:$4 sm:$0xff]   ;;  %v10242_v59 = vld [vmem:[%s14870_s3 + $0x34] ss:$8 sps:$4 sm:$0xff]  }
 0x16f   : > { %v1662_v45 = vsel %vm1651_vm1, %v1649_v34, %v1639_v18  ;;  %v1116_v48 = vsel %vm1115_vm0, %v1111_v12, %v1113_v5  ;;  %3216 = vmatpush1.bf16.msra.mxu0 %v10204_v11  ;;  %v1127_v15 = vsel %vm1115_vm0, %v1114_v39, %v1104_v33  ;;  %v12180_v18 = vadd.f32 %v1655_v46, %v1119_v44  ;;  %v10218_v58 = vld [vmem:[%s14868_s1 + $0x9e4] ss:$8 sps:$4 sm:$0xff]   ;;  %v10221_v63 = vld [vmem:[%s14868_s1 + $0x9f4] ss:$8 sps:$4 sm:$0xff]   ;;  %v10225_v9 = vld [vmem:[%s14870_s3 + $0x200] ss:$8 sps:$4 sm:$0xff]  }
 0x170   : > { %v12170_v47 = vadd.f32 %v1662_v45, %v1126_v28  ;;  %v1663_v16 = vsel %vm1651_vm1, %v1650_v41, %v1640_v24  ;;  %3217 = vmatprep.subr.bf16.mxu0 %v10209_v25  ;;  %v1652_v19 = vsel %vm1651_vm1, %v1647_v14, %v1649_v34  ;;  %v1117_v33 = vsel %vm1115_vm0, %v1112_v26, %v1114_v39  ;;  %v10222_v24 = vld [vmem:[%s14870_s3] ss:$8 sps:$4 sm:$0xff]   ;;  %v10254_v7 = vld [vmem:[%s14870_s3 + $0x54] ss:$8 sps:$4 sm:$0xff]   ;;  %v10252_v11 = vld [vmem:[%s14870_s3 + $0x50] ss:$8 sps:$4 sm:$0xff]  }
 0x171   : > { %v12185_v29 = vadd.f32 %v1663_v16, %v1127_v15  ;;  %v1653_v22 = vsel %vm1651_vm1, %v1648_v30, %v1650_v41  ;;  %v12199_v50 = vadd.f32 %v1652_v19, %v1116_v48  ;;  %3554 = vmatpush1.bf16.msra.mxu1 %v10222_v24  ;;  %v10233_v10 = vld [vmem:[%s14870_s3 + $0x214] ss:$8 sps:$4 sm:$0xff]   ;;  %v10260_v12 = vld [vmem:[%s14870_s3 + $0x64] ss:$8 sps:$4 sm:$0xff]   ;;  %v10231_v14 = vld [vmem:[%s14870_s3 + $0x210] ss:$8 sps:$4 sm:$0xff]  }
 0x172   : > { %v12201_v36 = vadd.f32 %v1653_v22, %v1117_v33  ;;  %3555 = vmatprep.subr.bf16.mxu1 %v10230_v51  ;;  %v10994_v17 = vld [vmem:[%s11221_s27 + $0x8] ss:$16 sps:$4 sm:$0xff]   ;;  %v10239_v23 = vld [vmem:[%s14870_s3 + $0x224] ss:$8 sps:$4 sm:$0xff]   ;;  %v10266_v30 = vld [vmem:[%s14870_s3 + $0x74] ss:$8 sps:$4 sm:$0xff]  }
 0x173   : > { %3218 = vmatpush1.bf16.msra.mxu0 %v10207_v21  ;;  %v10258_v25 = vld [vmem:[%s14870_s3 + $0x60] ss:$8 sps:$4 sm:$0xff]   ;;  %v10995_v26 = vld [vmem:[%s11221_s27 + $0x2c] ss:$16 sps:$4 sm:$0xff]   ;;  %v10264_v5 = vld [vmem:[%s14870_s3 + $0x70] ss:$8 sps:$4 sm:$0xff]  }
 0x174   : > { %3219 = vmatprep.subr.bf16.mxu0 %v10212_v27  ;;  %v10237_v31 = vld [vmem:[%s14870_s3 + $0x220] ss:$8 sps:$4 sm:$0xff]   ;;  %v10245_v32 = vld [vmem:[%s14870_s3 + $0x234] ss:$8 sps:$4 sm:$0xff]   ;;  %v10272_v34 = vld [vmem:[%s14870_s3 + $0x84] ss:$8 sps:$4 sm:$0xff]  }
 0x175   : > { %3556 = vmatpush1.bf16.msra.mxu1 %v10228_v53  ;;  %v10243_v35 = vld [vmem:[%s14870_s3 + $0x230] ss:$8 sps:$4 sm:$0xff]   ;;  %v10251_v37 = vld [vmem:[%s14870_s3 + $0x244] ss:$8 sps:$4 sm:$0xff]   ;;  %v10270_v38 = vld [vmem:[%s14870_s3 + $0x80] ss:$8 sps:$4 sm:$0xff]  }
 0x176   : > { %3557 = vmatprep.subr.bf16.mxu1 %v10236_v55  ;;  %v10996_v20 = vld [vmem:[%s11221_s27 + $0x28] ss:$16 sps:$4 sm:$0xff]   ;;  %v10997_v39 = vld [vmem:[%s11221_s27 + $0x4c] ss:$16 sps:$4 sm:$0xff]  }
 0x177   : > { %3220 = vmatpush1.bf16.msra.mxu0 %v10210_v52  ;;  %v10278_v41 = vld [vmem:[%s14870_s3 + $0x94] ss:$8 sps:$4 sm:$0xff]   ;;  %v10249_v21 = vld [vmem:[%s14870_s3 + $0x240] ss:$8 sps:$4 sm:$0xff]   ;;  %v10276_v28 = vld [vmem:[%s14870_s3 + $0x90] ss:$8 sps:$4 sm:$0xff]  }
 0x178   : > { %3221 = vmatprep.subr.bf16.mxu0 %v10215_v54  ;;  %v10257_v44 = vld [vmem:[%s14870_s3 + $0x254] ss:$8 sps:$4 sm:$0xff]   ;;  %v10284_v45 = vld [vmem:[%s14870_s3 + $0xa4] ss:$8 sps:$4 sm:$0xff]   ;;  %v10255_v46 = vld [vmem:[%s14870_s3 + $0x250] ss:$8 sps:$4 sm:$0xff]  }
 0x179   : > { %3558 = vmatpush1.bf16.msra.mxu1 %v10234_v57  ;;  %v10998_v48 = vld [vmem:[%s11221_s27 + $0x48] ss:$16 sps:$4 sm:$0xff]   ;;  %v10263_v15 = vld [vmem:[%s14870_s3 + $0x264] ss:$8 sps:$4 sm:$0xff]   ;;  %v10269_v19 = vld [vmem:[%s14870_s3 + $0x274] ss:$8 sps:$4 sm:$0xff]  }
 0x17a   : > { %3559 = vmatprep.subr.bf16.mxu1 %v10242_v59  ;;  %v10282_v16 = vld [vmem:[%s14870_s3 + $0xa0] ss:$8 sps:$4 sm:$0xff]   ;;  %v10267_v33 = vld [vmem:[%s14870_s3 + $0x270] ss:$8 sps:$4 sm:$0xff]   ;;  %v10275_v22 = vld [vmem:[%s14870_s3 + $0x284] ss:$8 sps:$4 sm:$0xff]  }
 0x17b   : > { %3222 = vmatpush1.bf16.msra.mxu0 %v10213_v56  ;;  %v10261_v27 = vld [vmem:[%s14870_s3 + $0x260] ss:$8 sps:$4 sm:$0xff]   ;;  %v10279_v51 = vld [vmem:[%s14870_s3 + $0x290] ss:$8 sps:$4 sm:$0xff]   ;;  %v10287_v52 = vld [vmem:[%s14870_s3 + $0x2a4] ss:$8 sps:$4 sm:$0xff]  }
 0x17c   : > { %3223 = vmatprep.subr.bf16.mxu0 %v10218_v58  ;;  %v10273_v24 = vld [vmem:[%s14870_s3 + $0x280] ss:$8 sps:$4 sm:$0xff]  }
 0x17d   : > { %3560 = vmatpush1.bf16.msra.mxu1 %v10240_v62  ;;  %v10285_v53 = vld [vmem:[%s14870_s3 + $0x2a0] ss:$8 sps:$4 sm:$0xff]  }
 0x17e   : > { %3561 = vmatprep.subr.bf16.mxu1 %v10248_v0 }
 0x17f   : > { %3224 = vmatpush1.bf16.msra.mxu0 %v10216_v60 }
 0x180   : > { %3225 = vmatprep.subr.bf16.mxu0 %v10221_v63 }
 0x181   : > { %3562 = vmatpush1.bf16.msra.mxu1 %v10246_v6 }
 0x182   : > { %3563 = vmatprep.subr.bf16.mxu1 %v10254_v7 }
 0x183   : > { %3226 = vmatpush1.bf16.msra.mxu0 %v10219_v1 }
 0x184   : > { %4125 = vmatprep.subr.bf16.mxu0 %v10227_v2 }
 0x185   : > { %3564 = vmatpush1.bf16.msra.mxu1 %v10252_v11  ;;  %v10291_v11 = vld [vmem:[%s14870_s3 + $0x2b0] ss:$8 sps:$4 sm:$0xff]  }
 0x186   : > { %3228 = vmatmul.mubr.bf16.vlgmr.msra.gmra.mrb[24].mxu0 %v10994_v17  ;;  %3565 = vmatprep.subr.bf16.mxu1 %v10260_v12  ;;  %v10293_v12 = vld [vmem:[%s14870_s3 + $0x2b4] ss:$8 sps:$4 sm:$0xff]  }
 0x187   : > { %3237 = vmatprep.mubr.bf16.mxu0 %v10995_v26  ;;  %4126 = vmatpush1.bf16.msra.mxu0 %v10225_v9 }
 0x188   : > { %4127 = vmatprep.subr.bf16.mxu0 %v10233_v10 }
 0x189   : > { %3566 = vmatpush1.bf16.msra.mxu1 %v10258_v25  ;;  %v10299_v25 = vld [vmem:[%s14870_s3 + $0x2c4] ss:$8 sps:$4 sm:$0xff]  }
 0x18a   : > { %3567 = vmatprep.subr.bf16.mxu1 %v10266_v30 }
 0x18b   : > { %4128 = vmatpush1.bf16.msra.mxu0 %v10231_v14 }
 0x18c   : > { %4129 = vmatprep.subr.bf16.mxu0 %v10239_v23  ;;  %v10296_v23 = vld [vmem:[%s14870_s3 + $0xc4] ss:$8 sps:$4 sm:$0xff]  }
 0x18d   : > { %3568 = vmatpush1.bf16.msra.mxu1 %v10264_v5 }
 0x18e   : > { %3238 = vmatmul.mubr.bf16.gmra.mrb[28].mxu0 %v10996_v20  ;;  %3569 = vmatprep.subr.bf16.mxu1 %v10272_v34 }
 0x18f   : > { %3247 = vmatprep.mubr.bf16.mxu0 %v10997_v39  ;;  %4130 = vmatpush1.bf16.msra.mxu0 %v10237_v31 }
 0x190   : > { %4131 = vmatprep.subr.bf16.mxu0 %v10245_v32 }
 0x191   : > { %3570 = vmatpush1.bf16.msra.mxu1 %v10270_v38 }
 0x192   : > { %3571 = vmatprep.subr.bf16.mxu1 %v10278_v41  ;;  %v10297_v41 = vld [vmem:[%s14870_s3 + $0x2c0] ss:$8 sps:$4 sm:$0xff]  }
 0x193   : > { %4132 = vmatpush1.bf16.msra.mxu0 %v10243_v35  ;;  %v10294_v35 = vld [vmem:[%s14870_s3 + $0xc0] ss:$8 sps:$4 sm:$0xff]  }
 0x194   : > { %4133 = vmatprep.subr.bf16.mxu0 %v10251_v37 }
 0x195   : > { %3572 = vmatpush1.bf16.msra.mxu1 %v10276_v28 }
 0x196   : > { %3248 = vmatmul.mubr.bf16.gmra.mrb[32].mxu0 %v10998_v48  ;;  %3573 = vmatprep.subr.bf16.mxu1 %v10284_v45 }
 0x197   : > { %4134 = vmatpush1.bf16.msra.mxu0 %v10249_v21 }
 0x198   : > { %4135 = vmatprep.subr.bf16.mxu0 %v10257_v44 }
 0x199   : > { %3574 = vmatpush1.bf16.msra.mxu1 %v10282_v16 }
 0x19b   : > { %4136 = vmatpush1.bf16.msra.mxu0 %v10255_v46 }
 0x19c   : > { %4137 = vmatprep.subr.bf16.mxu0 %v10263_v15 }
 0x19f   : > { %4138 = vmatpush1.bf16.msra.mxu0 %v10261_v27  ;;  %v10303_v27 = vld [vmem:[%s14870_s3 + $0x2d0] ss:$8 sps:$4 sm:$0xff]  }
 0x1a0   : > { %4139 = vmatprep.subr.bf16.mxu0 %v10269_v19 }
 0x1a3   : > { %4140 = vmatpush1.bf16.msra.mxu0 %v10267_v33 }
 0x1a4   : > { %4141 = vmatprep.subr.bf16.mxu0 %v10275_v22 }
 0x1a7   : > { %4142 = vmatpush1.bf16.msra.mxu0 %v10273_v24 }
 0x1a8   : > { %4143 = vmatprep.subr.bf16.mxu0 %v10281_v49 }
 0x1ab   : > { %4144 = vmatpush1.bf16.msra.mxu0 %v10279_v51  ;;  %v10308_v51 = vld [vmem:[%s14870_s3 + $0xe4] ss:$8 sps:$4 sm:$0xff]  }
 0x1ac   : > { %4145 = vmatprep.subr.bf16.mxu0 %v10287_v52 }
 0x1af   : > { %4146 = vmatpush1.bf16.msra.mxu0 %v10285_v53 }
 0x1b0   : > { %4147 = vmatprep.subr.bf16.mxu0 %v10293_v12 }
 0x1b3   : > { %4148 = vmatpush1.bf16.msra.mxu0 %v10291_v11 }
 0x1b4   : > { %4149 = vmatprep.subr.bf16.mxu0 %v10299_v25  ;;  %v10315_v25 = vld [vmem:[%s14870_s3 + $0x2f0] ss:$8 sps:$4 sm:$0xff]  }
 0x1b7   : > { %4150 = vmatpush1.bf16.msra.mxu0 %v10297_v41 }
 0x1d9   : > { %v2158_v54 = vpop.f32.mrb[12].mxu0 }
 0x1da   : > { %v12355_v55 = vpop.f32.mrb[12].mxu1  ;;  %v2187_v56 = vadd.f32 %v2158_v54, %v12170_v47  ;;  %v2160_v58 = vpop.f32.mrb[13].mxu0  ;;  %v10290_v47 = vld [vmem:[%s14870_s3 + $0xb4] ss:$8 sps:$4 sm:$0xff]   ;;  %v10306_v54 = vld [vmem:[%s14870_s3 + $0xe0] ss:$8 sps:$4 sm:$0xff]  }
 0x1db   : > { %v2710_v57 = vrot.slane %v12355_v55, 1  ;;  %v12359_v59 = vpop.f32.mrb[13].mxu1  ;;  %v2188_v60 = vadd.f32 %v2160_v58, %v12185_v29  ;;  %v2162_v63 = vpop.f32.mrb[14].mxu0  ;;  %v10288_v29 = vld [vmem:[%s14870_s3 + $0xb0] ss:$8 sps:$4 sm:$0xff]   ;;  %3575 = vmatprep.subr.bf16.mxu1 %v10290_v47 }
 0x1dc   : > { %v2711_v62 = vrot.slane %v12359_v59, 1  ;;  %v2685_v0 = vpop.f32.mrb[14].mxu1  ;;  %v2189_v1 = vadd.f32 %v2162_v63, %v12093_v40  ;;  %v2164_v6 = vpop.f32.mrb[15].mxu0  ;;  %3576 = vmatpush1.bf16.msra.mxu1 %v10288_v29  ;;  %v390_v59 = vadd.s32 8, %v12056_v13 }
 0x1dd   : > { %v2712_v2 = vrot.slane %v2685_v0, 1  ;;  %v2687_v7 = vpop.f32.mrb[15].mxu1  ;;  %v2190_v9 = vadd.f32 %v2164_v6, %v12103_v42  ;;  %3577 = vmatprep.subr.bf16.mxu1 %v10296_v23 }
 0x1de   : > { %v2713_v10 = vrot.slane %v2687_v7, 1 }
 0x1df   : > { %v2731_v40 = vsel %vm2722_vm2, %v2710_v57, %v2712_v2 }
 0x1e0   : > { %v12382_v42 = vadd.f32 %v2731_v40, %v2187_v56  ;;  %v2732_v14 = vsel %vm2722_vm2, %v2711_v62, %v2713_v10  ;;  %3578 = vmatpush1.bf16.msra.mxu1 %v10294_v35  ;;  %v10309_v56 = vld [vmem:[%s14870_s3 + $0x2e0] ss:$8 sps:$4 sm:$0xff]   ;;  %v10314_v40 = vld [vmem:[%s14870_s3 + $0xf4] ss:$8 sps:$4 sm:$0xff]  }
 0x1e1   : > { %v12388_v17 = vadd.f32 %v2732_v14, %v2188_v60  ;;  %v2168_v26 = vpop.f32.mrb[16].mxu0 }
 0x1e2   : > { %v2691_v30 = vpop.f32.mrb[16].mxu1  ;;  %v2191_v31 = vadd.f32 %v2168_v26, %v12118_v61  ;;  %v2170_v5 = vpop.f32.mrb[17].mxu0 }
 0x1e3   : > { %v2714_v32 = vrot.slane %v2691_v30, 1  ;;  %v2693_v34 = vpop.f32.mrb[17].mxu1  ;;  %v2192_v20 = vadd.f32 %v2170_v5, %v12131_v3  ;;  %v2172_v38 = vpop.f32.mrb[18].mxu0  ;;  %v10302_v3 = vld [vmem:[%s14870_s3 + $0xd4] ss:$8 sps:$4 sm:$0xff]  }
 0x1e4   : > { %v2715_v37 = vrot.slane %v2693_v34, 1  ;;  %v2695_v39 = vpop.f32.mrb[18].mxu1  ;;  %v2193_v21 = vadd.f32 %v2172_v38, %v12133_v4  ;;  %v2174_v28 = vpop.f32.mrb[19].mxu0  ;;  %v10300_v4 = vld [vmem:[%s14870_s3 + $0xd0] ss:$8 sps:$4 sm:$0xff]   ;;  %3579 = vmatprep.subr.bf16.mxu1 %v10302_v3  ;;  %v392_v38 = vadd.s32 24, %v12056_v13 }
 0x1e5   : > { %v2729_v61 = vsel %vm2722_vm2, %v2712_v2, %v2714_v32  ;;  %v2716_v44 = vrot.slane %v2695_v39, 1  ;;  %v2697_v45 = vpop.f32.mrb[19].mxu1  ;;  %v2194_v15 = vadd.f32 %v2174_v28, %v12139_v8  ;;  %v10305_v8 = vld [vmem:[%s14870_s3 + $0x2d4] ss:$8 sps:$4 sm:$0xff]   ;;  %3580 = vmatpush1.bf16.msra.mxu1 %v10300_v4  ;;  %v394_v28 = vadd.s32 40, %v12056_v13 }
 0x1e6   : > { %v12410_v46 = vadd.f32 %v2729_v61, %v2189_v1  ;;  %v2730_v48 = vsel %vm2722_vm2, %v2713_v10, %v2715_v37  ;;  %v2717_v16 = vrot.slane %v2697_v45, 1  ;;  %4151 = vmatprep.subr.bf16.mxu0 %v10305_v8  ;;  %3581 = vmatprep.subr.bf16.mxu1 %v10308_v51  ;;  %v10311_v1 = vld [vmem:[%s14870_s3 + $0x2e4] ss:$8 sps:$4 sm:$0xff]   ;;  %v393_v61 = vadd.s32 32, %v12056_v13 }
 0x1e7   : > { %v12421_v19 = vadd.f32 %v2730_v48, %v2190_v9  ;;  %v2727_v33 = vsel %vm2722_vm2, %v2714_v32, %v2716_v44  ;;  %4152 = vmatpush1.bf16.msra.mxu0 %v10303_v27  ;;  %v12500_v39 = vmul.u32.u64.low 2863311531, %v12056_v13  ;;  %v12501_v41 = vmul.u32.u64.high 2863311531, %v12056_v13, %v12500_v39 }
 0x1e8   : > { %v12428_v22 = vadd.f32 %v2727_v33, %v2191_v31  ;;  %v2728_v24 = vsel %vm2722_vm2, %v2715_v37, %v2717_v16  ;;  %4153 = vmatprep.subr.bf16.mxu0 %v10311_v1  ;;  %v10317_v31 = vld [vmem:[%s14870_s3 + $0x2f4] ss:$8 sps:$4 sm:$0xff]   ;;  %v10323_v37 = vld [vmem:[%s14870_s3 + $0x404] ss:$8 sps:$4 sm:$0xff]   ;;  %v12517_v27 = vmul.u32.u64.low 2863311531, %v394_v28  ;;  %v12518_v33 = vmul.u32.u64.high 2863311531, %v394_v28, %v12517_v27 }
 0x1e9   : > { %v12432_v49 = vadd.f32 %v2728_v24, %v2192_v20  ;;  %v2178_v52 = vpop.f32.mrb[20].mxu0  ;;  %3582 = vmatpush1.bf16.msra.mxu1 %v10306_v54  ;;  %v10320_v20 = vld [vmem:[%s14870_s3 + $0x104] ss:$8 sps:$4 sm:$0xff]   ;;  %v401_v8 = vshrl.u32 %v12501_v41, 5 }
 0x1ea   : > { %v2701_v53 = vpop.f32.mrb[20].mxu1  ;;  %v2195_v58 = vadd.f32 %v2178_v52, %v12154_v43  ;;  %v2180_v63 = vpop.f32.mrb[21].mxu0  ;;  %3583 = vmatprep.subr.bf16.mxu1 %v10314_v40  ;;  %v3295_v40 = vld [vmem:[%s14869_s2] sm:$0x3] }
 0x1eb   : > { %v2718_v60 = vrot.slane %v2701_v53, 1  ;;  %v2703_v0 = vpop.f32.mrb[21].mxu1  ;;  %v2196_v2 = vadd.f32 %v2180_v63, %v12180_v18  ;;  %v2182_v7 = vpop.f32.mrb[22].mxu0  ;;  %4154 = vmatpush1.bf16.msra.mxu0 %v10309_v56  ;;  %v402_v53 = vmul.u32 48, %v401_v8 }
 0x1ec   : > { %v2719_v6 = vrot.slane %v2703_v0, 1  ;;  %v2705_v47 = vpop.f32.mrb[22].mxu1  ;;  %v2197_v10 = vadd.f32 %v2182_v7, %v12199_v50  ;;  %v2184_v43 = vpop.f32.mrb[23].mxu0  ;;  %v10312_v50 = vld [vmem:[%s14870_s3 + $0xf0] ss:$8 sps:$4 sm:$0xff]   ;;  %4155 = vmatprep.subr.bf16.mxu0 %v10317_v31 }
 0x1ed   : > { %v2725_v9 = vsel %vm2722_vm2, %v2716_v44, %v2718_v60  ;;  %v2720_v29 = vrot.slane %v2705_v47, 1  ;;  %v2707_v11 = vpop.f32.mrb[23].mxu1  ;;  %v2198_v14 = vadd.f32 %v2184_v43, %v12201_v36  ;;  %3584 = vmatpush1.bf16.msra.mxu1 %v10312_v50  ;;  %v403_v0 = vsub.s32 %v12056_v13, %v402_v53 }
 0x1ee   : > { %v12454_v12 = vadd.f32 %v2725_v9, %v2193_v21  ;;  %v2726_v18 = vsel %vm2722_vm2, %v2717_v16, %v2719_v6  ;;  %v2721_v23 = vrot.slane %v2707_v11, 1  ;;  %3833 = vmatprep.subr.bf16.mxu1 %v10320_v20 }
 0x1ef   : > { %v12465_v26 = vadd.f32 %v2726_v18, %v2194_v15  ;;  %v2723_v30 = vsel %vm2722_vm2, %v2718_v60, %v2720_v29  ;;  %v2733_v36 = vsel %vm2722_vm2, %v2720_v29, %v2710_v57  ;;  %4156 = vmatpush1.bf16.msra.mxu0 %v10315_v25  ;;  %vm461_vm3 = vcmp.ne.s32.totalorder %v403_v0, 0 }
 0x1f0   : > { %v12476_v32 = vadd.f32 %v2723_v30, %v2195_v58  ;;  %v12478_v5 = vadd.f32 %v2733_v36, %v2197_v10  ;;  %v2724_v34 = vsel %vm2722_vm2, %v2719_v6, %v2721_v23  ;;  %v2734_v55 = vsel %vm2722_vm2, %v2721_v23, %v2711_v62  ;;  %4685 = vmatprep.subr.bf16.mxu0 %v10323_v37 }
 0x1f1   : > { %v12486_v35 = vadd.f32 %v2724_v34, %v2196_v2  ;;  %v12488_v57 = vadd.f32 %v2734_v55, %v2198_v14  ;;  %v391_v62 = vadd.s32 16, %v12056_v13  ;;  %v456_v58 = vshrl.u32 %v12518_v33, 5 }
 0x1f2   : > { %v12504_v21 = vmul.u32.u64.low 2863311531, %v390_v59  ;;  %v12505_v44 = vmul.u32.u64.high 2863311531, %v390_v59, %v12504_v21  ;;  %v12511_v48 = vmul.u32.u64.low 2863311531, %v392_v38  ;;  %v12512_v15 = vmul.u32.u64.high 2863311531, %v392_v38, %v12511_v48 }
 0x1f3   : > { %v12508_v45 = vmul.u32.u64.low 2863311531, %v391_v62  ;;  %v12509_v3 = vmul.u32.u64.high 2863311531, %v391_v62, %v12508_v45  ;;  %v12514_v16 = vmul.u32.u64.low 2863311531, %v393_v61  ;;  %v12515_v4 = vmul.u32.u64.high 2863311531, %v393_v61, %v12514_v16 }
 0x1f4   : > { %v412_v24 = vshrl.u32 %v12505_v44, 5  ;;  %v434_v52 = vshrl.u32 %v12512_v15, 5  ;;  %v457_v6 = vmul.u32 48, %v456_v58  ;;  %vm467_vm4 = vcmp.lt.s32.totalorder %v403_v0, 0 }
 0x1f5   : > { %v423_v51 = vshrl.u32 %v12509_v3, 5  ;;  %v445_v54 = vshrl.u32 %v12515_v4, 5  ;;  %vm12530_vm10 = vmand %vm467_vm4, %vm461_vm3  ;;  %v479_v11 = vadd.s32 48, %v403_v0  ;;  %v12538_v18 = vsub.s32 0, %v12056_v13 }
 0x1f6   : > { %v413_v56 = vmul.u32 48, %v412_v24  ;;  %v435_v63 = vmul.u32 48, %v434_v52  ;;  %v458_v10 = vsub.s32 %v394_v28, %v457_v6  ;;  %v12547_v36 = vsub.s32 1, %v12056_v13 }
 0x1f7   : > { %v424_v60 = vmul.u32 48, %v423_v51  ;;  %v446_v1 = vmul.u32 48, %v445_v54  ;;  %v12568_v21 = vrot.slane %v3295_v40, %v12538_v18 }
 0x1f8   : > { %v414_v2 = vsub.s32 %v390_v59, %v413_v56  ;;  %v436_v47 = vsub.s32 %v392_v38, %v435_v63  ;;  %vm466_vm4 = vcmp.ne.s32.totalorder %v458_v10, 0  ;;  %v485_v38 = vsel %vm12530_vm10, %v479_v11, %v403_v0 }
 0x1f9   : > { %v425_v7 = vsub.s32 %v391_v62, %v424_v60  ;;  %v447_v9 = vsub.s32 %v393_v61, %v446_v1  ;;  %v484_v41 = vadd.s32 48, %v458_v10  ;;  %v12582_v48 = vrot.slane %v3295_v40, %v12547_v36  ;;  %v10318_v1 = vld [vmem:[%s14870_s3 + $0x100] ss:$8 sps:$4 sm:$0xff]  }
 0x1fa   : > { %vm462_vm5 = vcmp.ne.s32.totalorder %v414_v2, 0  ;;  %vm468_vm6 = vcmp.lt.s32.totalorder %v414_v2, 0  ;;  %vm464_vm11 = vcmp.ne.s32.totalorder %v436_v47, 0  ;;  %vm470_vm12 = vcmp.lt.s32.totalorder %v436_v47, 0 }
 0x1fb   : > { %vm463_vm8 = vcmp.ne.s32.totalorder %v425_v7, 0  ;;  %vm469_vm9 = vcmp.lt.s32.totalorder %v425_v7, 0  ;;  %vm12542_vm13 = vmand %vm468_vm6, %vm462_vm5  ;;  %v480_v50 = vadd.s32 48, %v414_v2  ;;  %v481_v25 = vadd.s32 48, %v425_v7 }
 0x1fc   : > { %vm465_vm14 = vcmp.ne.s32.totalorder %v447_v9, 0  ;;  %vm471_vm15 = vcmp.lt.s32.totalorder %v447_v9, 0  ;;  %vm12551_vm3 = vmand %vm469_vm9, %vm463_vm8  ;;  %v482_v34 = vadd.s32 48, %v436_v47  ;;  %vm472_vm5 = vcmp.lt.s32.totalorder %v458_v10, 0 }
 0x1fd   : > { %vm476_vm6 = vmand %vm470_vm12, %vm464_vm11  ;;  %v483_v59 = vadd.s32 48, %v447_v9  ;;  %v486_v44 = vsel %vm12542_vm13, %v480_v50, %v414_v2  ;;  %v487_v28 = vsel %vm12551_vm3, %v481_v25, %v425_v7  ;;  %vm491_vm10 = vcmp.ge.s32.totalorder %v485_v38, 16 }
 0x1fe   : > { %vm477_vm8 = vmand %vm471_vm15, %vm465_vm14  ;;  %v488_v15 = vsel %vm476_vm6, %v482_v34, %v436_v47  ;;  %vm497_vm11 = vcmp.lt.s32.totalorder %v485_v38, 32  ;;  %vm492_vm12 = vcmp.ge.s32.totalorder %v486_v44, 16  ;;  %vm498_vm13 = vcmp.lt.s32.totalorder %v486_v44, 32 }
 0x1ff   : > { %vm478_vm9 = vmand %vm472_vm5, %vm466_vm4  ;;  %v489_v4 = vsel %vm477_vm8, %v483_v59, %v447_v9  ;;  %vm493_vm14 = vcmp.ge.s32.totalorder %v487_v28, 16  ;;  %vm499_vm15 = vcmp.lt.s32.totalorder %v487_v28, 32  ;;  %vm494_vm3 = vcmp.ge.s32.totalorder %v488_v15, 16 }
 0x200   : > { %v490_v33 = vsel %vm478_vm9, %v484_v41, %v458_v10  ;;  %vm12586_vm4 = vmand %vm491_vm10, %vm497_vm11  ;;  %vm500_vm5 = vcmp.lt.s32.totalorder %v488_v15, 32  ;;  %vm495_vm6 = vcmp.ge.s32.totalorder %v489_v4, 16  ;;  %vm501_vm10 = vcmp.lt.s32.totalorder %v489_v4, 32 }
 0x201   : > { %vm12593_vm8 = vmand %vm492_vm12, %vm498_vm13  ;;  %vm496_vm9 = vcmp.ge.s32.totalorder %v490_v33, 16  ;;  %vm502_vm12 = vcmp.lt.s32.totalorder %v490_v33, 32 }
 0x202   : > { %vm12604_vm11 = vmand %vm493_vm14, %vm499_vm15 }
 0x203   : > { %vm506_vm13 = vmand %vm494_vm3, %vm500_vm5 }
 0x204   : > { %vm12618_vm14 = vmand %vm495_vm6, %vm501_vm10 }
 0x205   : > { %vm508_vm15 = vmand %vm496_vm9, %vm502_vm12 }
 0x259   : > { %v12528_v29 = vpop.f32.mrb[24].mxu0 }
 0x25a   : > { %v12540_v14 = vpop.f32.mrb[25].mxu0  ;;  %v3258_v55 = vrot.slane %v12528_v29, 2 }
 0x25b   : > { %v3233_v30 = vpop.f32.mrb[26].mxu0  ;;  %v3259_v62 = vrot.slane %v12540_v14, 2  ;;  %v10321_v14 = vld [vmem:[%s14870_s3 + $0x400] ss:$8 sps:$4 sm:$0xff]  }
 0x25c   : > { %v3260_v20 = vrot.slane %v3233_v30, 2  ;;  %v3235_v37 = vpop.f32.mrb[27].mxu0 }
 0x25d   : > { %v3261_v39 = vrot.slane %v3235_v37, 2 }
 0x25e   : > { %v3279_v61 = vsel %vm3270_vm7, %v3258_v55, %v3260_v20 }
 0x25f   : > { %v3283_v45 = vadd.f32 %v3279_v61, %v12382_v42  ;;  %v3280_v3 = vsel %vm3270_vm7, %v3259_v62, %v3261_v39 }
 0x260   : > { %v3284_v16 = vadd.f32 %v3280_v3, %v12388_v17 }
 0x261   : > { %v3239_v27 = vpop.f32.mrb[28].mxu0  ;;  %v3307_v42 = vadd.f32 %v12568_v21, %v3283_v45 }
 0x262   : > { %v3262_v8 = vrot.slane %v3239_v27, 2  ;;  %v3241_v24 = vpop.f32.mrb[29].mxu0  ;;  %v3308_v52 = vadd.f32 %v12582_v48, %v3284_v16 }
 0x263   : > { %v3263_v53 = vrot.slane %v3241_v24, 2  ;;  %v3243_v17 = vpop.f32.mrb[30].mxu0  ;;  %v3319_v6 = vmax.f32 %v3307_v42, 0.0 }
 0x264   : > { %v3277_v56 = vsel %vm3270_vm7, %v3260_v20, %v3262_v8  ;;  %v3264_v58 = vrot.slane %v3243_v17, 2  ;;  %v3245_v60 = vpop.f32.mrb[31].mxu0 }
 0x265   : > { %v3285_v63 = vadd.f32 %v3277_v56, %v12410_v46  ;;  %v3278_v0 = vsel %vm3270_vm7, %v3261_v39, %v3263_v53  ;;  %v3265_v2 = vrot.slane %v3245_v60, 2  ;;  %v3320_v46 = vmax.f32 %v3308_v52, 0.0 }
 0x266   : > { %v3286_v7 = vadd.f32 %v3278_v0, %v12421_v19  ;;  %v3275_v47 = vsel %vm3270_vm7, %v3262_v8, %v3264_v58  ;;  %v11007_v19 = vmov 0.0  }
 0x267   : > { %v3309_v9 = vadd.f32 %v12568_v21, %v3285_v63  ;;  %v3287_v10 = vadd.f32 %v3275_v47, %v12428_v22  ;;  %v3276_v43 = vsel %vm3270_vm7, %v3263_v53, %v3265_v2  ;;  %v12624_v40 = vsel %vm12586_vm4, 1.0, %v11007_v19 }
 0x268   : > { %v12628_v23 = vsel %vm12593_vm8, 1.0, %v11007_v19  ;;  %v3310_v50 = vadd.f32 %v12582_v48, %v3286_v7  ;;  %v3288_v22 = vadd.f32 %v3276_v43, %v12432_v49  ;;  %v12636_v30 = vsel %vm12604_vm11, 1.0, %v11007_v19 }
 0x269   : > { %v3321_v25 = vmax.f32 %v3309_v9, 0.0  ;;  %v3311_v31 = vadd.f32 %v12568_v21, %v3287_v10  ;;  %v12639_v34 = vsel %vm506_vm13, 1.0, %v11007_v19  ;;  %v3249_v20 = vpop.f32.mrb[32].mxu0  ;;  %v12644_v49 = vsel %vm12618_vm14, 1.0, %v11007_v19 }
 0x26a   : > { %v3322_v37 = vmax.f32 %v3310_v50, 0.0  ;;  %v3312_v59 = vadd.f32 %v12582_v48, %v3288_v22  ;;  %v3266_v38 = vrot.slane %v3249_v20, 2  ;;  %v3251_v39 = vpop.f32.mrb[33].mxu0  ;;  %v3331_v41 = vmul.f32 %v12624_v40, %v3319_v6  ;;  %v10329_v6 = vld [vmem:[%s14870_s3 + $0x414] ss:$8 sps:$4 sm:$0xff]  }
 0x26b   : > { %v3332_v61 = vmul.f32 %v12624_v40, %v3320_v46  ;;  %v3267_v44 = vrot.slane %v3251_v39, 2  ;;  %v12648_v28 = vsel %vm508_vm15, 1.0, %v11007_v19  ;;  %v3253_v45 = vpop.f32.mrb[34].mxu0  ;;  %v3333_v3 = vmul.f32 %v12628_v23, %v3321_v25  ;;  %v10327_v25 = vld [vmem:[%s14870_s3 + $0x410] ss:$8 sps:$4 sm:$0xff]  }
 0x26c   : > { %v3334_v15 = vmul.f32 %v12628_v23, %v3322_v37  ;;  %v3273_v16 = vsel %vm3270_vm7, %v3264_v58, %v3266_v38  ;;  %v3268_v4 = vrot.slane %v3253_v45, 2  ;;  %v3255_v27 = vpop.f32.mrb[35].mxu0  ;;  %v3323_v33 = vmax.f32 %v3311_v31, 0.0 }
 0x26d   : > { %v3289_v42 = vadd.f32 %v3273_v16, %v12454_v12  ;;  %v3274_v8 = vsel %vm3270_vm7, %v3265_v2, %v3267_v44  ;;  %v3269_v24 = vrot.slane %v3255_v27, 2  ;;  %v3324_v51 = vmax.f32 %v3312_v59, 0.0  ;;  %v10332_v59 = vld [vmem:[%s14870_s3 + $0x124] ss:$8 sps:$4 sm:$0xff]   ;;  %v10336_v16 = vld [vmem:[%s14870_s3 + $0x130] ss:$8 sps:$4 sm:$0xff]  }
 0x26e   : > { %v3290_v52 = vadd.f32 %v3274_v8, %v12465_v26  ;;  %v3271_v53 = vsel %vm3270_vm7, %v3266_v38, %v3268_v4  ;;  %v3281_v17 = vsel %vm3270_vm7, %v3268_v4, %v3258_v55  ;;  %v12675_v63 = vpack.c.bf16 %v3334_v15, %v3332_v61  ;;  %v10335_v38 = vld [vmem:[%s14870_s3 + $0x424] ss:$8 sps:$4 sm:$0xff]   ;;  %v10330_v61 = vld [vmem:[%s14870_s3 + $0x120] ss:$8 sps:$4 sm:$0xff]   ;;  %v10341_v15 = vld [vmem:[%s14870_s3 + $0x434] ss:$8 sps:$4 sm:$0xff]  }
 0x26f   : > { %v3313_v54 = vadd.f32 %v12568_v21, %v3289_v42  ;;  %v3291_v56 = vadd.f32 %v3271_v53, %v12476_v32  ;;  %v3293_v12 = vadd.f32 %v3281_v17, %v12478_v5  ;;  %v3272_v58 = vsel %vm3270_vm7, %v3267_v44, %v3269_v24  ;;  %v10333_v44 = vld [vmem:[%s14870_s3 + $0x420] ss:$8 sps:$4 sm:$0xff]   ;;  %v10339_v4 = vld [vmem:[%s14870_s3 + $0x430] ss:$8 sps:$4 sm:$0xff]   ;;  %v10344_v27 = vld [vmem:[%s14870_s3 + $0x144] ss:$8 sps:$4 sm:$0xff]  }
 0x270   : > { %v3314_v60 = vadd.f32 %v12582_v48, %v3290_v52  ;;  %v3282_v26 = vsel %vm3270_vm7, %v3269_v24, %v3259_v62  ;;  %v3292_v29 = vadd.f32 %v3272_v58, %v12486_v35  ;;  %v3335_v62 = vmul.f32 %v12636_v30, %v3323_v33  ;;  %3585 = vmatprep.mubr.bf16.mxu1 %v12675_v63  ;;  %v10347_v33 = vld [vmem:[%s14870_s3 + $0x444] ss:$8 sps:$4 sm:$0xff]   ;;  %v10342_v42 = vld [vmem:[%s14870_s3 + $0x140] ss:$8 sps:$4 sm:$0xff]   ;;  %v10350_v24 = vld [vmem:[%s14870_s3 + $0x154] ss:$8 sps:$4 sm:$0xff]  }
 0x271   : > { %v3325_v55 = vmax.f32 %v3313_v54, 0.0  ;;  %v3315_v0 = vadd.f32 %v12568_v21, %v3291_v56  ;;  %v3317_v32 = vadd.f32 %v12568_v21, %v3293_v12  ;;  %v3294_v5 = vadd.f32 %v3282_v26, %v12488_v57  ;;  %4157 = vmatprep.mubr.bf16.mxu0 %v12675_v63  ;;  %v10326_v57 = vld [vmem:[%s14870_s3 + $0x114] ss:$8 sps:$4 sm:$0xff]   ;;  %v10345_v8 = vld [vmem:[%s14870_s3 + $0x440] ss:$8 sps:$4 sm:$0xff]  }
 0x272   : > { %v3326_v35 = vmax.f32 %v3314_v60, 0.0  ;;  %v3316_v2 = vadd.f32 %v12582_v48, %v3292_v29  ;;  %v12690_v21 = vpack.c.bf16 %v3333_v3, %v3331_v41  ;;  %v3336_v10 = vmul.f32 %v12636_v30, %v3324_v51  ;;  %v10338_v3 = vld [vmem:[%s14870_s3 + $0x134] ss:$8 sps:$4 sm:$0xff]   ;;  %v10348_v52 = vld [vmem:[%s14870_s3 + $0x150] ss:$8 sps:$4 sm:$0xff]  }
 0x273   : > { %v3337_v7 = vmul.f32 %v12639_v34, %v3325_v55  ;;  %v3327_v47 = vmax.f32 %v3315_v0, 0.0  ;;  %v3329_v46 = vmax.f32 %v3317_v32, 0.0  ;;  %v3318_v9 = vadd.f32 %v12582_v48, %v3294_v5  ;;  %v10324_v48 = vld [vmem:[%s14870_s3 + $0x110] ss:$8 sps:$4 sm:$0xff]   ;;  %v10353_v51 = vld [vmem:[%s14870_s3 + $0x454] ss:$8 sps:$4 sm:$0xff]  }
 0x274   : > { %v3338_v43 = vmul.f32 %v12639_v34, %v3326_v35  ;;  %v3328_v11 = vmax.f32 %v3316_v2, 0.0  ;;  %3586 = vmatmul.mubr.bf16.vlgmr.msra.gmra.mrb[24].mxu1 %v12690_v21  ;;  %4158 = vmatmul.mubr.bf16.vlgmr.msra.gmra.mrb[36].mxu0 %v12690_v21  ;;  %v10351_v53 = vld [vmem:[%s14870_s3 + $0x450] ss:$8 sps:$4 sm:$0xff]   ;;  %v10356_v17 = vld [vmem:[%s14870_s3 + $0x164] ss:$8 sps:$4 sm:$0xff]  }
 0x275   : > { %v3339_v19 = vmul.f32 %v12644_v49, %v3327_v47  ;;  %v3341_v50 = vmul.f32 %v12648_v28, %v3329_v46  ;;  %v3330_v22 = vmax.f32 %v3318_v9, 0.0  ;;  %3834 = vmatpush1.bf16.msra.mxu1 %v10318_v1  ;;  %4686 = vmatpush1.bf16.msra.mxu0 %v10321_v14  ;;  %v12712_v31 = vpack.c.bf16 %v3337_v7, %v3335_v62  ;;  %v10359_v54 = vld [vmem:[%s14870_s3 + $0x464] ss:$8 sps:$4 sm:$0xff]   ;;  %v10354_v56 = vld [vmem:[%s14870_s3 + $0x160] ss:$8 sps:$4 sm:$0xff]  }
 0x276   : > { %v3340_v20 = vmul.f32 %v12644_v49, %v3328_v11  ;;  %3835 = vmatprep.subr.bf16.mxu1 %v10326_v57  ;;  %4687 = vmatprep.subr.bf16.mxu0 %v10329_v6  ;;  %v12715_v37 = vpack.c.bf16 %v3338_v43, %v3336_v10  ;;  %v10357_v12 = vld [vmem:[%s14870_s3 + $0x460] ss:$8 sps:$4 sm:$0xff]   ;;  %v10362_v58 = vld [vmem:[%s14870_s3 + $0x174] ss:$8 sps:$4 sm:$0xff]   ;;  %v10360_v26 = vld [vmem:[%s14870_s3 + $0x170] ss:$8 sps:$4 sm:$0xff]  }
 0x277   : > { %v3342_v39 = vmul.f32 %v12648_v28, %v3330_v22  ;;  %v12724_v41 = vpack.c.bf16 %v3341_v50, %v3339_v19  ;;  %v10365_v60 = vld [vmem:[%s14870_s3 + $0x474] ss:$8 sps:$4 sm:$0xff]   ;;  %v10363_v29 = vld [vmem:[%s14870_s3 + $0x470] ss:$8 sps:$4 sm:$0xff]   ;;  %v10368_v55 = vld [vmem:[%s14870_s3 + $0x184] ss:$8 sps:$4 sm:$0xff]  }
 0x278   : > { %3595 = vmatprep.mubr.bf16.mxu1 %v12715_v37  ;;  %4167 = vmatprep.mubr.bf16.mxu0 %v12715_v37  ;;  %v10371_v0 = vld [vmem:[%s14870_s3 + $0x484] ss:$8 sps:$4 sm:$0xff]   ;;  %v10366_v32 = vld [vmem:[%s14870_s3 + $0x180] ss:$8 sps:$4 sm:$0xff]   ;;  %v10374_v1 = vld [vmem:[%s14870_s3 + $0x194] ss:$8 sps:$4 sm:$0xff]  }
 0x279   : > { %3836 = vmatpush1.bf16.msra.mxu1 %v10324_v48  ;;  %4688 = vmatpush1.bf16.msra.mxu0 %v10327_v25  ;;  %v12734_v45 = vpack.c.bf16 %v3342_v39, %v3340_v20  ;;  %v10369_v5 = vld [vmem:[%s14870_s3 + $0x480] ss:$8 sps:$4 sm:$0xff]   ;;  %v10377_v14 = vld [vmem:[%s14870_s3 + $0x494] ss:$8 sps:$4 sm:$0xff]   ;;  %v10372_v62 = vld [vmem:[%s14870_s3 + $0x190] ss:$8 sps:$4 sm:$0xff]  }
 0x27a   : > { %3837 = vmatprep.subr.bf16.mxu1 %v10332_v59  ;;  %4689 = vmatprep.subr.bf16.mxu0 %v10335_v38  ;;  %v10375_v35 = vld [vmem:[%s14870_s3 + $0x490] ss:$8 sps:$4 sm:$0xff]   ;;  %v10380_v2 = vld [vmem:[%s14870_s3 + $0x1a4] ss:$8 sps:$4 sm:$0xff]   ;;  %v10378_v6 = vld [vmem:[%s14870_s3 + $0x1a0] ss:$8 sps:$4 sm:$0xff]  }
 0x27b   : > { %v10383_v57 = vld [vmem:[%s14870_s3 + $0x4a4] ss:$8 sps:$4 sm:$0xff]   ;;  %v10381_v7 = vld [vmem:[%s14870_s3 + $0x4a0] ss:$8 sps:$4 sm:$0xff]   ;;  %v10386_v47 = vld [vmem:[%s14870_s3 + $0x1b4] ss:$8 sps:$4 sm:$0xff]  }
 0x27c   : > { %3596 = vmatmul.mubr.bf16.gmra.mrb[28].mxu1 %v12712_v31  ;;  %4168 = vmatmul.mubr.bf16.gmra.mrb[40].mxu0 %v12712_v31  ;;  %v10389_v46 = vld [vmem:[%s14870_s3 + $0x4b4] ss:$8 sps:$4 sm:$0xff]   ;;  %v10384_v9 = vld [vmem:[%s14870_s3 + $0x1b0] ss:$8 sps:$4 sm:$0xff]   ;;  %v10392_v43 = vld [vmem:[%s14870_s3 + $0x1c4] ss:$8 sps:$4 sm:$0xff]  }
 0x27d   : > { %3838 = vmatpush1.bf16.msra.mxu1 %v10330_v61  ;;  %4690 = vmatpush1.bf16.msra.mxu0 %v10333_v44  ;;  %v10387_v10 = vld [vmem:[%s14870_s3 + $0x4b0] ss:$8 sps:$4 sm:$0xff]   ;;  %v10395_v11 = vld [vmem:[%s14870_s3 + $0x4c4] ss:$8 sps:$4 sm:$0xff]   ;;  %v10390_v19 = vld [vmem:[%s14870_s3 + $0x1c0] ss:$8 sps:$4 sm:$0xff]  }
 0x27e   : > { %3605 = vmatprep.mubr.bf16.mxu1 %v12734_v45  ;;  %4177 = vmatprep.mubr.bf16.mxu0 %v12734_v45  ;;  %v10393_v50 = vld [vmem:[%s14870_s3 + $0x4c0] ss:$8 sps:$4 sm:$0xff]   ;;  %v10398_v22 = vld [vmem:[%s14870_s3 + $0x1d4] ss:$8 sps:$4 sm:$0xff]   ;;  %v10396_v25 = vld [vmem:[%s14870_s3 + $0x1d0] ss:$8 sps:$4 sm:$0xff]  }
 0x27f   : > { %3839 = vmatprep.subr.bf16.mxu1 %v10338_v3  ;;  %4691 = vmatprep.subr.bf16.mxu0 %v10341_v15  ;;  %v10401_v48 = vld [vmem:[%s14870_s3 + $0x4d4] ss:$8 sps:$4 sm:$0xff]   ;;  %v10399_v20 = vld [vmem:[%s14870_s3 + $0x4d0] ss:$8 sps:$4 sm:$0xff]   ;;  %v10404_v59 = vld [vmem:[%s14870_s3 + $0x1e4] ss:$8 sps:$4 sm:$0xff]  }
 0x280   : > { %v10407_v38 = vld [vmem:[%s14870_s3 + $0x4e4] ss:$8 sps:$4 sm:$0xff]   ;;  %v10402_v39 = vld [vmem:[%s14870_s3 + $0x1e0] ss:$8 sps:$4 sm:$0xff]   ;;  %v10410_v44 = vld [vmem:[%s14870_s3 + $0x1f4] ss:$8 sps:$4 sm:$0xff]  }
 0x281   : > { %3840 = vmatpush1.bf16.msra.mxu1 %v10336_v16  ;;  %4692 = vmatpush1.bf16.msra.mxu0 %v10339_v4  ;;  %v10405_v61 = vld [vmem:[%s14870_s3 + $0x4e0] ss:$8 sps:$4 sm:$0xff]   ;;  %v10413_v3 = vld [vmem:[%s14870_s3 + $0x4f4] ss:$8 sps:$4 sm:$0xff]   ;;  %v10408_v15 = vld [vmem:[%s14870_s3 + $0x1f0] ss:$8 sps:$4 sm:$0xff]  }
 0x282   : > { %3841 = vmatprep.subr.bf16.mxu1 %v10344_v27  ;;  %4693 = vmatprep.subr.bf16.mxu0 %v10347_v33  ;;  %v10411_v16 = vld [vmem:[%s14870_s3 + $0x4f0] ss:$8 sps:$4 sm:$0xff]   ;;  %v10416_v4 = vld [vmem:[%s14870_s3 + $0x304] ss:$8 sps:$4 sm:$0xff]   ;;  %v10414_v27 = vld [vmem:[%s14870_s3 + $0x300] ss:$8 sps:$4 sm:$0xff]  }
 0x283   : > { %v10419_v33 = vld [vmem:[%s14870_s3 + $0x314] ss:$8 sps:$4 sm:$0xff]  }
 0x284   : > { %3606 = vmatmul.mubr.bf16.gmra.mrb[32].mxu1 %v12724_v41  ;;  %4178 = vmatmul.mubr.bf16.gmra.mrb[44].mxu0 %v12724_v41 }
 0x285   : > { %3842 = vmatpush1.bf16.msra.mxu1 %v10342_v42  ;;  %4694 = vmatpush1.bf16.msra.mxu0 %v10345_v8  ;;  %v10417_v42 = vld [vmem:[%s14870_s3 + $0x310] ss:$8 sps:$4 sm:$0xff]   ;;  %v10422_v8 = vld [vmem:[%s14870_s3 + $0x324] ss:$8 sps:$4 sm:$0xff]  }
 0x286   : > { %3865 = vmatprep.mubr.bf16.mxu1 %v12675_v63  ;;  %4717 = vmatprep.mubr.bf16.mxu0 %v12675_v63 }
 0x287   : > { %3843 = vmatprep.subr.bf16.mxu1 %v10350_v24  ;;  %4695 = vmatprep.subr.bf16.mxu0 %v10353_v51  ;;  %v10420_v24 = vld [vmem:[%s14870_s3 + $0x320] ss:$8 sps:$4 sm:$0xff]   ;;  %v10425_v51 = vld [vmem:[%s14870_s3 + $0x334] ss:$8 sps:$4 sm:$0xff]  }
 0x289   : > { %3844 = vmatpush1.bf16.msra.mxu1 %v10348_v52  ;;  %4696 = vmatpush1.bf16.msra.mxu0 %v10351_v53  ;;  %v10423_v52 = vld [vmem:[%s14870_s3 + $0x330] ss:$8 sps:$4 sm:$0xff]   ;;  %v10428_v53 = vld [vmem:[%s14870_s3 + $0x344] ss:$8 sps:$4 sm:$0xff]  }
 0x28a   : > { %3845 = vmatprep.subr.bf16.mxu1 %v10356_v17  ;;  %4697 = vmatprep.subr.bf16.mxu0 %v10359_v54  ;;  %v10426_v17 = vld [vmem:[%s14870_s3 + $0x340] ss:$8 sps:$4 sm:$0xff]   ;;  %v10431_v54 = vld [vmem:[%s14870_s3 + $0x354] ss:$8 sps:$4 sm:$0xff]  }
 0x28d   : > { %3846 = vmatpush1.bf16.msra.mxu1 %v10354_v56  ;;  %4698 = vmatpush1.bf16.msra.mxu0 %v10357_v12  ;;  %v10429_v56 = vld [vmem:[%s14870_s3 + $0x350] ss:$8 sps:$4 sm:$0xff]   ;;  %v10434_v12 = vld [vmem:[%s14870_s3 + $0x364] ss:$8 sps:$4 sm:$0xff]  }
 0x28e   : > { %3847 = vmatprep.subr.bf16.mxu1 %v10362_v58  ;;  %4699 = vmatprep.subr.bf16.mxu0 %v10365_v60  ;;  %v10432_v58 = vld [vmem:[%s14870_s3 + $0x360] ss:$8 sps:$4 sm:$0xff]   ;;  %v10437_v60 = vld [vmem:[%s14870_s3 + $0x374] ss:$8 sps:$4 sm:$0xff]  }
 0x291   : > { %3848 = vmatpush1.bf16.msra.mxu1 %v10360_v26  ;;  %4700 = vmatpush1.bf16.msra.mxu0 %v10363_v29  ;;  %v10440_v26 = vld [vmem:[%s14870_s3 + $0x384] ss:$8 sps:$4 sm:$0xff]   ;;  %v10438_v29 = vld [vmem:[%s14870_s3 + $0x380] ss:$8 sps:$4 sm:$0xff]  }
 0x292   : > { %3849 = vmatprep.subr.bf16.mxu1 %v10368_v55  ;;  %4701 = vmatprep.subr.bf16.mxu0 %v10371_v0  ;;  %v10443_v55 = vld [vmem:[%s14870_s3 + $0x394] ss:$8 sps:$4 sm:$0xff]   ;;  %v10441_v0 = vld [vmem:[%s14870_s3 + $0x390] ss:$8 sps:$4 sm:$0xff]  }
 0x295   : > { %3850 = vmatpush1.bf16.msra.mxu1 %v10366_v32  ;;  %4702 = vmatpush1.bf16.msra.mxu0 %v10369_v5  ;;  %v10446_v32 = vld [vmem:[%s14870_s3 + $0x3a4] ss:$8 sps:$4 sm:$0xff]   ;;  %v10444_v5 = vld [vmem:[%s14870_s3 + $0x3a0] ss:$8 sps:$4 sm:$0xff]  }
 0x296   : > { %3851 = vmatprep.subr.bf16.mxu1 %v10374_v1  ;;  %4703 = vmatprep.subr.bf16.mxu0 %v10377_v14  ;;  %v10449_v1 = vld [vmem:[%s14870_s3 + $0x3b4] ss:$8 sps:$4 sm:$0xff]   ;;  %v10447_v14 = vld [vmem:[%s14870_s3 + $0x3b0] ss:$8 sps:$4 sm:$0xff]  }
 0x299   : > { %3852 = vmatpush1.bf16.msra.mxu1 %v10372_v62  ;;  %4704 = vmatpush1.bf16.msra.mxu0 %v10375_v35  ;;  %v10452_v62 = vld [vmem:[%s14870_s3 + $0x3c4] ss:$8 sps:$4 sm:$0xff]   ;;  %v10450_v35 = vld [vmem:[%s14870_s3 + $0x3c0] ss:$8 sps:$4 sm:$0xff]  }
 0x29a   : > { %3853 = vmatprep.subr.bf16.mxu1 %v10380_v2  ;;  %4705 = vmatprep.subr.bf16.mxu0 %v10383_v57  ;;  %v10455_v2 = vld [vmem:[%s14870_s3 + $0x3d4] ss:$8 sps:$4 sm:$0xff]   ;;  %v10453_v57 = vld [vmem:[%s14870_s3 + $0x3d0] ss:$8 sps:$4 sm:$0xff]  }
 0x29d   : > { %3854 = vmatpush1.bf16.msra.mxu1 %v10378_v6  ;;  %4706 = vmatpush1.bf16.msra.mxu0 %v10381_v7  ;;  %v10458_v6 = vld [vmem:[%s14870_s3 + $0x3e4] ss:$8 sps:$4 sm:$0xff]   ;;  %v10456_v7 = vld [vmem:[%s14870_s3 + $0x3e0] ss:$8 sps:$4 sm:$0xff]  }
 0x29e   : > { %3855 = vmatprep.subr.bf16.mxu1 %v10386_v47  ;;  %4707 = vmatprep.subr.bf16.mxu0 %v10389_v46  ;;  %v10461_v47 = vld [vmem:[%s14870_s3 + $0x3f4] ss:$8 sps:$4 sm:$0xff]   ;;  %v10459_v46 = vld [vmem:[%s14870_s3 + $0x3f0] ss:$8 sps:$4 sm:$0xff]  }
 0x2a1   : > { %3856 = vmatpush1.bf16.msra.mxu1 %v10384_v9  ;;  %4708 = vmatpush1.bf16.msra.mxu0 %v10387_v10  ;;  %v10462_v9 = vld [vmem:[%s14872_s5] ss:$8 sps:$4 sm:$0xff]   ;;  %v10464_v10 = vld [vmem:[%s14872_s5 + $0x4] ss:$8 sps:$4 sm:$0xff]  }
 0x2a2   : > { %3857 = vmatprep.subr.bf16.mxu1 %v10392_v43  ;;  %4709 = vmatprep.subr.bf16.mxu0 %v10395_v11  ;;  %v10471_v43 = vld [vmem:[%s14872_s5 + $0x110] ss:$8 sps:$4 sm:$0xff]   ;;  %v10476_v11 = vld [vmem:[%s14872_s5 + $0x24] ss:$8 sps:$4 sm:$0xff]  }
 0x2a5   : > { %3858 = vmatpush1.bf16.msra.mxu1 %v10390_v19  ;;  %4710 = vmatpush1.bf16.msra.mxu0 %v10393_v50  ;;  %v10479_v19 = vld [vmem:[%s14872_s5 + $0x124] ss:$8 sps:$4 sm:$0xff]   ;;  %v10474_v50 = vld [vmem:[%s14872_s5 + $0x20] ss:$8 sps:$4 sm:$0xff]  }
 0x2a6   : > { %3859 = vmatprep.subr.bf16.mxu1 %v10398_v22  ;;  %4711 = vmatprep.subr.bf16.mxu0 %v10401_v48  ;;  %v10477_v22 = vld [vmem:[%s14872_s5 + $0x120] ss:$8 sps:$4 sm:$0xff]   ;;  %v10482_v48 = vld [vmem:[%s14872_s5 + $0x34] ss:$8 sps:$4 sm:$0xff]  }
 0x2a9   : > { %3860 = vmatpush1.bf16.msra.mxu1 %v10396_v25  ;;  %4712 = vmatpush1.bf16.msra.mxu0 %v10399_v20  ;;  %v10485_v25 = vld [vmem:[%s14872_s5 + $0x134] ss:$8 sps:$4 sm:$0xff]   ;;  %v10480_v20 = vld [vmem:[%s14872_s5 + $0x30] ss:$8 sps:$4 sm:$0xff]  }
 0x2aa   : > { %3861 = vmatprep.subr.bf16.mxu1 %v10404_v59  ;;  %4713 = vmatprep.subr.bf16.mxu0 %v10407_v38  ;;  %v10483_v59 = vld [vmem:[%s14872_s5 + $0x130] ss:$8 sps:$4 sm:$0xff]   ;;  %v10488_v38 = vld [vmem:[%s14872_s5 + $0x44] ss:$8 sps:$4 sm:$0xff]  }
 0x2ad   : > { %3862 = vmatpush1.bf16.msra.mxu1 %v10402_v39  ;;  %4714 = vmatpush1.bf16.msra.mxu0 %v10405_v61  ;;  %v10491_v39 = vld [vmem:[%s14872_s5 + $0x144] ss:$8 sps:$4 sm:$0xff]   ;;  %v10486_v61 = vld [vmem:[%s14872_s5 + $0x40] ss:$8 sps:$4 sm:$0xff]  }
 0x2ae   : > { %3863 = vmatprep.subr.bf16.mxu1 %v10410_v44  ;;  %4715 = vmatprep.subr.bf16.mxu0 %v10413_v3  ;;  %v10489_v44 = vld [vmem:[%s14872_s5 + $0x140] ss:$8 sps:$4 sm:$0xff]   ;;  %v10494_v3 = vld [vmem:[%s14872_s5 + $0x54] ss:$8 sps:$4 sm:$0xff]  }
 0x2b1   : > { %3864 = vmatpush1.bf16.msra.mxu1 %v10408_v15  ;;  %4716 = vmatpush1.bf16.msra.mxu0 %v10411_v16  ;;  %v10497_v15 = vld [vmem:[%s14872_s5 + $0x154] ss:$8 sps:$4 sm:$0xff]   ;;  %v10492_v16 = vld [vmem:[%s14872_s5 + $0x50] ss:$8 sps:$4 sm:$0xff]  }
 0x2b2   : > { %4393 = vmatprep.subr.bf16.mxu1 %v10416_v4  ;;  %v10495_v4 = vld [vmem:[%s14872_s5 + $0x150] ss:$8 sps:$4 sm:$0xff]  }
 0x2b4   : > { %3866 = vmatmul.mubr.bf16.vlgmr.msra.gmra.mrb[36].mxu1 %v12690_v21  ;;  %4718 = vmatmul.mubr.bf16.vlgmr.msra.gmra.mrb[48].mxu0 %v12690_v21 }
 0x2b5   : > { %3875 = vmatprep.mubr.bf16.mxu1 %v12715_v37  ;;  %4394 = vmatpush1.bf16.msra.mxu1 %v10414_v27  ;;  %v10500_v27 = vld [vmem:[%s14872_s5 + $0x64] ss:$8 sps:$4 sm:$0xff]  }
 0x2b6   : > { %4727 = vmatprep.mubr.bf16.mxu0 %v12715_v37  ;;  %4395 = vmatprep.subr.bf16.mxu1 %v10419_v33  ;;  %v10503_v33 = vld [vmem:[%s14872_s5 + $0x164] ss:$8 sps:$4 sm:$0xff]  }
 0x2b9   : > { %4396 = vmatpush1.bf16.msra.mxu1 %v10417_v42  ;;  %v10498_v42 = vld [vmem:[%s14872_s5 + $0x60] ss:$8 sps:$4 sm:$0xff]  }
 0x2ba   : > { %4397 = vmatprep.subr.bf16.mxu1 %v10422_v8  ;;  %v10501_v8 = vld [vmem:[%s14872_s5 + $0x160] ss:$8 sps:$4 sm:$0xff]  }
 0x2bc   : > { %3876 = vmatmul.mubr.bf16.gmra.mrb[40].mxu1 %v12712_v31  ;;  %4728 = vmatmul.mubr.bf16.gmra.mrb[52].mxu0 %v12712_v31 }
 0x2bd   : > { %3885 = vmatprep.mubr.bf16.mxu1 %v12734_v45  ;;  %4398 = vmatpush1.bf16.msra.mxu1 %v10420_v24  ;;  %v10506_v24 = vld [vmem:[%s14872_s5 + $0x74] ss:$8 sps:$4 sm:$0xff]  }
 0x2be   : > { %4737 = vmatprep.mubr.bf16.mxu0 %v12734_v45  ;;  %4399 = vmatprep.subr.bf16.mxu1 %v10425_v51  ;;  %v10509_v51 = vld [vmem:[%s14872_s5 + $0x174] ss:$8 sps:$4 sm:$0xff]  }
 0x2c1   : > { %4400 = vmatpush1.bf16.msra.mxu1 %v10423_v52  ;;  %v10504_v52 = vld [vmem:[%s14872_s5 + $0x70] ss:$8 sps:$4 sm:$0xff]  }
 0x2c2   : > { %4401 = vmatprep.subr.bf16.mxu1 %v10428_v53  ;;  %v10507_v53 = vld [vmem:[%s14872_s5 + $0x170] ss:$8 sps:$4 sm:$0xff]  }
 0x2c4   : > { %3886 = vmatmul.mubr.bf16.gmra.mrb[44].mxu1 %v12724_v41  ;;  %4738 = vmatmul.mubr.bf16.gmra.mrb[56].mxu0 %v12724_v41 }
 0x2c5   : > { %4402 = vmatpush1.bf16.msra.mxu1 %v10426_v17  ;;  %4425 = vmatprep.mubr.bf16.mxu1 %v12675_v63  ;;  %v10435_v63 = vld [vmem:[%s14870_s3 + $0x370] ss:$8 sps:$4 sm:$0xff]   ;;  %v10512_v17 = vld [vmem:[%s14872_s5 + $0x84] ss:$8 sps:$4 sm:$0xff]  }
 0x2c6   : > { %4403 = vmatprep.subr.bf16.mxu1 %v10431_v54  ;;  %v10515_v54 = vld [vmem:[%s14872_s5 + $0x184] ss:$8 sps:$4 sm:$0xff]  }
 0x2c9   : > { %4404 = vmatpush1.bf16.msra.mxu1 %v10429_v56  ;;  %v10510_v56 = vld [vmem:[%s14872_s5 + $0x80] ss:$8 sps:$4 sm:$0xff]  }
 0x2ca   : > { %4405 = vmatprep.subr.bf16.mxu1 %v10434_v12  ;;  %v10513_v12 = vld [vmem:[%s14872_s5 + $0x180] ss:$8 sps:$4 sm:$0xff]  }
 0x2cd   : > { %4406 = vmatpush1.bf16.msra.mxu1 %v10432_v58  ;;  %v10518_v58 = vld [vmem:[%s14872_s5 + $0x94] ss:$8 sps:$4 sm:$0xff]  }
 0x2ce   : > { %4407 = vmatprep.subr.bf16.mxu1 %v10437_v60  ;;  %v10521_v60 = vld [vmem:[%s14872_s5 + $0x194] ss:$8 sps:$4 sm:$0xff]  }
 0x2d1   : > { %4408 = vmatpush1.bf16.msra.mxu1 %v10435_v63  ;;  %v10516_v63 = vld [vmem:[%s14872_s5 + $0x90] ss:$8 sps:$4 sm:$0xff]  }
 0x2d2   : > { %4409 = vmatprep.subr.bf16.mxu1 %v10440_v26  ;;  %v10519_v26 = vld [vmem:[%s14872_s5 + $0x190] ss:$8 sps:$4 sm:$0xff]  }
 0x2d5   : > { %4410 = vmatpush1.bf16.msra.mxu1 %v10438_v29 }
 0x2d6   : > { %4411 = vmatprep.subr.bf16.mxu1 %v10443_v55 }
 0x2d9   : > { %4412 = vmatpush1.bf16.msra.mxu1 %v10441_v0 }
 0x2da   : > { %4413 = vmatprep.subr.bf16.mxu1 %v10446_v32 }
 0x2dd   : > { %4414 = vmatpush1.bf16.msra.mxu1 %v10444_v5 }
 0x2de   : > { %4415 = vmatprep.subr.bf16.mxu1 %v10449_v1 }
 0x2e1   : > { %4416 = vmatpush1.bf16.msra.mxu1 %v10447_v14  ;;  %v10522_v14 = vld [vmem:[%s14872_s5 + $0xa0] ss:$8 sps:$4 sm:$0xff]  }
 0x2e2   : > { %4417 = vmatprep.subr.bf16.mxu1 %v10452_v62 }
 0x2e5   : > { %4418 = vmatpush1.bf16.msra.mxu1 %v10450_v35 }
 0x2e6   : > { %4419 = vmatprep.subr.bf16.mxu1 %v10455_v2 }
 0x2e9   : > { %4420 = vmatpush1.bf16.msra.mxu1 %v10453_v57 }
 0x2ea   : > { %4421 = vmatprep.subr.bf16.mxu1 %v10458_v6  ;;  %v10524_v6 = vld [vmem:[%s14872_s5 + $0xa4] ss:$8 sps:$4 sm:$0xff]  }
 0x2ed   : > { %4422 = vmatpush1.bf16.msra.mxu1 %v10456_v7 }
 0x2ee   : > { %4423 = vmatprep.subr.bf16.mxu1 %v10461_v47 }
 0x2f1   : > { %4424 = vmatpush1.bf16.msra.mxu1 %v10459_v46  ;;  %v10525_v46 = vld [vmem:[%s14872_s5 + $0x1a0] ss:$8 sps:$4 sm:$0xff]  }
 0x2f2   : > { %5042 = vmatprep.subr.bf16.mxu1 %v10464_v10 }
 0x2f4   : > { %4426 = vmatmul.mubr.bf16.vlgmr.msra.gmra.mrb[48].mxu1 %v12690_v21  ;;  %v10465_v21 = vld [vmem:[%s14872_s5 + $0x100] ss:$8 sps:$4 sm:$0xff]  }
 0x2f5   : > { %4435 = vmatprep.mubr.bf16.mxu1 %v12715_v37  ;;  %v10470_v37 = vld [vmem:[%s14872_s5 + $0x14] ss:$8 sps:$4 sm:$0xff]   ;;  %5043 = vmatpush1.bf16.msra.mxu1 %v10462_v9  ;;  %v10527_v9 = vld [vmem:[%s14872_s5 + $0x1a4] ss:$8 sps:$4 sm:$0xff]  }
 0x2f6   : > { %5044 = vmatprep.subr.bf16.mxu1 %v10470_v37  ;;  %v10533_v37 = vld [vmem:[%s14872_s5 + $0x1b4] ss:$8 sps:$4 sm:$0xff]  }
 0x2fc   : > { %4436 = vmatmul.mubr.bf16.gmra.mrb[52].mxu1 %v12712_v31  ;;  %v10467_v31 = vld [vmem:[%s14872_s5 + $0x104] ss:$8 sps:$4 sm:$0xff]  }
 0x2fd   : > { %4445 = vmatprep.mubr.bf16.mxu1 %v12734_v45  ;;  %5322 = vmatprep.subr.bf16.mxu0 %v10467_v31  ;;  %v10468_v45 = vld [vmem:[%s14872_s5 + $0x10] ss:$8 sps:$4 sm:$0xff]   ;;  %v10530_v31 = vld [vmem:[%s14872_s5 + $0xb4] ss:$8 sps:$4 sm:$0xff]  }
 0x2fe   : > { %5323 = vmatpush1.bf16.msra.mxu0 %v10465_v21  ;;  %5045 = vmatpush1.bf16.msra.mxu1 %v10468_v45  ;;  %v10531_v45 = vld [vmem:[%s14872_s5 + $0x1b0] ss:$8 sps:$4 sm:$0xff]  }
 0x2ff   : > { %5046 = vmatprep.subr.bf16.mxu1 %v10476_v11 }
 0x302   : > { %5047 = vmatpush1.bf16.msra.mxu1 %v10474_v50 }
 0x303   : > { %5048 = vmatprep.subr.bf16.mxu1 %v10482_v48 }
 0x304   : > { %4446 = vmatmul.mubr.bf16.gmra.mrb[56].mxu1 %v12724_v41  ;;  %v10473_v41 = vld [vmem:[%s14872_s5 + $0x114] ss:$8 sps:$4 sm:$0xff]  }
 0x305   : > { %5324 = vmatprep.subr.bf16.mxu0 %v10473_v41  ;;  %v10528_v41 = vld [vmem:[%s14872_s5 + $0xb0] ss:$8 sps:$4 sm:$0xff]  }
 0x306   : > { %5325 = vmatpush1.bf16.msra.mxu0 %v10471_v43  ;;  %5049 = vmatpush1.bf16.msra.mxu1 %v10480_v20 }
 0x307   : > { %5326 = vmatprep.subr.bf16.mxu0 %v10479_v19  ;;  %5050 = vmatprep.subr.bf16.mxu1 %v10488_v38 }
 0x30a   : > { %5327 = vmatpush1.bf16.msra.mxu0 %v10477_v22  ;;  %5051 = vmatpush1.bf16.msra.mxu1 %v10486_v61 }
 0x30b   : > { %5328 = vmatprep.subr.bf16.mxu0 %v10485_v25  ;;  %5052 = vmatprep.subr.bf16.mxu1 %v10494_v3  ;;  %v10534_v3 = vld [vmem:[%s14872_s5 + $0xc0] ss:$8 sps:$4 sm:$0xff]  }
 0x30e   : > { %5329 = vmatpush1.bf16.msra.mxu0 %v10483_v59  ;;  %5053 = vmatpush1.bf16.msra.mxu1 %v10492_v16  ;;  %v10536_v59 = vld [vmem:[%s14872_s5 + $0xc4] ss:$8 sps:$4 sm:$0xff]  }
 0x30f   : > { %5330 = vmatprep.subr.bf16.mxu0 %v10491_v39  ;;  %5054 = vmatprep.subr.bf16.mxu1 %v10500_v27  ;;  %v10539_v27 = vld [vmem:[%s14872_s5 + $0x1c4] ss:$8 sps:$4 sm:$0xff]  }
 0x312   : > { %5331 = vmatpush1.bf16.msra.mxu0 %v10489_v44  ;;  %5055 = vmatpush1.bf16.msra.mxu1 %v10498_v42 }
 0x313   : > { %5332 = vmatprep.subr.bf16.mxu0 %v10497_v15  ;;  %5056 = vmatprep.subr.bf16.mxu1 %v10506_v24  ;;  %v10545_v24 = vld [vmem:[%s14872_s5 + $0x1d4] ss:$8 sps:$4 sm:$0xff]  }
 0x316   : > { %5333 = vmatpush1.bf16.msra.mxu0 %v10495_v4  ;;  %5057 = vmatpush1.bf16.msra.mxu1 %v10504_v52  ;;  %v10537_v4 = vld [vmem:[%s14872_s5 + $0x1c0] ss:$8 sps:$4 sm:$0xff]   ;;  %v10543_v52 = vld [vmem:[%s14872_s5 + $0x1d0] ss:$8 sps:$4 sm:$0xff]  }
 0x317   : > { %5334 = vmatprep.subr.bf16.mxu0 %v10503_v33  ;;  %5058 = vmatprep.subr.bf16.mxu1 %v10512_v17 }
 0x31a   : > { %5335 = vmatpush1.bf16.msra.mxu0 %v10501_v8  ;;  %5059 = vmatpush1.bf16.msra.mxu1 %v10510_v56  ;;  %v10542_v8 = vld [vmem:[%s14872_s5 + $0xd4] ss:$8 sps:$4 sm:$0xff]  }
 0x31b   : > { %5336 = vmatprep.subr.bf16.mxu0 %v10509_v51  ;;  %5060 = vmatprep.subr.bf16.mxu1 %v10518_v58  ;;  %v10540_v51 = vld [vmem:[%s14872_s5 + $0xd0] ss:$8 sps:$4 sm:$0xff]  }
 0x31e   : > { %5337 = vmatpush1.bf16.msra.mxu0 %v10507_v53  ;;  %5061 = vmatpush1.bf16.msra.mxu1 %v10516_v63 }
 0x31f   : > { %5338 = vmatprep.subr.bf16.mxu0 %v10515_v54  ;;  %5062 = vmatprep.subr.bf16.mxu1 %v10524_v6  ;;  %v10546_v6 = vld [vmem:[%s14872_s5 + $0xe0] ss:$8 sps:$4 sm:$0xff]  }
 0x322   : > { %5339 = vmatpush1.bf16.msra.mxu0 %v10513_v12  ;;  %5063 = vmatpush1.bf16.msra.mxu1 %v10522_v14 }
 0x323   : > { %5340 = vmatprep.subr.bf16.mxu0 %v10521_v60  ;;  %5064 = vmatprep.subr.bf16.mxu1 %v10530_v31  ;;  %v10551_v31 = vld [vmem:[%s14872_s5 + $0x1e4] ss:$8 sps:$4 sm:$0xff]  }
 0x326   : > { %5341 = vmatpush1.bf16.msra.mxu0 %v10519_v26  ;;  %5065 = vmatpush1.bf16.msra.mxu1 %v10528_v41  ;;  %v10548_v26 = vld [vmem:[%s14872_s5 + $0xe4] ss:$8 sps:$4 sm:$0xff]  }
 0x327   : > { %5342 = vmatprep.subr.bf16.mxu0 %v10527_v9  ;;  %5066 = vmatprep.subr.bf16.mxu1 %v10536_v59  ;;  %v10549_v9 = vld [vmem:[%s14872_s5 + $0x1e0] ss:$8 sps:$4 sm:$0xff]  }
 0x32a   : > { %5343 = vmatpush1.bf16.msra.mxu0 %v10525_v46  ;;  %5067 = vmatpush1.bf16.msra.mxu1 %v10534_v3 }
 0x32b   : > { %5344 = vmatprep.subr.bf16.mxu0 %v10533_v37  ;;  %5068 = vmatprep.subr.bf16.mxu1 %v10542_v8 }
 0x32e   : > { %5345 = vmatpush1.bf16.msra.mxu0 %v10531_v45  ;;  %5069 = vmatpush1.bf16.msra.mxu1 %v10540_v51 }
 0x32f   : > { %5346 = vmatprep.subr.bf16.mxu0 %v10539_v27  ;;  %5070 = vmatprep.subr.bf16.mxu1 %v10548_v26 }
 0x332   : > { %5347 = vmatpush1.bf16.msra.mxu0 %v10537_v4  ;;  %5071 = vmatpush1.bf16.msra.mxu1 %v10546_v6 }
 0x333   : > { %5348 = vmatprep.subr.bf16.mxu0 %v10545_v24 }
 0x336   : > { %5349 = vmatpush1.bf16.msra.mxu0 %v10543_v52 }
 0x337   : > { %5350 = vmatprep.subr.bf16.mxu0 %v10551_v31 }
 0x33a   : > { %5351 = vmatpush1.bf16.msra.mxu0 %v10549_v9 }
 0x347   : > { %v13132_v29 = vpop.f32.mrb[24].mxu1  ;;  %v13134_v55 = vpop.f32.mrb[36].mxu0 }
 0x348   : > { %v13136_v0 = vpop.f32.mrb[25].mxu1  ;;  %v13138_v32 = vpop.f32.mrb[37].mxu0  ;;  %v3616_v62 = vrot.slane %v13132_v29, 6  ;;  %v10554_v29 = vld [vmem:[%s14872_s5 + $0xf4] ss:$8 sps:$4 sm:$0xff]  }
 0x349   : > { %v3591_v5 = vpop.f32.mrb[26].mxu1  ;;  %v13140_v1 = vpop.f32.mrb[38].mxu0  ;;  %v3617_v7 = vrot.slane %v13136_v0, 6  ;;  %v10555_v0 = vld [vmem:[%s14872_s5 + $0x1f0] ss:$8 sps:$4 sm:$0xff]   ;;  %5072 = vmatprep.subr.bf16.mxu1 %v10554_v29 }
 0x34a   : > { %v3618_v35 = vrot.slane %v3591_v5, 6  ;;  %v3593_v2 = vpop.f32.mrb[27].mxu1  ;;  %v13146_v57 = vpop.f32.mrb[39].mxu0 }
 0x34b   : > { %v3619_v47 = vrot.slane %v3593_v2, 6 }
 0x34c   : > { %v13162_v10 = vsel %vm1115_vm0, %v3616_v62, %v3618_v35 }
 0x34d   : > { %v13168_v21 = vsel %vm1115_vm0, %v3617_v7, %v3619_v47 }
 0x34f   : > { %v3597_v43 = vpop.f32.mrb[28].mxu1  ;;  %v13182_v11 = vpop.f32.mrb[40].mxu0 }
 0x350   : > { %v3620_v19 = vrot.slane %v3597_v43, 6  ;;  %v3599_v50 = vpop.f32.mrb[29].mxu1  ;;  %v13184_v22 = vpop.f32.mrb[41].mxu0 }
 0x351   : > { %v3621_v48 = vrot.slane %v3599_v50, 6  ;;  %v3601_v25 = vpop.f32.mrb[30].mxu1  ;;  %v13186_v20 = vpop.f32.mrb[42].mxu0  ;;  %v10563_v50 = vld [vmem:[%s14872_s5 + $0x304] ss:$8 sps:$4 sm:$0xff]  }
 0x352   : > { %v13193_v38 = vsel %vm1115_vm0, %v3618_v35, %v3620_v19  ;;  %v3622_v39 = vrot.slane %v3601_v25, 6  ;;  %v3603_v61 = vpop.f32.mrb[31].mxu1  ;;  %v13195_v44 = vpop.f32.mrb[43].mxu0 }
 0x353   : > { %v13202_v15 = vsel %vm1115_vm0, %v3619_v47, %v3621_v48  ;;  %v3623_v16 = vrot.slane %v3603_v61, 6 }
 0x354   : > { %v13212_v33 = vsel %vm1115_vm0, %v3620_v19, %v3622_v39  ;;  %v10552_v19 = vld [vmem:[%s14872_s5 + $0xf0] ss:$8 sps:$4 sm:$0xff]  }
 0x355   : > { %v13216_v42 = vsel %vm1115_vm0, %v3621_v48, %v3623_v16  ;;  %5073 = vmatpush1.bf16.msra.mxu1 %v10552_v19 }
 0x357   : > { %v3607_v53 = vpop.f32.mrb[32].mxu1  ;;  %v13230_v17 = vpop.f32.mrb[44].mxu0 }
 0x358   : > { %v3624_v54 = vrot.slane %v3607_v53, 6  ;;  %v3609_v56 = vpop.f32.mrb[33].mxu1  ;;  %v13232_v12 = vpop.f32.mrb[45].mxu0 }
 0x359   : > { %v3625_v58 = vrot.slane %v3609_v56, 6  ;;  %v3611_v60 = vpop.f32.mrb[34].mxu1  ;;  %v13234_v63 = vpop.f32.mrb[46].mxu0 }
 0x35a   : > { %v13241_v5 = vsel %vm1115_vm0, %v3622_v39, %v3624_v54  ;;  %v3626_v14 = vrot.slane %v3611_v60, 6  ;;  %v3613_v35 = vpop.f32.mrb[35].mxu1  ;;  %v13243_v2 = vpop.f32.mrb[47].mxu0 }
 0x35b   : > { %v13250_v47 = vsel %vm1115_vm0, %v3623_v16, %v3625_v58  ;;  %v3627_v46 = vrot.slane %v3613_v35, 6 }
 0x35c   : > { %v13260_v37 = vsel %vm1115_vm0, %v3624_v54, %v3626_v14  ;;  %v13266_v41 = vsel %vm1115_vm0, %v3626_v14, %v3616_v62  ;;  %v10557_v62 = vld [vmem:[%s14872_s5 + $0x1f4] ss:$8 sps:$4 sm:$0xff]  }
 0x35d   : > { %v13270_v45 = vsel %vm1115_vm0, %v3625_v58, %v3627_v46  ;;  %v13276_v43 = vsel %vm1115_vm0, %v3627_v46, %v3617_v7  ;;  %5352 = vmatprep.subr.bf16.mxu0 %v10557_v62  ;;  %v10560_v7 = vld [vmem:[%s14872_s5 + $0x204] ss:$8 sps:$4 sm:$0xff]  }
 0x35e   : > { %5353 = vmatpush1.bf16.msra.mxu0 %v10555_v0  ;;  %5614 = vmatprep.subr.bf16.mxu1 %v10560_v7 }
 0x35f   : > { %5882 = vmatprep.subr.bf16.mxu0 %v10563_v50 }
 0x387   : > { %v13296_v48 = vpop.f32.mrb[36].mxu1  ;;  %v13298_v25 = vpop.f32.mrb[48].mxu0 }
 0x388   : > { %v13300_v59 = vpop.f32.mrb[37].mxu1  ;;  %v13302_v39 = vpop.f32.mrb[49].mxu0  ;;  %v3896_v16 = vrot.slane %v13296_v48, 7  ;;  %v4748_v4 = vrot.slane %v13298_v25, 2 }
 0x389   : > { %v3871_v61 = vpop.f32.mrb[38].mxu1  ;;  %v4723_v3 = vpop.f32.mrb[50].mxu0  ;;  %v3897_v52 = vrot.slane %v13300_v59, 7  ;;  %v4749_v53 = vrot.slane %v13302_v39, 2 }
 0x38a   : > { %v3898_v27 = vrot.slane %v3871_v61, 7  ;;  %v4750_v8 = vrot.slane %v4723_v3, 2  ;;  %v3873_v24 = vpop.f32.mrb[39].mxu1  ;;  %v4725_v51 = vpop.f32.mrb[51].mxu0 }
 0x38b   : > { %v3899_v54 = vrot.slane %v3873_v24, 7  ;;  %v4751_v56 = vrot.slane %v4725_v51, 2 }
 0x38c   : > { %v3916_v58 = vsel %vm1651_vm1, %v3896_v16, %v3898_v27  ;;  %v13316_v60 = vsel %vm3270_vm7, %v4748_v4, %v4750_v8 }
 0x38d   : > { %v3922_v26 = vadd.f32 %v3916_v58, %v13162_v10  ;;  %v3917_v14 = vsel %vm1651_vm1, %v3897_v52, %v3899_v54  ;;  %v13327_v35 = vsel %vm3270_vm7, %v4749_v53, %v4751_v56 }
 0x38e   : > { %v3923_v6 = vadd.f32 %v3917_v14, %v13168_v21 }
 0x38f   : > { %v3877_v46 = vpop.f32.mrb[40].mxu1  ;;  %v4729_v9 = vpop.f32.mrb[52].mxu0  ;;  %v13331_v31 = vadd.f32 %v13140_v1, %v3922_v26 }
 0x390   : > { %v3900_v29 = vrot.slane %v3877_v46, 7  ;;  %v4752_v10 = vrot.slane %v4729_v9, 2  ;;  %v3879_v62 = vpop.f32.mrb[41].mxu1  ;;  %v4731_v19 = vpop.f32.mrb[53].mxu0  ;;  %v13334_v0 = vadd.f32 %v13146_v57, %v3923_v6 }
 0x391   : > { %v3901_v7 = vrot.slane %v3879_v62, 7  ;;  %v4753_v50 = vrot.slane %v4731_v19, 2  ;;  %v3881_v61 = vpop.f32.mrb[42].mxu1  ;;  %v4733_v3 = vpop.f32.mrb[54].mxu0 }
 0x392   : > { %v3914_v24 = vsel %vm1651_vm1, %v3898_v27, %v3900_v29  ;;  %v13340_v21 = vsel %vm3270_vm7, %v4750_v8, %v4752_v10  ;;  %v3902_v1 = vrot.slane %v3881_v61, 7  ;;  %v4754_v51 = vrot.slane %v4733_v3, 2  ;;  %v3883_v58 = vpop.f32.mrb[43].mxu1  ;;  %v4735_v26 = vpop.f32.mrb[55].mxu0 }
 0x393   : > { %v3924_v14 = vadd.f32 %v3914_v24, %v13193_v38  ;;  %v3915_v57 = vsel %vm1651_vm1, %v3899_v54, %v3901_v7  ;;  %v13347_v6 = vsel %vm3270_vm7, %v4751_v56, %v4753_v50  ;;  %v3903_v46 = vrot.slane %v3883_v58, 7 }
 0x394   : > { %v3925_v27 = vadd.f32 %v3915_v57, %v13202_v15  ;;  %v3912_v8 = vsel %vm1651_vm1, %v3900_v29, %v3902_v1  ;;  %v13354_v9 = vsel %vm3270_vm7, %v4752_v10, %v4754_v51  ;;  %v4755_v62 = vrot.slane %v4735_v26, 2 }
 0x395   : > { %v3926_v38 = vadd.f32 %v3912_v8, %v13212_v33  ;;  %v3913_v54 = vsel %vm1651_vm1, %v3901_v7, %v3903_v46  ;;  %v13360_v19 = vadd.f32 %v13182_v11, %v3924_v14 }
 0x396   : > { %v3927_v56 = vadd.f32 %v3913_v54, %v13216_v42  ;;  %v13365_v15 = vsel %vm3270_vm7, %v4753_v50, %v4755_v62  ;;  %v13368_v29 = vadd.f32 %v13184_v22, %v3925_v27 }
 0x397   : > { %v3887_v10 = vpop.f32.mrb[44].mxu1  ;;  %v4739_v61 = vpop.f32.mrb[56].mxu0  ;;  %v13371_v3 = vadd.f32 %v13186_v20, %v3926_v38 }
 0x398   : > { %v3904_v33 = vrot.slane %v3887_v10, 7  ;;  %v4756_v24 = vrot.slane %v4739_v61, 2  ;;  %v3889_v7 = vpop.f32.mrb[45].mxu1  ;;  %v4741_v58 = vpop.f32.mrb[57].mxu0  ;;  %v13374_v11 = vadd.f32 %v13195_v44, %v3927_v56 }
 0x399   : > { %v3905_v42 = vrot.slane %v3889_v7, 7  ;;  %v4757_v26 = vrot.slane %v4741_v58, 2  ;;  %v3891_v14 = vpop.f32.mrb[46].mxu1  ;;  %v4743_v50 = vpop.f32.mrb[58].mxu0 }
 0x39a   : > { %v3910_v22 = vsel %vm1651_vm1, %v3902_v1, %v3904_v33  ;;  %v13380_v57 = vsel %vm3270_vm7, %v4754_v51, %v4756_v24  ;;  %v3906_v20 = vrot.slane %v3891_v14, 7  ;;  %v4758_v27 = vrot.slane %v4743_v50, 2  ;;  %v3893_v8 = vpop.f32.mrb[47].mxu1  ;;  %v4745_v38 = vpop.f32.mrb[59].mxu0 }
 0x39b   : > { %v3928_v54 = vadd.f32 %v3910_v22, %v13241_v5  ;;  %v3911_v44 = vsel %vm1651_vm1, %v3903_v46, %v3905_v42  ;;  %v13387_v56 = vsel %vm3270_vm7, %v4755_v62, %v4757_v26  ;;  %v3907_v10 = vrot.slane %v3893_v8, 7 }
 0x39c   : > { %v3929_v1 = vadd.f32 %v3911_v44, %v13250_v47  ;;  %v3908_v51 = vsel %vm1651_vm1, %v3904_v33, %v3906_v20  ;;  %v3918_v61 = vsel %vm1651_vm1, %v3906_v20, %v3896_v16  ;;  %v13398_v5 = vsel %vm3270_vm7, %v4756_v24, %v4758_v27 }
 0x39d   : > { %v3920_v46 = vadd.f32 %v3918_v61, %v13266_v41  ;;  %v3930_v62 = vadd.f32 %v3908_v51, %v13260_v37  ;;  %v13406_v47 = vsel %vm3270_vm7, %v4758_v27, %v4748_v4  ;;  %v3909_v48 = vsel %vm1651_vm1, %v3905_v42, %v3907_v10 }
 0x39e   : > { %v3919_v16 = vsel %vm1651_vm1, %v3907_v10, %v3897_v52  ;;  %v3931_v33 = vadd.f32 %v3909_v48, %v13270_v45  ;;  %v4759_v24 = vrot.slane %v4745_v38, 2  ;;  %v13416_v41 = vadd.f32 %v13230_v17, %v3928_v54 }
 0x39f   : > { %v3921_v37 = vadd.f32 %v3919_v16, %v13276_v43  ;;  %v4188_v25 = vadd.f32 %v13134_v55, %v3920_v46  ;;  %v13421_v4 = vadd.f32 %v13234_v63, %v3930_v62  ;;  %v13424_v7 = vadd.f32 %v13232_v12, %v3929_v1 }
 0x3a0   : > { %v13428_v59 = vsel %vm3270_vm7, %v4757_v26, %v4759_v24  ;;  %v13434_v17 = vsel %vm3270_vm7, %v4759_v24, %v4749_v53  ;;  %v13437_v45 = vadd.f32 %v13243_v2, %v3931_v33 }
 0x3a1   : > { %v4189_v55 = vadd.f32 %v13138_v32, %v3921_v37  ;;  %v4784_v32 = vld [vmem:[%s14871_s4] sm:$0x3] }
 0x3a2   : > { %v13459_v20 = vrot.slane %v4784_v32, %v12538_v18  ;;  %v13463_v38 = vrot.slane %v4784_v32, %v12547_v36 }
 0x3c7   : > { %v13440_v63 = vpop.f32.mrb[48].mxu1 }
 0x3c8   : > { %v13442_v43 = vpop.f32.mrb[49].mxu1  ;;  %v4456_v52 = vrot.slane %v13440_v63, 1 }
 0x3c9   : > { %v4431_v12 = vpop.f32.mrb[50].mxu1  ;;  %v4457_v39 = vrot.slane %v13442_v43, 1 }
 0x3ca   : > { %v4458_v58 = vrot.slane %v4431_v12, 1  ;;  %v4433_v42 = vpop.f32.mrb[51].mxu1 }
 0x3cb   : > { %v4459_v26 = vrot.slane %v4433_v42, 1 }
 0x3cc   : > { %v4476_v2 = vsel %vm2722_vm2, %v4456_v52, %v4458_v58 }
 0x3cd   : > { %v4480_v53 = vadd.f32 %v4476_v2, %v4188_v25  ;;  %v4477_v14 = vsel %vm2722_vm2, %v4457_v39, %v4459_v26 }
 0x3ce   : > { %v4481_v50 = vadd.f32 %v4477_v14, %v4189_v55 }
 0x3cf   : > { %v4772_v22 = vadd.f32 %v13316_v60, %v4480_v53  ;;  %v4437_v27 = vpop.f32.mrb[52].mxu1 }
 0x3d0   : > { %v4773_v8 = vadd.f32 %v13327_v35, %v4481_v50  ;;  %v4460_v54 = vrot.slane %v4437_v27, 1  ;;  %v4439_v44 = vpop.f32.mrb[53].mxu1 }
 0x3d1   : > { %v4461_v10 = vrot.slane %v4439_v44, 1  ;;  %v4441_v1 = vpop.f32.mrb[54].mxu1  ;;  %v4796_v60 = vadd.f32 %v13459_v20, %v4772_v22 }
 0x3d2   : > { %v4474_v51 = vsel %vm2722_vm2, %v4458_v58, %v4460_v54  ;;  %v4462_v61 = vrot.slane %v4441_v1, 1  ;;  %v4443_v46 = vpop.f32.mrb[55].mxu1  ;;  %v4797_v16 = vadd.f32 %v13463_v38, %v4773_v8 }
 0x3d3   : > { %v4482_v62 = vadd.f32 %v4474_v51, %v13331_v31  ;;  %v4475_v48 = vsel %vm2722_vm2, %v4459_v26, %v4461_v10  ;;  %v4463_v35 = vrot.slane %v4443_v46, 1  ;;  %v4808_v58 = vmax.f32 %v4796_v60, 0.0 }
 0x3d4   : > { %v4483_v33 = vadd.f32 %v4475_v48, %v13334_v0  ;;  %v4472_v24 = vsel %vm2722_vm2, %v4460_v54, %v4462_v61  ;;  %v4809_v2 = vmax.f32 %v4797_v16, 0.0 }
 0x3d5   : > { %v4774_v37 = vadd.f32 %v13340_v21, %v4482_v62  ;;  %v4484_v25 = vadd.f32 %v4472_v24, %v13360_v19  ;;  %v4473_v55 = vsel %vm2722_vm2, %v4461_v10, %v4463_v35  ;;  %v4820_v44 = vmul.f32 %v12624_v40, %v4808_v58 }
 0x3d6   : > { %v4775_v31 = vadd.f32 %v13347_v6, %v4483_v33  ;;  %v4485_v12 = vadd.f32 %v4473_v55, %v13368_v29  ;;  %v4821_v51 = vmul.f32 %v12624_v40, %v4809_v2 }
 0x3d7   : > { %v4798_v42 = vadd.f32 %v13459_v20, %v4774_v37  ;;  %v4776_v26 = vadd.f32 %v13354_v9, %v4484_v25  ;;  %v4447_v0 = vpop.f32.mrb[56].mxu1 }
 0x3d8   : > { %v4799_v32 = vadd.f32 %v13463_v38, %v4775_v31  ;;  %v4777_v21 = vadd.f32 %v13365_v15, %v4485_v12  ;;  %v4464_v53 = vrot.slane %v4447_v0, 1  ;;  %v4449_v19 = vpop.f32.mrb[57].mxu1  ;;  %v10566_v31 = vld [vmem:[%s14872_s5 + $0x214] ss:$8 sps:$4 sm:$0xff]  }
 0x3d9   : > { %v4810_v14 = vmax.f32 %v4798_v42, 0.0  ;;  %v4800_v50 = vadd.f32 %v13459_v20, %v4776_v26  ;;  %v4465_v22 = vrot.slane %v4449_v19, 1  ;;  %v4451_v6 = vpop.f32.mrb[58].mxu1  ;;  %v10569_v12 = vld [vmem:[%s14872_s5 + $0x314] ss:$8 sps:$4 sm:$0xff]  }
 0x3da   : > { %v4811_v27 = vmax.f32 %v4799_v32, 0.0  ;;  %v4801_v29 = vadd.f32 %v13463_v38, %v4777_v21  ;;  %v4470_v8 = vsel %vm2722_vm2, %v4462_v61, %v4464_v53  ;;  %v4466_v9 = vrot.slane %v4451_v6, 1  ;;  %v4453_v54 = vpop.f32.mrb[59].mxu1  ;;  %v10564_v21 = vld [vmem:[%s14872_s5 + $0x210] ss:$8 sps:$4 sm:$0xff]  }
 0x3db   : > { %v4822_v10 = vmul.f32 %v12628_v23, %v4810_v14  ;;  %v4486_v15 = vadd.f32 %v4470_v8, %v13371_v3  ;;  %v4471_v1 = vsel %vm2722_vm2, %v4463_v35, %v4465_v22  ;;  %v4812_v62 = vmax.f32 %v4800_v50, 0.0  ;;  %v10575_v6 = vld [vmem:[%s14872_s5 + $0x324] ss:$8 sps:$4 sm:$0xff]  }
 0x3dc   : > { %v4823_v46 = vmul.f32 %v12628_v23, %v4811_v27  ;;  %v4487_v60 = vadd.f32 %v4471_v1, %v13374_v11  ;;  %v4468_v61 = vsel %vm2722_vm2, %v4464_v53, %v4466_v9  ;;  %v4478_v3 = vsel %vm2722_vm2, %v4466_v9, %v4456_v52 }
 0x3dd   : > { %v4778_v48 = vadd.f32 %v13380_v57, %v4486_v15  ;;  %v4488_v16 = vadd.f32 %v4468_v61, %v13416_v41  ;;  %v4813_v35 = vmax.f32 %v4801_v29, 0.0  ;;  %v4490_v24 = vadd.f32 %v4478_v3, %v13421_v4  ;;  %v10558_v57 = vld [vmem:[%s14872_s5 + $0x200] ss:$8 sps:$4 sm:$0xff]   ;;  %v10581_v15 = vld [vmem:[%s14872_s5 + $0x334] ss:$8 sps:$4 sm:$0xff]  }
 0x3de   : > { %v4779_v33 = vadd.f32 %v13387_v56, %v4487_v60  ;;  %v4467_v37 = vrot.slane %v4453_v54, 1  ;;  %v13509_v55 = vpack.c.bf16 %v4823_v46, %v4821_v51  ;;  %v10561_v41 = vld [vmem:[%s14872_s5 + $0x300] ss:$8 sps:$4 sm:$0xff]   ;;  %v13517_v63 = vpack.c.bf16 %v4822_v10, %v4820_v44  ;;  %v10578_v10 = vld [vmem:[%s14872_s5 + $0x234] ss:$8 sps:$4 sm:$0xff]  }
 0x3df   : > { %v4802_v11 = vadd.f32 %v13459_v20, %v4778_v48  ;;  %v4780_v25 = vadd.f32 %v13398_v5, %v4488_v16  ;;  %v4782_v4 = vadd.f32 %v13406_v47, %v4490_v24  ;;  %v4824_v43 = vmul.f32 %v12636_v30, %v4812_v62  ;;  %v10573_v44 = vld [vmem:[%s14872_s5 + $0x320] ss:$8 sps:$4 sm:$0xff]   ;;  %v10576_v61 = vld [vmem:[%s14872_s5 + $0x230] ss:$8 sps:$4 sm:$0xff]   ;;  %v10584_v48 = vld [vmem:[%s14872_s5 + $0x244] ss:$8 sps:$4 sm:$0xff]  }
 0x3e0   : > { %v4803_v56 = vadd.f32 %v13463_v38, %v4779_v33  ;;  %v4469_v52 = vsel %vm2722_vm2, %v4465_v22, %v4467_v37  ;;  %v4479_v5 = vsel %vm2722_vm2, %v4467_v37, %v4457_v39  ;;  %5074 = vmatprep.mubr.bf16.mxu1 %v13509_v55  ;;  %5354 = vmatprep.mubr.bf16.mxu0 %v13509_v55  ;;  %v10572_v22 = vld [vmem:[%s14872_s5 + $0x224] ss:$8 sps:$4 sm:$0xff]   ;;  %v10579_v62 = vld [vmem:[%s14872_s5 + $0x330] ss:$8 sps:$4 sm:$0xff]   ;;  %v10582_v16 = vld [vmem:[%s14872_s5 + $0x240] ss:$8 sps:$4 sm:$0xff]  }
 0x3e1   : > { %v4814_v58 = vmax.f32 %v4802_v11, 0.0  ;;  %v4804_v42 = vadd.f32 %v13459_v20, %v4780_v25  ;;  %v4489_v47 = vadd.f32 %v4469_v52, %v13424_v7  ;;  %v4491_v26 = vadd.f32 %v4479_v5, %v13437_v45  ;;  %5075 = vmatmul.mubr.bf16.vlgmr.msra.gmra.mrb[60].mxu1 %v13517_v63  ;;  %5355 = vmatmul.mubr.bf16.vlgmr.msra.gmra.mrb[60].mxu0 %v13517_v63  ;;  %v10587_v3 = vld [vmem:[%s14872_s5 + $0x344] ss:$8 sps:$4 sm:$0xff]   ;;  %v10590_v33 = vld [vmem:[%s14872_s5 + $0x254] ss:$8 sps:$4 sm:$0xff]  }
 0x3e2   : > { %v4815_v39 = vmax.f32 %v4803_v56, 0.0  ;;  %v4806_v0 = vadd.f32 %v13459_v20, %v4782_v4  ;;  %5615 = vmatpush1.bf16.msra.mxu1 %v10558_v57  ;;  %5883 = vmatpush1.bf16.msra.mxu0 %v10561_v41  ;;  %v10567_v20 = vld [vmem:[%s14872_s5 + $0x310] ss:$8 sps:$4 sm:$0xff]   ;;  %v4825_v53 = vmul.f32 %v12636_v30, %v4813_v35  ;;  %v10585_v35 = vld [vmem:[%s14872_s5 + $0x340] ss:$8 sps:$4 sm:$0xff]  }
 0x3e3   : > { %v4826_v2 = vmul.f32 %v12639_v34, %v4814_v58  ;;  %v4816_v32 = vmax.f32 %v4804_v42, 0.0  ;;  %v4781_v7 = vadd.f32 %v13428_v59, %v4489_v47  ;;  %v4783_v45 = vadd.f32 %v13434_v17, %v4491_v26  ;;  %5616 = vmatprep.subr.bf16.mxu1 %v10566_v31  ;;  %5884 = vmatprep.subr.bf16.mxu0 %v10569_v12  ;;  %v10593_v24 = vld [vmem:[%s14872_s5 + $0x354] ss:$8 sps:$4 sm:$0xff]   ;;  %v10588_v37 = vld [vmem:[%s14872_s5 + $0x250] ss:$8 sps:$4 sm:$0xff]  }
 0x3e4   : > { %v4827_v19 = vmul.f32 %v12639_v34, %v4815_v39  ;;  %v4818_v14 = vmax.f32 %v4806_v0, 0.0  ;;  %v10591_v11 = vld [vmem:[%s14872_s5 + $0x350] ss:$8 sps:$4 sm:$0xff]   ;;  %v10596_v25 = vld [vmem:[%s14872_s5 + $0x264] ss:$8 sps:$4 sm:$0xff]  }
 0x3e5   : > { %v4828_v59 = vmul.f32 %v12644_v49, %v4816_v32  ;;  %v4805_v17 = vadd.f32 %v13463_v38, %v4781_v7  ;;  %v4807_v50 = vadd.f32 %v13463_v38, %v4783_v45  ;;  %v13562_v27 = vpack.c.bf16 %v4826_v2, %v4824_v43  ;;  %v10570_v38 = vld [vmem:[%s14872_s5 + $0x220] ss:$8 sps:$4 sm:$0xff]   ;;  %v10599_v57 = vld [vmem:[%s14872_s5 + $0x364] ss:$8 sps:$4 sm:$0xff]   ;;  %v10602_v4 = vld [vmem:[%s14872_s5 + $0x274] ss:$8 sps:$4 sm:$0xff]  }
 0x3e6   : > { %v4830_v29 = vmul.f32 %v12648_v28, %v4818_v14  ;;  %v13565_v8 = vpack.c.bf16 %v4827_v19, %v4825_v53  ;;  %5617 = vmatpush1.bf16.msra.mxu1 %v10564_v21  ;;  %5885 = vmatpush1.bf16.msra.mxu0 %v10567_v20  ;;  %v10594_v41 = vld [vmem:[%s14872_s5 + $0x260] ss:$8 sps:$4 sm:$0xff]   ;;  %v10605_v52 = vld [vmem:[%s14872_s5 + $0x374] ss:$8 sps:$4 sm:$0xff]   ;;  %v10600_v5 = vld [vmem:[%s14872_s5 + $0x270] ss:$8 sps:$4 sm:$0xff]  }
 0x3e7   : > { %v4817_v9 = vmax.f32 %v4805_v17, 0.0  ;;  %v4819_v54 = vmax.f32 %v4807_v50, 0.0  ;;  %5618 = vmatprep.subr.bf16.mxu1 %v10572_v22  ;;  %5886 = vmatprep.subr.bf16.mxu0 %v10575_v6  ;;  %v10597_v56 = vld [vmem:[%s14872_s5 + $0x360] ss:$8 sps:$4 sm:$0xff]   ;;  %v10603_v31 = vld [vmem:[%s14872_s5 + $0x370] ss:$8 sps:$4 sm:$0xff]  }
 0x3e8   : > { %5084 = vmatprep.mubr.bf16.mxu1 %v13565_v8  ;;  %5364 = vmatprep.mubr.bf16.mxu0 %v13565_v8  ;;  %v13581_v1 = vpack.c.bf16 %v4830_v29, %v4828_v59  ;;  %v10608_v12 = vld [vmem:[%s14872_s5 + $0x284] ss:$8 sps:$4 sm:$0xff]   ;;  %v10606_v42 = vld [vmem:[%s14872_s5 + $0x280] ss:$8 sps:$4 sm:$0xff]   ;;  %v10614_v26 = vld [vmem:[%s14872_s5 + $0x294] ss:$8 sps:$4 sm:$0xff]  }
 0x3e9   : > { %v4829_v51 = vmul.f32 %v12644_v49, %v4817_v9  ;;  %v4831_v46 = vmul.f32 %v12648_v28, %v4819_v54  ;;  %5085 = vmatmul.mubr.bf16.gmra.mrb[64].mxu1 %v13562_v27  ;;  %5365 = vmatmul.mubr.bf16.gmra.mrb[64].mxu0 %v13562_v27  ;;  %v10611_v58 = vld [vmem:[%s14872_s5 + $0x384] ss:$8 sps:$4 sm:$0xff]   ;;  %v10609_v47 = vld [vmem:[%s14872_s5 + $0x380] ss:$8 sps:$4 sm:$0xff]   ;;  %v10617_v43 = vld [vmem:[%s14872_s5 + $0x394] ss:$8 sps:$4 sm:$0xff]  }
 0x3ea   : > { %5619 = vmatpush1.bf16.msra.mxu1 %v10570_v38  ;;  %5887 = vmatpush1.bf16.msra.mxu0 %v10573_v44  ;;  %v10612_v39 = vld [vmem:[%s14872_s5 + $0x290] ss:$8 sps:$4 sm:$0xff]   ;;  %v10620_v2 = vld [vmem:[%s14872_s5 + $0x2a4] ss:$8 sps:$4 sm:$0xff]   ;;  %v10618_v7 = vld [vmem:[%s14872_s5 + $0x2a0] ss:$8 sps:$4 sm:$0xff]  }
 0x3eb   : > { %v13587_v60 = vpack.c.bf16 %v4831_v46, %v4829_v51  ;;  %5620 = vmatprep.subr.bf16.mxu1 %v10578_v10  ;;  %5888 = vmatprep.subr.bf16.mxu0 %v10581_v15  ;;  %v10615_v0 = vld [vmem:[%s14872_s5 + $0x390] ss:$8 sps:$4 sm:$0xff]   ;;  %v10623_v32 = vld [vmem:[%s14872_s5 + $0x3a4] ss:$8 sps:$4 sm:$0xff]   ;;  %v10621_v45 = vld [vmem:[%s14872_s5 + $0x3a0] ss:$8 sps:$4 sm:$0xff]  }
 0x3ec   : > { %v10626_v21 = vld [vmem:[%s14872_s5 + $0x2b4] ss:$8 sps:$4 sm:$0xff]   ;;  %v10624_v53 = vld [vmem:[%s14872_s5 + $0x2b0] ss:$8 sps:$4 sm:$0xff]   ;;  %v10632_v14 = vld [vmem:[%s14872_s5 + $0x2c4] ss:$8 sps:$4 sm:$0xff]  }
 0x3ed   : > { %5094 = vmatprep.mubr.bf16.mxu1 %v13587_v60  ;;  %5374 = vmatprep.mubr.bf16.mxu0 %v13587_v60  ;;  %v10629_v20 = vld [vmem:[%s14872_s5 + $0x3b4] ss:$8 sps:$4 sm:$0xff]   ;;  %v10627_v19 = vld [vmem:[%s14872_s5 + $0x3b0] ss:$8 sps:$4 sm:$0xff]   ;;  %v10635_v59 = vld [vmem:[%s14872_s5 + $0x3c4] ss:$8 sps:$4 sm:$0xff]  }
 0x3ee   : > { %5621 = vmatpush1.bf16.msra.mxu1 %v10576_v61  ;;  %5889 = vmatpush1.bf16.msra.mxu0 %v10579_v62  ;;  %v10630_v17 = vld [vmem:[%s14872_s5 + $0x2c0] ss:$8 sps:$4 sm:$0xff]   ;;  %v10638_v22 = vld [vmem:[%s14872_s5 + $0x2d4] ss:$8 sps:$4 sm:$0xff]   ;;  %v10636_v29 = vld [vmem:[%s14872_s5 + $0x2d0] ss:$8 sps:$4 sm:$0xff]  }
 0x3ef   : > { %5622 = vmatprep.subr.bf16.mxu1 %v10584_v48  ;;  %5890 = vmatprep.subr.bf16.mxu0 %v10587_v3  ;;  %v10633_v50 = vld [vmem:[%s14872_s5 + $0x3c0] ss:$8 sps:$4 sm:$0xff]   ;;  %v10641_v6 = vld [vmem:[%s14872_s5 + $0x3d4] ss:$8 sps:$4 sm:$0xff]   ;;  %v10639_v9 = vld [vmem:[%s14872_s5 + $0x3d0] ss:$8 sps:$4 sm:$0xff]  }
 0x3f0   : > { %v10644_v54 = vld [vmem:[%s14872_s5 + $0x2e4] ss:$8 sps:$4 sm:$0xff]   ;;  %v10642_v44 = vld [vmem:[%s14872_s5 + $0x2e0] ss:$8 sps:$4 sm:$0xff]   ;;  %v10650_v15 = vld [vmem:[%s14872_s5 + $0x2f4] ss:$8 sps:$4 sm:$0xff]  }
 0x3f1   : > { %5095 = vmatmul.mubr.bf16.gmra.mrb[68].mxu1 %v13581_v1  ;;  %5375 = vmatmul.mubr.bf16.gmra.mrb[68].mxu0 %v13581_v1  ;;  %v10647_v38 = vld [vmem:[%s14872_s5 + $0x3e4] ss:$8 sps:$4 sm:$0xff]   ;;  %v10645_v10 = vld [vmem:[%s14872_s5 + $0x3e0] ss:$8 sps:$4 sm:$0xff]   ;;  %v10653_v51 = vld [vmem:[%s14872_s5 + $0x3f4] ss:$8 sps:$4 sm:$0xff]  }
 0x3f2   : > { %5623 = vmatpush1.bf16.msra.mxu1 %v10582_v16  ;;  %5891 = vmatpush1.bf16.msra.mxu0 %v10585_v35  ;;  %v10648_v46 = vld [vmem:[%s14872_s5 + $0x2f0] ss:$8 sps:$4 sm:$0xff]   ;;  %v10656_v62 = vld [vmem:[%s14872_s5 + $0x404] ss:$8 sps:$4 sm:$0xff]   ;;  %v10654_v48 = vld [vmem:[%s14872_s5 + $0x400] ss:$8 sps:$4 sm:$0xff]  }
 0x3f3   : > { %5646 = vmatprep.mubr.bf16.mxu1 %v13509_v55  ;;  %5914 = vmatprep.mubr.bf16.mxu0 %v13509_v55  ;;  %v10651_v61 = vld [vmem:[%s14872_s5 + $0x3f0] ss:$8 sps:$4 sm:$0xff]   ;;  %v10659_v3 = vld [vmem:[%s14872_s5 + $0x414] ss:$8 sps:$4 sm:$0xff]   ;;  %v10662_v35 = vld [vmem:[%s14872_s5 + $0x424] ss:$8 sps:$4 sm:$0xff]  }
 0x3f4   : > { %5624 = vmatprep.subr.bf16.mxu1 %v10590_v33  ;;  %5892 = vmatprep.subr.bf16.mxu0 %v10593_v24  ;;  %v10657_v16 = vld [vmem:[%s14872_s5 + $0x410] ss:$8 sps:$4 sm:$0xff]   ;;  %v10660_v33 = vld [vmem:[%s14872_s5 + $0x420] ss:$8 sps:$4 sm:$0xff]   ;;  %v10665_v24 = vld [vmem:[%s14872_s5 + $0x434] ss:$8 sps:$4 sm:$0xff]  }
 0x3f6   : > { %5625 = vmatpush1.bf16.msra.mxu1 %v10588_v37  ;;  %5893 = vmatpush1.bf16.msra.mxu0 %v10591_v11  ;;  %v10663_v37 = vld [vmem:[%s14872_s5 + $0x430] ss:$8 sps:$4 sm:$0xff]   ;;  %v10668_v11 = vld [vmem:[%s14872_s5 + $0x444] ss:$8 sps:$4 sm:$0xff]  }
 0x3f7   : > { %5626 = vmatprep.subr.bf16.mxu1 %v10596_v25  ;;  %5894 = vmatprep.subr.bf16.mxu0 %v10599_v57  ;;  %v10666_v25 = vld [vmem:[%s14872_s5 + $0x440] ss:$8 sps:$4 sm:$0xff]   ;;  %v10671_v57 = vld [vmem:[%s14872_s5 + $0x454] ss:$8 sps:$4 sm:$0xff]  }
 0x3fa   : > { %5627 = vmatpush1.bf16.msra.mxu1 %v10594_v41  ;;  %5895 = vmatpush1.bf16.msra.mxu0 %v10597_v56  ;;  %v10669_v41 = vld [vmem:[%s14872_s5 + $0x450] ss:$8 sps:$4 sm:$0xff]   ;;  %v10674_v56 = vld [vmem:[%s14872_s5 + $0x464] ss:$8 sps:$4 sm:$0xff]  }
 0x3fb   : > { %5628 = vmatprep.subr.bf16.mxu1 %v10602_v4  ;;  %5896 = vmatprep.subr.bf16.mxu0 %v10605_v52  ;;  %v10672_v4 = vld [vmem:[%s14872_s5 + $0x460] ss:$8 sps:$4 sm:$0xff]   ;;  %v10675_v52 = vld [vmem:[%s14872_s5 + $0x470] ss:$8 sps:$4 sm:$0xff]  }
 0x3fe   : > { %5629 = vmatpush1.bf16.msra.mxu1 %v10600_v5  ;;  %5897 = vmatpush1.bf16.msra.mxu0 %v10603_v31  ;;  %v10680_v5 = vld [vmem:[%s14872_s5 + $0x484] ss:$8 sps:$4 sm:$0xff]   ;;  %v10678_v31 = vld [vmem:[%s14872_s5 + $0x480] ss:$8 sps:$4 sm:$0xff]  }
 0x3ff   : > { %5630 = vmatprep.subr.bf16.mxu1 %v10608_v12  ;;  %5898 = vmatprep.subr.bf16.mxu0 %v10611_v58  ;;  %v10683_v12 = vld [vmem:[%s14872_s5 + $0x494] ss:$8 sps:$4 sm:$0xff]   ;;  %v10681_v58 = vld [vmem:[%s14872_s5 + $0x490] ss:$8 sps:$4 sm:$0xff]  }
 0x402   : > { %5631 = vmatpush1.bf16.msra.mxu1 %v10606_v42  ;;  %5899 = vmatpush1.bf16.msra.mxu0 %v10609_v47  ;;  %v10686_v42 = vld [vmem:[%s14872_s5 + $0x4a4] ss:$8 sps:$4 sm:$0xff]   ;;  %v10684_v47 = vld [vmem:[%s14872_s5 + $0x4a0] ss:$8 sps:$4 sm:$0xff]  }
 0x403   : > { %5632 = vmatprep.subr.bf16.mxu1 %v10614_v26  ;;  %5900 = vmatprep.subr.bf16.mxu0 %v10617_v43  ;;  %v10689_v26 = vld [vmem:[%s14872_s5 + $0x4b4] ss:$8 sps:$4 sm:$0xff]   ;;  %v10687_v43 = vld [vmem:[%s14872_s5 + $0x4b0] ss:$8 sps:$4 sm:$0xff]  }
 0x406   : > { %5633 = vmatpush1.bf16.msra.mxu1 %v10612_v39  ;;  %5901 = vmatpush1.bf16.msra.mxu0 %v10615_v0  ;;  %v10692_v39 = vld [vmem:[%s14872_s5 + $0x4c4] ss:$8 sps:$4 sm:$0xff]   ;;  %v10690_v0 = vld [vmem:[%s14872_s5 + $0x4c0] ss:$8 sps:$4 sm:$0xff]  }
 0x407   : > { %5634 = vmatprep.subr.bf16.mxu1 %v10620_v2  ;;  %5902 = vmatprep.subr.bf16.mxu0 %v10623_v32  ;;  %v10695_v2 = vld [vmem:[%s14872_s5 + $0x4d4] ss:$8 sps:$4 sm:$0xff]   ;;  %v10693_v32 = vld [vmem:[%s14872_s5 + $0x4d0] ss:$8 sps:$4 sm:$0xff]  }
 0x40a   : > { %5635 = vmatpush1.bf16.msra.mxu1 %v10618_v7  ;;  %5903 = vmatpush1.bf16.msra.mxu0 %v10621_v45  ;;  %v10698_v7 = vld [vmem:[%s14872_s5 + $0x4e4] ss:$8 sps:$4 sm:$0xff]   ;;  %v10696_v45 = vld [vmem:[%s14872_s5 + $0x4e0] ss:$8 sps:$4 sm:$0xff]  }
 0x40b   : > { %5636 = vmatprep.subr.bf16.mxu1 %v10626_v21  ;;  %5904 = vmatprep.subr.bf16.mxu0 %v10629_v20  ;;  %v10701_v21 = vld [vmem:[%s14872_s5 + $0x4f4] ss:$8 sps:$4 sm:$0xff]   ;;  %v10699_v20 = vld [vmem:[%s14872_s5 + $0x4f0] ss:$8 sps:$4 sm:$0xff]  }
 0x40e   : > { %5637 = vmatpush1.bf16.msra.mxu1 %v10624_v53  ;;  %5905 = vmatpush1.bf16.msra.mxu0 %v10627_v19  ;;  %v10704_v53 = vld [vmem:[%s14874_s7 + $0x4] ss:$8 sps:$4 sm:$0xff]  }
 0x40f   : > { %5638 = vmatprep.subr.bf16.mxu1 %v10632_v14  ;;  %5906 = vmatprep.subr.bf16.mxu0 %v10635_v59  ;;  %v10707_v19 = vld [vmem:[%s14874_s7 + $0x104] ss:$8 sps:$4 sm:$0xff]   ;;  %v10711_v14 = vld [vmem:[%s14874_s7 + $0x110] ss:$8 sps:$4 sm:$0xff]  }
 0x410   : > { %v10716_v59 = vld [vmem:[%s14874_s7 + $0x24] ss:$8 sps:$4 sm:$0xff]  }
 0x412   : > { %5639 = vmatpush1.bf16.msra.mxu1 %v10630_v17  ;;  %5907 = vmatpush1.bf16.msra.mxu0 %v10633_v50  ;;  %v10719_v17 = vld [vmem:[%s14874_s7 + $0x124] ss:$8 sps:$4 sm:$0xff]   ;;  %v10714_v50 = vld [vmem:[%s14874_s7 + $0x20] ss:$8 sps:$4 sm:$0xff]  }
 0x413   : > { %5640 = vmatprep.subr.bf16.mxu1 %v10638_v22  ;;  %5908 = vmatprep.subr.bf16.mxu0 %v10641_v6  ;;  %v10717_v22 = vld [vmem:[%s14874_s7 + $0x120] ss:$8 sps:$4 sm:$0xff]   ;;  %v10722_v6 = vld [vmem:[%s14874_s7 + $0x34] ss:$8 sps:$4 sm:$0xff]  }
 0x416   : > { %5641 = vmatpush1.bf16.msra.mxu1 %v10636_v29  ;;  %5909 = vmatpush1.bf16.msra.mxu0 %v10639_v9  ;;  %v10725_v29 = vld [vmem:[%s14874_s7 + $0x134] ss:$8 sps:$4 sm:$0xff]   ;;  %v10720_v9 = vld [vmem:[%s14874_s7 + $0x30] ss:$8 sps:$4 sm:$0xff]  }
 0x417   : > { %5642 = vmatprep.subr.bf16.mxu1 %v10644_v54  ;;  %5910 = vmatprep.subr.bf16.mxu0 %v10647_v38  ;;  %v10723_v54 = vld [vmem:[%s14874_s7 + $0x130] ss:$8 sps:$4 sm:$0xff]   ;;  %v10728_v38 = vld [vmem:[%s14874_s7 + $0x44] ss:$8 sps:$4 sm:$0xff]  }
 0x41a   : > { %5643 = vmatpush1.bf16.msra.mxu1 %v10642_v44  ;;  %5911 = vmatpush1.bf16.msra.mxu0 %v10645_v10  ;;  %v10731_v44 = vld [vmem:[%s14874_s7 + $0x144] ss:$8 sps:$4 sm:$0xff]   ;;  %v10726_v10 = vld [vmem:[%s14874_s7 + $0x40] ss:$8 sps:$4 sm:$0xff]  }
 0x41b   : > { %5644 = vmatprep.subr.bf16.mxu1 %v10650_v15  ;;  %5912 = vmatprep.subr.bf16.mxu0 %v10653_v51  ;;  %v10729_v15 = vld [vmem:[%s14874_s7 + $0x140] ss:$8 sps:$4 sm:$0xff]   ;;  %v10734_v51 = vld [vmem:[%s14874_s7 + $0x54] ss:$8 sps:$4 sm:$0xff]  }
 0x41e   : > { %5645 = vmatpush1.bf16.msra.mxu1 %v10648_v46  ;;  %5913 = vmatpush1.bf16.msra.mxu0 %v10651_v61  ;;  %v10737_v46 = vld [vmem:[%s14874_s7 + $0x154] ss:$8 sps:$4 sm:$0xff]   ;;  %v10732_v61 = vld [vmem:[%s14874_s7 + $0x50] ss:$8 sps:$4 sm:$0xff]  }
 0x41f   : > { %6174 = vmatprep.subr.bf16.mxu1 %v10656_v62  ;;  %6531 = vmatprep.subr.bf16.mxu0 %v10704_v53  ;;  %v10735_v62 = vld [vmem:[%s14874_s7 + $0x150] ss:$8 sps:$4 sm:$0xff]  }
 0x421   : > { %5647 = vmatmul.mubr.bf16.vlgmr.msra.gmra.mrb[72].mxu1 %v13517_v63  ;;  %5915 = vmatmul.mubr.bf16.vlgmr.msra.gmra.mrb[72].mxu0 %v13517_v63 }
 0x422   : > { %5656 = vmatprep.mubr.bf16.mxu1 %v13565_v8  ;;  %5924 = vmatprep.mubr.bf16.mxu0 %v13565_v8 }
 0x423   : > { %6175 = vmatpush1.bf16.msra.mxu1 %v10654_v48  ;;  %v10740_v48 = vld [vmem:[%s14874_s7 + $0x64] ss:$8 sps:$4 sm:$0xff]  }
 0x424   : > { %6176 = vmatprep.subr.bf16.mxu1 %v10659_v3  ;;  %v10743_v3 = vld [vmem:[%s14874_s7 + $0x164] ss:$8 sps:$4 sm:$0xff]  }
 0x427   : > { %6177 = vmatpush1.bf16.msra.mxu1 %v10657_v16  ;;  %v10738_v16 = vld [vmem:[%s14874_s7 + $0x60] ss:$8 sps:$4 sm:$0xff]  }
 0x428   : > { %6178 = vmatprep.subr.bf16.mxu1 %v10662_v35  ;;  %v10741_v35 = vld [vmem:[%s14874_s7 + $0x160] ss:$8 sps:$4 sm:$0xff]  }
 0x429   : > { %5657 = vmatmul.mubr.bf16.gmra.mrb[76].mxu1 %v13562_v27  ;;  %5925 = vmatmul.mubr.bf16.gmra.mrb[76].mxu0 %v13562_v27 }
 0x42a   : > { %5666 = vmatprep.mubr.bf16.mxu1 %v13587_v60  ;;  %5934 = vmatprep.mubr.bf16.mxu0 %v13587_v60 }
 0x42b   : > { %6179 = vmatpush1.bf16.msra.mxu1 %v10660_v33  ;;  %v10746_v33 = vld [vmem:[%s14874_s7 + $0x74] ss:$8 sps:$4 sm:$0xff]  }
 0x42c   : > { %6180 = vmatprep.subr.bf16.mxu1 %v10665_v24  ;;  %v10749_v24 = vld [vmem:[%s14874_s7 + $0x174] ss:$8 sps:$4 sm:$0xff]  }
 0x42f   : > { %6181 = vmatpush1.bf16.msra.mxu1 %v10663_v37  ;;  %v10744_v37 = vld [vmem:[%s14874_s7 + $0x70] ss:$8 sps:$4 sm:$0xff]  }
 0x430   : > { %6182 = vmatprep.subr.bf16.mxu1 %v10668_v11  ;;  %v10747_v11 = vld [vmem:[%s14874_s7 + $0x170] ss:$8 sps:$4 sm:$0xff]  }
 0x431   : > { %5667 = vmatmul.mubr.bf16.gmra.mrb[80].mxu1 %v13581_v1  ;;  %5935 = vmatmul.mubr.bf16.gmra.mrb[80].mxu0 %v13581_v1 }
 0x432   : > { %6206 = vmatprep.mubr.bf16.mxu1 %v13509_v55  ;;  %v10677_v55 = vld [vmem:[%s14872_s5 + $0x474] ss:$8 sps:$4 sm:$0xff]  }
 0x433   : > { %6183 = vmatpush1.bf16.msra.mxu1 %v10666_v25  ;;  %v10752_v25 = vld [vmem:[%s14874_s7 + $0x84] ss:$8 sps:$4 sm:$0xff]  }
 0x434   : > { %6184 = vmatprep.subr.bf16.mxu1 %v10671_v57  ;;  %v10755_v57 = vld [vmem:[%s14874_s7 + $0x184] ss:$8 sps:$4 sm:$0xff]  }
 0x437   : > { %6185 = vmatpush1.bf16.msra.mxu1 %v10669_v41  ;;  %v10750_v41 = vld [vmem:[%s14874_s7 + $0x80] ss:$8 sps:$4 sm:$0xff]  }
 0x438   : > { %6186 = vmatprep.subr.bf16.mxu1 %v10674_v56  ;;  %v10753_v56 = vld [vmem:[%s14874_s7 + $0x180] ss:$8 sps:$4 sm:$0xff]  }
 0x43b   : > { %6187 = vmatpush1.bf16.msra.mxu1 %v10672_v4  ;;  %v10758_v4 = vld [vmem:[%s14874_s7 + $0x94] ss:$8 sps:$4 sm:$0xff]  }
 0x43c   : > { %6188 = vmatprep.subr.bf16.mxu1 %v10677_v55  ;;  %v10761_v55 = vld [vmem:[%s14874_s7 + $0x194] ss:$8 sps:$4 sm:$0xff]  }
 0x43f   : > { %6189 = vmatpush1.bf16.msra.mxu1 %v10675_v52  ;;  %v10756_v52 = vld [vmem:[%s14874_s7 + $0x90] ss:$8 sps:$4 sm:$0xff]  }
 0x440   : > { %6190 = vmatprep.subr.bf16.mxu1 %v10680_v5  ;;  %v10759_v5 = vld [vmem:[%s14874_s7 + $0x190] ss:$8 sps:$4 sm:$0xff]  }
 0x443   : > { %6191 = vmatpush1.bf16.msra.mxu1 %v10678_v31  ;;  %v10764_v31 = vld [vmem:[%s14874_s7 + $0xa4] ss:$8 sps:$4 sm:$0xff]  }
 0x444   : > { %6192 = vmatprep.subr.bf16.mxu1 %v10683_v12  ;;  %v10767_v12 = vld [vmem:[%s14874_s7 + $0x1a4] ss:$8 sps:$4 sm:$0xff]  }
 0x447   : > { %6193 = vmatpush1.bf16.msra.mxu1 %v10681_v58  ;;  %v10762_v58 = vld [vmem:[%s14874_s7 + $0xa0] ss:$8 sps:$4 sm:$0xff]  }
 0x448   : > { %6194 = vmatprep.subr.bf16.mxu1 %v10686_v42  ;;  %v10765_v42 = vld [vmem:[%s14874_s7 + $0x1a0] ss:$8 sps:$4 sm:$0xff]  }
 0x44b   : > { %6195 = vmatpush1.bf16.msra.mxu1 %v10684_v47 }
 0x44c   : > { %6196 = vmatprep.subr.bf16.mxu1 %v10689_v26 }
 0x44f   : > { %6197 = vmatpush1.bf16.msra.mxu1 %v10687_v43 }
 0x450   : > { %6198 = vmatprep.subr.bf16.mxu1 %v10692_v39 }
 0x453   : > { %6199 = vmatpush1.bf16.msra.mxu1 %v10690_v0 }
 0x454   : > { %6200 = vmatprep.subr.bf16.mxu1 %v10695_v2 }
 0x457   : > { %6201 = vmatpush1.bf16.msra.mxu1 %v10693_v32 }
 0x458   : > { %6202 = vmatprep.subr.bf16.mxu1 %v10698_v7 }
 0x45b   : > { %6203 = vmatpush1.bf16.msra.mxu1 %v10696_v45 }
 0x45c   : > { %6204 = vmatprep.subr.bf16.mxu1 %v10701_v21 }
 0x45f   : > { %6205 = vmatpush1.bf16.msra.mxu1 %v10699_v20  ;;  %v10770_v20 = vld [vmem:[%s14874_s7 + $0xb4] ss:$8 sps:$4 sm:$0xff]  }
 0x460   : > { %6811 = vmatprep.subr.bf16.mxu1 %v10707_v19 }
 0x462   : > { %6207 = vmatmul.mubr.bf16.vlgmr.msra.gmra.mrb[84].mxu1 %v13517_v63  ;;  %v10702_v63 = vld [vmem:[%s14874_s7] ss:$8 sps:$4 sm:$0xff]  }
 0x463   : > { %6216 = vmatprep.mubr.bf16.mxu1 %v13565_v8  ;;  %v10710_v8 = vld [vmem:[%s14874_s7 + $0x14] ss:$8 sps:$4 sm:$0xff]   ;;  %6532 = vmatpush1.bf16.msra.mxu0 %v10702_v63 }
 0x464   : > { %6533 = vmatprep.subr.bf16.mxu0 %v10710_v8  ;;  %v10768_v8 = vld [vmem:[%s14874_s7 + $0xb0] ss:$8 sps:$4 sm:$0xff]  }
 0x46a   : > { %6217 = vmatmul.mubr.bf16.gmra.mrb[88].mxu1 %v13562_v27  ;;  %v10705_v27 = vld [vmem:[%s14874_s7 + $0x100] ss:$8 sps:$4 sm:$0xff]  }
 0x46b   : > { %6226 = vmatprep.mubr.bf16.mxu1 %v13587_v60  ;;  %6812 = vmatpush1.bf16.msra.mxu1 %v10705_v27  ;;  %v10708_v60 = vld [vmem:[%s14874_s7 + $0x10] ss:$8 sps:$4 sm:$0xff]  }
 0x46c   : > { %6534 = vmatpush1.bf16.msra.mxu0 %v10708_v60 }
 0x46d   : > { %6535 = vmatprep.subr.bf16.mxu0 %v10716_v59  ;;  %v10773_v59 = vld [vmem:[%s14874_s7 + $0x1b4] ss:$8 sps:$4 sm:$0xff]  }
 0x470   : > { %6536 = vmatpush1.bf16.msra.mxu0 %v10714_v50 }
 0x471   : > { %6537 = vmatprep.subr.bf16.mxu0 %v10722_v6 }
 0x472   : > { %6227 = vmatmul.mubr.bf16.gmra.mrb[92].mxu1 %v13581_v1  ;;  %v10713_v1 = vld [vmem:[%s14874_s7 + $0x114] ss:$8 sps:$4 sm:$0xff]  }
 0x473   : > { %6813 = vmatprep.subr.bf16.mxu1 %v10713_v1 }
 0x474   : > { %6814 = vmatpush1.bf16.msra.mxu1 %v10711_v14  ;;  %6538 = vmatpush1.bf16.msra.mxu0 %v10720_v9  ;;  %v10771_v14 = vld [vmem:[%s14874_s7 + $0x1b0] ss:$8 sps:$4 sm:$0xff]   ;;  %v10776_v9 = vld [vmem:[%s14874_s7 + $0xc4] ss:$8 sps:$4 sm:$0xff]  }
 0x475   : > { %6815 = vmatprep.subr.bf16.mxu1 %v10719_v17  ;;  %6539 = vmatprep.subr.bf16.mxu0 %v10728_v38 }
 0x478   : > { %6816 = vmatpush1.bf16.msra.mxu1 %v10717_v22  ;;  %6540 = vmatpush1.bf16.msra.mxu0 %v10726_v10  ;;  %v10777_v10 = vld [vmem:[%s14874_s7 + $0x1c0] ss:$8 sps:$4 sm:$0xff]  }
 0x479   : > { %6817 = vmatprep.subr.bf16.mxu1 %v10725_v29  ;;  %6541 = vmatprep.subr.bf16.mxu0 %v10734_v51 }
 0x47c   : > { %6818 = vmatpush1.bf16.msra.mxu1 %v10723_v54  ;;  %6542 = vmatpush1.bf16.msra.mxu0 %v10732_v61  ;;  %v10779_v54 = vld [vmem:[%s14874_s7 + $0x1c4] ss:$8 sps:$4 sm:$0xff]  }
 0x47d   : > { %6819 = vmatprep.subr.bf16.mxu1 %v10731_v44  ;;  %6543 = vmatprep.subr.bf16.mxu0 %v10740_v48  ;;  %v10774_v44 = vld [vmem:[%s14874_s7 + $0xc0] ss:$8 sps:$4 sm:$0xff]  }
 0x480   : > { %6820 = vmatpush1.bf16.msra.mxu1 %v10729_v15  ;;  %6544 = vmatpush1.bf16.msra.mxu0 %v10738_v16 }
 0x481   : > { %6821 = vmatprep.subr.bf16.mxu1 %v10737_v46  ;;  %6545 = vmatprep.subr.bf16.mxu0 %v10746_v33 }
 0x484   : > { %6822 = vmatpush1.bf16.msra.mxu1 %v10735_v62  ;;  %6546 = vmatpush1.bf16.msra.mxu0 %v10744_v37 }
 0x485   : > { %6823 = vmatprep.subr.bf16.mxu1 %v10743_v3  ;;  %6547 = vmatprep.subr.bf16.mxu0 %v10752_v25 }
 0x488   : > { %6824 = vmatpush1.bf16.msra.mxu1 %v10741_v35  ;;  %6548 = vmatpush1.bf16.msra.mxu0 %v10750_v41 }
 0x489   : > { %6825 = vmatprep.subr.bf16.mxu1 %v10749_v24  ;;  %6549 = vmatprep.subr.bf16.mxu0 %v10758_v4  ;;  %v10782_v24 = vld [vmem:[%s14874_s7 + $0xd4] ss:$8 sps:$4 sm:$0xff]   ;;  %v10780_v4 = vld [vmem:[%s14874_s7 + $0xd0] ss:$8 sps:$4 sm:$0xff]  }
 0x48c   : > { %6826 = vmatpush1.bf16.msra.mxu1 %v10747_v11  ;;  %6550 = vmatpush1.bf16.msra.mxu0 %v10756_v52 }
 0x48d   : > { %6827 = vmatprep.subr.bf16.mxu1 %v10755_v57  ;;  %6551 = vmatprep.subr.bf16.mxu0 %v10764_v31 }
 0x490   : > { %6828 = vmatpush1.bf16.msra.mxu1 %v10753_v56  ;;  %6552 = vmatpush1.bf16.msra.mxu0 %v10762_v58  ;;  %v10785_v58 = vld [vmem:[%s14874_s7 + $0x1d4] ss:$8 sps:$4 sm:$0xff]  }
 0x491   : > { %6829 = vmatprep.subr.bf16.mxu1 %v10761_v55  ;;  %6553 = vmatprep.subr.bf16.mxu0 %v10770_v20 }
 0x494   : > { %6830 = vmatpush1.bf16.msra.mxu1 %v10759_v5  ;;  %6554 = vmatpush1.bf16.msra.mxu0 %v10768_v8  ;;  %v10791_v8 = vld [vmem:[%s14874_s7 + $0x1e4] ss:$8 sps:$4 sm:$0xff]  }
 0x495   : > { %6831 = vmatprep.subr.bf16.mxu1 %v10767_v12  ;;  %6555 = vmatprep.subr.bf16.mxu0 %v10776_v9  ;;  %v10783_v12 = vld [vmem:[%s14874_s7 + $0x1d0] ss:$8 sps:$4 sm:$0xff]  }
 0x498   : > { %6832 = vmatpush1.bf16.msra.mxu1 %v10765_v42  ;;  %6556 = vmatpush1.bf16.msra.mxu0 %v10774_v44 }
 0x499   : > { %6833 = vmatprep.subr.bf16.mxu1 %v10773_v59  ;;  %6557 = vmatprep.subr.bf16.mxu0 %v10782_v24 }
 0x49c   : > { %6834 = vmatpush1.bf16.msra.mxu1 %v10771_v14  ;;  %6558 = vmatpush1.bf16.msra.mxu0 %v10780_v4  ;;  %v10789_v14 = vld [vmem:[%s14874_s7 + $0x1e0] ss:$8 sps:$4 sm:$0xff]  }
 0x49d   : > { %6835 = vmatprep.subr.bf16.mxu1 %v10779_v54 }
 0x4a0   : > { %6836 = vmatpush1.bf16.msra.mxu1 %v10777_v10 }
 0x4a1   : > { %6837 = vmatprep.subr.bf16.mxu1 %v10785_v58  ;;  %v10803_v58 = vld [vmem:[%s14874_s7 + $0x304] ss:$8 sps:$4 sm:$0xff]  }
 0x4a4   : > { %6838 = vmatpush1.bf16.msra.mxu1 %v10783_v12 }
 0x4a5   : > { %6839 = vmatprep.subr.bf16.mxu1 %v10791_v8 }
 0x4a8   : > { %6840 = vmatpush1.bf16.msra.mxu1 %v10789_v14 }
 0x4b4   : > { %v13989_v47 = vpop.f32.mrb[60].mxu1  ;;  %v13991_v26 = vpop.f32.mrb[60].mxu0 }
 0x4b5   : > { %v5105_v43 = vrot.slane %v13989_v47, 6  ;;  %v5385_v39 = vrot.slane %v13991_v26, 7  ;;  %v13995_v0 = vpop.f32.mrb[61].mxu1  ;;  %v13997_v2 = vpop.f32.mrb[61].mxu0 }
 0x4b6   : > { %v5106_v32 = vrot.slane %v13995_v0, 6  ;;  %v5386_v7 = vrot.slane %v13997_v2, 7  ;;  %v5080_v45 = vpop.f32.mrb[62].mxu1  ;;  %v5360_v21 = vpop.f32.mrb[62].mxu0 }
 0x4b7   : > { %v5107_v53 = vrot.slane %v5080_v45, 6  ;;  %v5387_v19 = vrot.slane %v5360_v21, 7  ;;  %v5082_v63 = vpop.f32.mrb[63].mxu1  ;;  %v5362_v27 = vpop.f32.mrb[63].mxu0 }
 0x4b8   : > { %v5108_v1 = vrot.slane %v5082_v63, 6  ;;  %v5388_v60 = vrot.slane %v5362_v27, 7  ;;  %v10788_v27 = vld [vmem:[%s14874_s7 + $0xe4] ss:$8 sps:$4 sm:$0xff]  }
 0x4b9   : > { %v5125_v17 = vsel %vm1115_vm0, %v5105_v43, %v5107_v53  ;;  %v5405_v50 = vsel %vm1651_vm1, %v5385_v39, %v5387_v19  ;;  %6559 = vmatprep.subr.bf16.mxu0 %v10788_v27 }
 0x4ba   : > { %v14021_v22 = vadd.f32 %v5405_v50, %v5125_v17  ;;  %v5126_v6 = vsel %vm1115_vm0, %v5106_v32, %v5108_v1  ;;  %v5406_v29 = vsel %vm1651_vm1, %v5386_v7, %v5388_v60 }
 0x4bb   : > { %v14037_v38 = vadd.f32 %v5406_v29, %v5126_v6 }
 0x4bc   : > { %v5086_v15 = vpop.f32.mrb[64].mxu1  ;;  %v5366_v51 = vpop.f32.mrb[64].mxu0 }
 0x4bd   : > { %v5109_v46 = vrot.slane %v5086_v15, 6  ;;  %v5389_v61 = vrot.slane %v5366_v51, 7  ;;  %v5088_v62 = vpop.f32.mrb[65].mxu1  ;;  %v5368_v48 = vpop.f32.mrb[65].mxu0 }
 0x4be   : > { %v5110_v3 = vrot.slane %v5088_v62, 6  ;;  %v5390_v16 = vrot.slane %v5368_v48, 7  ;;  %v5090_v35 = vpop.f32.mrb[66].mxu1  ;;  %v5370_v33 = vpop.f32.mrb[66].mxu0 }
 0x4bf   : > { %v5111_v37 = vrot.slane %v5090_v35, 6  ;;  %v5391_v11 = vrot.slane %v5370_v33, 7  ;;  %v5092_v25 = vpop.f32.mrb[67].mxu1  ;;  %v5372_v57 = vpop.f32.mrb[67].mxu0  ;;  %v5123_v41 = vsel %vm1115_vm0, %v5107_v53, %v5109_v46  ;;  %v5403_v56 = vsel %vm1651_vm1, %v5387_v19, %v5389_v61 }
 0x4c0   : > { %v5112_v55 = vrot.slane %v5092_v25, 6  ;;  %v5392_v52 = vrot.slane %v5372_v57, 7  ;;  %v14055_v5 = vadd.f32 %v5403_v56, %v5123_v41  ;;  %v5124_v31 = vsel %vm1115_vm0, %v5108_v1, %v5110_v3  ;;  %v10792_v57 = vld [vmem:[%s14874_s7 + $0xf0] ss:$8 sps:$4 sm:$0xff]  }
 0x4c1   : > { %v5404_v42 = vsel %vm1651_vm1, %v5388_v60, %v5390_v16  ;;  %v5121_v45 = vsel %vm1115_vm0, %v5109_v46, %v5111_v37  ;;  %v5401_v21 = vsel %vm1651_vm1, %v5389_v61, %v5391_v11  ;;  %v10786_v60 = vld [vmem:[%s14874_s7 + $0xe0] ss:$8 sps:$4 sm:$0xff]  }
 0x4c2   : > { %v14071_v20 = vadd.f32 %v5404_v42, %v5124_v31  ;;  %v14073_v53 = vadd.f32 %v5401_v21, %v5121_v45  ;;  %v5122_v19 = vsel %vm1115_vm0, %v5110_v3, %v5112_v55  ;;  %v5402_v63 = vsel %vm1651_vm1, %v5390_v16, %v5392_v52  ;;  %6560 = vmatpush1.bf16.msra.mxu0 %v10786_v60  ;;  %v10794_v16 = vld [vmem:[%s14874_s7 + $0xf4] ss:$8 sps:$4 sm:$0xff]  }
 0x4c3   : > { %v14085_v1 = vadd.f32 %v5402_v63, %v5122_v19  ;;  %6561 = vmatprep.subr.bf16.mxu0 %v10794_v16 }
 0x4c4   : > { %v5096_v59 = vpop.f32.mrb[68].mxu1  ;;  %v5376_v17 = vpop.f32.mrb[68].mxu0 }
 0x4c5   : > { %v5113_v50 = vrot.slane %v5096_v59, 6  ;;  %v5393_v6 = vrot.slane %v5376_v17, 7  ;;  %v5098_v29 = vpop.f32.mrb[69].mxu1  ;;  %v5378_v9 = vpop.f32.mrb[69].mxu0 }
 0x4c6   : > { %v5114_v54 = vrot.slane %v5098_v29, 6  ;;  %v5394_v44 = vrot.slane %v5378_v9, 7  ;;  %v5100_v10 = vpop.f32.mrb[70].mxu1  ;;  %v5380_v15 = vpop.f32.mrb[70].mxu0  ;;  %6562 = vmatpush1.bf16.msra.mxu0 %v10792_v57 }
 0x4c7   : > { %v5115_v51 = vrot.slane %v5100_v10, 6  ;;  %v5395_v46 = vrot.slane %v5380_v15, 7  ;;  %v5102_v61 = vpop.f32.mrb[71].mxu1  ;;  %v5382_v62 = vpop.f32.mrb[71].mxu0  ;;  %v5119_v48 = vsel %vm1115_vm0, %v5111_v37, %v5113_v50  ;;  %v5399_v3 = vsel %vm1651_vm1, %v5391_v11, %v5393_v6  ;;  %v10795_v37 = vld [vmem:[%s14874_s7 + $0x1f0] ss:$8 sps:$4 sm:$0xff]  }
 0x4c8   : > { %v5116_v35 = vrot.slane %v5102_v61, 6  ;;  %v5396_v33 = vrot.slane %v5382_v62, 7  ;;  %v14100_v24 = vadd.f32 %v5399_v3, %v5119_v48  ;;  %v5120_v25 = vsel %vm1115_vm0, %v5112_v55, %v5114_v54  ;;  %v10797_v55 = vld [vmem:[%s14874_s7 + $0x1f4] ss:$8 sps:$4 sm:$0xff]  }
 0x4c9   : > { %v5127_v11 = vsel %vm1115_vm0, %v5115_v51, %v5105_v43  ;;  %v5407_v41 = vsel %vm1651_vm1, %v5395_v46, %v5385_v39  ;;  %v5400_v56 = vsel %vm1651_vm1, %v5392_v52, %v5394_v44  ;;  %v5117_v4 = vsel %vm1115_vm0, %v5113_v50, %v5115_v51  ;;  %6841 = vmatprep.subr.bf16.mxu1 %v10797_v55 }
 0x4ca   : > { %v5409_v47 = vadd.f32 %v5407_v41, %v5127_v11  ;;  %v5128_v26 = vsel %vm1115_vm0, %v5116_v35, %v5106_v32  ;;  %v5408_v43 = vsel %vm1651_vm1, %v5396_v33, %v5386_v7  ;;  %v14133_v39 = vadd.f32 %v5400_v56, %v5120_v25  ;;  %6842 = vmatpush1.bf16.msra.mxu1 %v10795_v37  ;;  %v10800_v7 = vld [vmem:[%s14874_s7 + $0x204] ss:$8 sps:$4 sm:$0xff]  }
 0x4cb   : > { %v5410_v52 = vadd.f32 %v5408_v43, %v5128_v26  ;;  %v5397_v31 = vsel %vm1651_vm1, %v5393_v6, %v5395_v46  ;;  %v5118_v12 = vsel %vm1115_vm0, %v5114_v54, %v5116_v35  ;;  %v5398_v0 = vsel %vm1651_vm1, %v5394_v44, %v5396_v33  ;;  %7103 = vmatprep.subr.bf16.mxu0 %v10800_v7 }
 0x4cc   : > { %v14141_v32 = vadd.f32 %v5397_v31, %v5117_v4  ;;  %v14143_v2 = vadd.f32 %v5398_v0, %v5118_v12  ;;  %7371 = vmatprep.subr.bf16.mxu1 %v10803_v58 }
 0x4f4   : > { %v5648_v42 = vpop.f32.mrb[72].mxu1  ;;  %v14151_v45 = vpop.f32.mrb[72].mxu0 }
 0x4f5   : > { %v5677_v21 = vadd.f32 %v5648_v42, %v5409_v47  ;;  %v5650_v19 = vpop.f32.mrb[73].mxu1  ;;  %v14153_v63 = vpop.f32.mrb[73].mxu0  ;;  %v5945_v14 = vrot.slane %v14151_v45, 1 }
 0x4f6   : > { %v5678_v27 = vadd.f32 %v5650_v19, %v5410_v52  ;;  %v5652_v8 = vpop.f32.mrb[74].mxu1  ;;  %v5920_v60 = vpop.f32.mrb[74].mxu0  ;;  %v5946_v29 = vrot.slane %v14153_v63, 1 }
 0x4f7   : > { %v5679_v59 = vadd.f32 %v5652_v8, %v14021_v22  ;;  %v5947_v17 = vrot.slane %v5920_v60, 1  ;;  %v5654_v50 = vpop.f32.mrb[75].mxu1  ;;  %v5922_v6 = vpop.f32.mrb[75].mxu0 }
 0x4f8   : > { %v5680_v9 = vadd.f32 %v5654_v50, %v14037_v38  ;;  %v5948_v54 = vrot.slane %v5922_v6, 1 }
 0x4f9   : > { %v5965_v44 = vsel %vm2722_vm2, %v5945_v14, %v5947_v17 }
 0x4fa   : > { %v14161_v10 = vadd.f32 %v5965_v44, %v5677_v21  ;;  %v5966_v15 = vsel %vm2722_vm2, %v5946_v29, %v5948_v54 }
 0x4fb   : > { %v14165_v51 = vadd.f32 %v5966_v15, %v5678_v27 }
 0x4fc   : > { %v5658_v46 = vpop.f32.mrb[76].mxu1  ;;  %v5926_v22 = vpop.f32.mrb[76].mxu0 }
 0x4fd   : > { %v5681_v61 = vadd.f32 %v5658_v46, %v14055_v5  ;;  %v5949_v62 = vrot.slane %v5926_v22, 1  ;;  %v5660_v48 = vpop.f32.mrb[77].mxu1  ;;  %v5928_v3 = vpop.f32.mrb[77].mxu0 }
 0x4fe   : > { %v5682_v38 = vadd.f32 %v5660_v48, %v14071_v20  ;;  %v5950_v16 = vrot.slane %v5928_v3, 1  ;;  %v5662_v35 = vpop.f32.mrb[78].mxu1  ;;  %v5930_v33 = vpop.f32.mrb[78].mxu0 }
 0x4ff   : > { %v5963_v25 = vsel %vm2722_vm2, %v5947_v17, %v5949_v62  ;;  %v5683_v57 = vadd.f32 %v5662_v35, %v14073_v53  ;;  %v5951_v37 = vrot.slane %v5930_v33, 1  ;;  %v5664_v11 = vpop.f32.mrb[79].mxu1  ;;  %v5932_v41 = vpop.f32.mrb[79].mxu0 }
 0x500   : > { %v5971_v56 = vadd.f32 %v5963_v25, %v5679_v59  ;;  %v5964_v5 = vsel %vm2722_vm2, %v5948_v54, %v5950_v16  ;;  %v5684_v4 = vadd.f32 %v5664_v11, %v14085_v1  ;;  %v5952_v55 = vrot.slane %v5932_v41, 1 }
 0x501   : > { %v5972_v47 = vadd.f32 %v5964_v5, %v5680_v9  ;;  %v5961_v20 = vsel %vm2722_vm2, %v5949_v62, %v5951_v37 }
 0x502   : > { %v14177_v26 = vadd.f32 %v5961_v20, %v5681_v61  ;;  %v5962_v43 = vsel %vm2722_vm2, %v5950_v16, %v5952_v55 }
 0x503   : > { %v14181_v53 = vadd.f32 %v5962_v43, %v5682_v38 }
 0x504   : > { %v5668_v52 = vpop.f32.mrb[80].mxu1  ;;  %v5936_v31 = vpop.f32.mrb[80].mxu0 }
 0x505   : > { %v5685_v12 = vadd.f32 %v5668_v52, %v14100_v24  ;;  %v5953_v0 = vrot.slane %v5936_v31, 1  ;;  %v5670_v7 = vpop.f32.mrb[81].mxu1  ;;  %v5938_v58 = vpop.f32.mrb[81].mxu0 }
 0x506   : > { %v5686_v1 = vadd.f32 %v5670_v7, %v14133_v39  ;;  %v5954_v42 = vrot.slane %v5938_v58, 1  ;;  %v5672_v45 = vpop.f32.mrb[82].mxu1  ;;  %v5940_v21 = vpop.f32.mrb[82].mxu0 }
 0x507   : > { %v5959_v19 = vsel %vm2722_vm2, %v5951_v37, %v5953_v0  ;;  %v5687_v63 = vadd.f32 %v5672_v45, %v14141_v32  ;;  %v5955_v27 = vrot.slane %v5940_v21, 1  ;;  %v5674_v8 = vpop.f32.mrb[83].mxu1  ;;  %v5942_v60 = vpop.f32.mrb[83].mxu0 }
 0x508   : > { %v14188_v59 = vadd.f32 %v5959_v19, %v5683_v57  ;;  %v5960_v24 = vsel %vm2722_vm2, %v5952_v55, %v5954_v42  ;;  %v5688_v17 = vadd.f32 %v5674_v8, %v14143_v2  ;;  %v5956_v50 = vrot.slane %v5942_v60, 1 }
 0x509   : > { %v14193_v39 = vadd.f32 %v5960_v24, %v5684_v4  ;;  %v5957_v6 = vsel %vm2722_vm2, %v5953_v0, %v5955_v27  ;;  %v5967_v9 = vsel %vm2722_vm2, %v5955_v27, %v5945_v14  ;;  %v6273_v14 = vld [vmem:[%s14873_s6] sm:$0x3] }
 0x50a   : > { %v14199_v32 = vadd.f32 %v5957_v6, %v5685_v12  ;;  %v14201_v54 = vadd.f32 %v5967_v9, %v5687_v63  ;;  %v5958_v44 = vsel %vm2722_vm2, %v5954_v42, %v5956_v50  ;;  %v5968_v15 = vsel %vm2722_vm2, %v5956_v50, %v5946_v29 }
 0x50b   : > { %v14207_v2 = vadd.f32 %v5958_v44, %v5686_v1  ;;  %v14209_v46 = vadd.f32 %v5968_v15, %v5688_v17  ;;  %v6278_v33 = vrot.slane %v6273_v14, %v12538_v18  ;;  %v14224_v37 = vrot.slane %v6273_v14, %v12547_v36 }
 0x535   : > { %v6208_v22 = vpop.f32.mrb[84].mxu1 }
 0x536   : > { %v14211_v61 = vpop.f32.mrb[85].mxu1  ;;  %v6237_v48 = vrot.slane %v6208_v22, 2 }
 0x537   : > { %v6212_v62 = vpop.f32.mrb[86].mxu1  ;;  %v6238_v16 = vrot.slane %v14211_v61, 2 }
 0x538   : > { %v6239_v3 = vrot.slane %v6212_v62, 2  ;;  %v6214_v38 = vpop.f32.mrb[87].mxu1 }
 0x539   : > { %v6240_v35 = vrot.slane %v6214_v38, 2 }
 0x53a   : > { %v6257_v29 = vsel %vm3270_vm7, %v6237_v48, %v6239_v3 }
 0x53b   : > { %v6261_v25 = vadd.f32 %v6257_v29, %v14161_v10  ;;  %v6258_v57 = vsel %vm3270_vm7, %v6238_v16, %v6240_v35 }
 0x53c   : > { %v6262_v11 = vadd.f32 %v6258_v57, %v14165_v51 }
 0x53d   : > { %v6218_v41 = vpop.f32.mrb[88].mxu1  ;;  %v6285_v5 = vadd.f32 %v6278_v33, %v6261_v25 }
 0x53e   : > { %v6241_v4 = vrot.slane %v6218_v41, 2  ;;  %v6220_v55 = vpop.f32.mrb[89].mxu1  ;;  %v6286_v20 = vadd.f32 %v14224_v37, %v6262_v11 }
 0x53f   : > { %v6242_v43 = vrot.slane %v6220_v55, 2  ;;  %v6222_v52 = vpop.f32.mrb[90].mxu1  ;;  %v6297_v1 = vmax.f32 %v6285_v5, 0.0 }
 0x540   : > { %v6255_v31 = vsel %vm3270_vm7, %v6239_v3, %v6241_v4  ;;  %v6243_v10 = vrot.slane %v6222_v52, 2  ;;  %v6224_v12 = vpop.f32.mrb[91].mxu1  ;;  %v6298_v45 = vmax.f32 %v6286_v20, 0.0 }
 0x541   : > { %v6263_v0 = vadd.f32 %v6255_v31, %v5971_v56  ;;  %v6256_v7 = vsel %vm3270_vm7, %v6240_v35, %v6242_v43  ;;  %v6244_v58 = vrot.slane %v6224_v12, 2  ;;  %v6309_v9 = vmul.f32 %v12624_v40, %v6297_v1 }
 0x542   : > { %v6264_v51 = vadd.f32 %v6256_v7, %v5972_v47  ;;  %v6253_v42 = vsel %vm3270_vm7, %v6241_v4, %v6243_v10  ;;  %v6310_v44 = vmul.f32 %v12624_v40, %v6298_v45  ;;  %v10809_v7 = vld [vmem:[%s14874_s7 + $0x314] ss:$8 sps:$4 sm:$0xff]  }
 0x543   : > { %v6287_v21 = vadd.f32 %v6278_v33, %v6263_v0  ;;  %v6265_v19 = vadd.f32 %v6253_v42, %v14177_v26  ;;  %v6254_v63 = vsel %vm3270_vm7, %v6242_v43, %v6244_v58 }
 0x544   : > { %v6288_v27 = vadd.f32 %v14224_v37, %v6264_v51  ;;  %v6266_v56 = vadd.f32 %v6254_v63, %v14181_v53 }
 0x545   : > { %v6299_v8 = vmax.f32 %v6287_v21, 0.0  ;;  %v6289_v60 = vadd.f32 %v6278_v33, %v6265_v19  ;;  %v6228_v24 = vpop.f32.mrb[92].mxu1 }
 0x546   : > { %v6300_v17 = vmax.f32 %v6288_v27, 0.0  ;;  %v6290_v47 = vadd.f32 %v14224_v37, %v6266_v56  ;;  %v6245_v50 = vrot.slane %v6228_v24, 2  ;;  %v6230_v6 = vpop.f32.mrb[93].mxu1 }
 0x547   : > { %v6246_v26 = vrot.slane %v6230_v6, 2  ;;  %v6232_v15 = vpop.f32.mrb[94].mxu1  ;;  %v6311_v22 = vmul.f32 %v12628_v23, %v6299_v8  ;;  %v6301_v3 = vmax.f32 %v6289_v60, 0.0  ;;  %v10807_v8 = vld [vmem:[%s14874_s7 + $0x310] ss:$8 sps:$4 sm:$0xff]  }
 0x548   : > { %v6312_v61 = vmul.f32 %v12628_v23, %v6300_v17  ;;  %v6251_v53 = vsel %vm3270_vm7, %v6243_v10, %v6245_v50  ;;  %v6247_v62 = vrot.slane %v6232_v15, 2  ;;  %v6234_v14 = vpop.f32.mrb[95].mxu1  ;;  %v6302_v25 = vmax.f32 %v6290_v47, 0.0  ;;  %v10812_v47 = vld [vmem:[%s14874_s7 + $0x224] ss:$8 sps:$4 sm:$0xff]  }
 0x549   : > { %v6267_v38 = vadd.f32 %v6251_v53, %v14188_v59  ;;  %v6252_v35 = vsel %vm3270_vm7, %v6244_v58, %v6246_v26  ;;  %v6248_v29 = vrot.slane %v6234_v14, 2  ;;  %v6313_v0 = vmul.f32 %v12636_v30, %v6301_v3  ;;  %v10816_v53 = vld [vmem:[%s14874_s7 + $0x230] ss:$8 sps:$4 sm:$0xff]   ;;  %v10824_v14 = vld [vmem:[%s14874_s7 + $0x244] ss:$8 sps:$4 sm:$0xff]  }
 0x54a   : > { %v6268_v57 = vadd.f32 %v6252_v35, %v14193_v39  ;;  %v6249_v11 = vsel %vm3270_vm7, %v6245_v50, %v6247_v62  ;;  %v6259_v41 = vsel %vm3270_vm7, %v6247_v62, %v6237_v48  ;;  %v14262_v52 = vpack.c.bf16 %v6312_v61, %v6310_v44  ;;  %v10815_v50 = vld [vmem:[%s14874_s7 + $0x324] ss:$8 sps:$4 sm:$0xff]   ;;  %v10810_v44 = vld [vmem:[%s14874_s7 + $0x220] ss:$8 sps:$4 sm:$0xff]   ;;  %v10821_v61 = vld [vmem:[%s14874_s7 + $0x334] ss:$8 sps:$4 sm:$0xff]  }
 0x54b   : > { %v6291_v5 = vadd.f32 %v6278_v33, %v6267_v38  ;;  %v6269_v4 = vadd.f32 %v6249_v11, %v14199_v32  ;;  %v6271_v55 = vadd.f32 %v6259_v41, %v14201_v54  ;;  %v6250_v59 = vsel %vm3270_vm7, %v6246_v26, %v6248_v29  ;;  %v10798_v32 = vld [vmem:[%s14874_s7 + $0x200] ss:$8 sps:$4 sm:$0xff]   ;;  %v10819_v62 = vld [vmem:[%s14874_s7 + $0x330] ss:$8 sps:$4 sm:$0xff]   ;;  %v10827_v3 = vld [vmem:[%s14874_s7 + $0x344] ss:$8 sps:$4 sm:$0xff]  }
 0x54c   : > { %v6292_v20 = vadd.f32 %v14224_v37, %v6268_v57  ;;  %v6260_v43 = vsel %vm3270_vm7, %v6248_v29, %v6238_v16  ;;  %v6270_v39 = vadd.f32 %v6250_v59, %v14207_v2  ;;  %v10801_v54 = vld [vmem:[%s14874_s7 + $0x300] ss:$8 sps:$4 sm:$0xff]   ;;  %6563 = vmatprep.mubr.bf16.mxu0 %v14262_v52  ;;  %6843 = vmatprep.mubr.bf16.mxu1 %v14262_v52  ;;  %v10830_v29 = vld [vmem:[%s14874_s7 + $0x254] ss:$8 sps:$4 sm:$0xff]   ;;  %v10828_v57 = vld [vmem:[%s14874_s7 + $0x250] ss:$8 sps:$4 sm:$0xff]  }
 0x54d   : > { %v6303_v31 = vmax.f32 %v6291_v5, 0.0  ;;  %v6293_v10 = vadd.f32 %v6278_v33, %v6269_v4  ;;  %v6295_v48 = vadd.f32 %v6278_v33, %v6271_v55  ;;  %v6272_v12 = vadd.f32 %v6260_v43, %v14209_v46  ;;  %v10806_v46 = vld [vmem:[%s14874_s7 + $0x214] ss:$8 sps:$4 sm:$0xff]   ;;  %v10813_v26 = vld [vmem:[%s14874_s7 + $0x320] ss:$8 sps:$4 sm:$0xff]  }
 0x54e   : > { %v6304_v16 = vmax.f32 %v6292_v20, 0.0  ;;  %v6294_v2 = vadd.f32 %v14224_v37, %v6270_v39  ;;  %v14275_v33 = vpack.c.bf16 %v6311_v22, %v6309_v9  ;;  %v6314_v45 = vmul.f32 %v12636_v30, %v6302_v25  ;;  %v10818_v22 = vld [vmem:[%s14874_s7 + $0x234] ss:$8 sps:$4 sm:$0xff]   ;;  %v10822_v38 = vld [vmem:[%s14874_s7 + $0x240] ss:$8 sps:$4 sm:$0xff]  }
 0x54f   : > { %v6315_v58 = vmul.f32 %v12639_v34, %v6303_v31  ;;  %v6305_v1 = vmax.f32 %v6293_v10, 0.0  ;;  %v6307_v51 = vmax.f32 %v6295_v48, 0.0  ;;  %v6296_v42 = vadd.f32 %v14224_v37, %v6272_v12  ;;  %v10804_v37 = vld [vmem:[%s14874_s7 + $0x210] ss:$8 sps:$4 sm:$0xff]   ;;  %v10825_v35 = vld [vmem:[%s14874_s7 + $0x340] ss:$8 sps:$4 sm:$0xff]  }
 0x550   : > { %v6316_v21 = vmul.f32 %v12639_v34, %v6304_v16  ;;  %v6306_v19 = vmax.f32 %v6294_v2, 0.0  ;;  %6564 = vmatmul.mubr.bf16.vlgmr.msra.gmra.mrb[84].mxu0 %v14275_v33  ;;  %6844 = vmatmul.mubr.bf16.vlgmr.msra.gmra.mrb[96].mxu1 %v14275_v33  ;;  %v10833_v25 = vld [vmem:[%s14874_s7 + $0x354] ss:$8 sps:$4 sm:$0xff]   ;;  %v10831_v11 = vld [vmem:[%s14874_s7 + $0x350] ss:$8 sps:$4 sm:$0xff]  }
 0x551   : > { %v6317_v63 = vmul.f32 %v12644_v49, %v6305_v1  ;;  %v6319_v27 = vmul.f32 %v12648_v28, %v6307_v51  ;;  %v6308_v56 = vmax.f32 %v6296_v42, 0.0  ;;  %7104 = vmatpush1.bf16.msra.mxu0 %v10798_v32  ;;  %7372 = vmatpush1.bf16.msra.mxu1 %v10801_v54  ;;  %v14297_v60 = vpack.c.bf16 %v6315_v58, %v6313_v0  ;;  %v10836_v41 = vld [vmem:[%s14874_s7 + $0x264] ss:$8 sps:$4 sm:$0xff]   ;;  %v10834_v4 = vld [vmem:[%s14874_s7 + $0x260] ss:$8 sps:$4 sm:$0xff]  }
 0x552   : > { %v6318_v24 = vmul.f32 %v12644_v49, %v6306_v19  ;;  %7105 = vmatprep.subr.bf16.mxu0 %v10806_v46  ;;  %7373 = vmatprep.subr.bf16.mxu1 %v10809_v7  ;;  %v14300_v17 = vpack.c.bf16 %v6316_v21, %v6314_v45  ;;  %v10839_v5 = vld [vmem:[%s14874_s7 + $0x364] ss:$8 sps:$4 sm:$0xff]   ;;  %v10837_v55 = vld [vmem:[%s14874_s7 + $0x360] ss:$8 sps:$4 sm:$0xff]   ;;  %v10842_v59 = vld [vmem:[%s14874_s7 + $0x274] ss:$8 sps:$4 sm:$0xff]  }
 0x553   : > { %v6320_v6 = vmul.f32 %v12648_v28, %v6308_v56  ;;  %v14309_v9 = vpack.c.bf16 %v6319_v27, %v6317_v63  ;;  %v10845_v20 = vld [vmem:[%s14874_s7 + $0x374] ss:$8 sps:$4 sm:$0xff]   ;;  %v10840_v43 = vld [vmem:[%s14874_s7 + $0x270] ss:$8 sps:$4 sm:$0xff]   ;;  %v10848_v31 = vld [vmem:[%s14874_s7 + $0x284] ss:$8 sps:$4 sm:$0xff]  }
 0x554   : > { %6573 = vmatprep.mubr.bf16.mxu0 %v14300_v17  ;;  %6853 = vmatprep.mubr.bf16.mxu1 %v14300_v17  ;;  %v10843_v39 = vld [vmem:[%s14874_s7 + $0x370] ss:$8 sps:$4 sm:$0xff]   ;;  %v10851_v10 = vld [vmem:[%s14874_s7 + $0x384] ss:$8 sps:$4 sm:$0xff]   ;;  %v10846_v48 = vld [vmem:[%s14874_s7 + $0x280] ss:$8 sps:$4 sm:$0xff]  }
 0x555   : > { %7106 = vmatpush1.bf16.msra.mxu0 %v10804_v37  ;;  %7374 = vmatpush1.bf16.msra.mxu1 %v10807_v8  ;;  %v14319_v15 = vpack.c.bf16 %v6320_v6, %v6318_v24  ;;  %v10849_v12 = vld [vmem:[%s14874_s7 + $0x380] ss:$8 sps:$4 sm:$0xff]   ;;  %v10854_v32 = vld [vmem:[%s14874_s7 + $0x294] ss:$8 sps:$4 sm:$0xff]   ;;  %v10852_v0 = vld [vmem:[%s14874_s7 + $0x290] ss:$8 sps:$4 sm:$0xff]  }
 0x556   : > { %7107 = vmatprep.subr.bf16.mxu0 %v10812_v47  ;;  %7375 = vmatprep.subr.bf16.mxu1 %v10815_v50  ;;  %v10857_v54 = vld [vmem:[%s14874_s7 + $0x394] ss:$8 sps:$4 sm:$0xff]   ;;  %v10855_v16 = vld [vmem:[%s14874_s7 + $0x390] ss:$8 sps:$4 sm:$0xff]   ;;  %v10860_v2 = vld [vmem:[%s14874_s7 + $0x2a4] ss:$8 sps:$4 sm:$0xff]  }
 0x557   : > { %v10863_v46 = vld [vmem:[%s14874_s7 + $0x3a4] ss:$8 sps:$4 sm:$0xff]   ;;  %v10858_v7 = vld [vmem:[%s14874_s7 + $0x2a0] ss:$8 sps:$4 sm:$0xff]   ;;  %v10866_v1 = vld [vmem:[%s14874_s7 + $0x2b4] ss:$8 sps:$4 sm:$0xff]  }
 0x558   : > { %6574 = vmatmul.mubr.bf16.gmra.mrb[88].mxu0 %v14297_v60  ;;  %6854 = vmatmul.mubr.bf16.gmra.mrb[100].mxu1 %v14297_v60  ;;  %v10861_v58 = vld [vmem:[%s14874_s7 + $0x3a0] ss:$8 sps:$4 sm:$0xff]   ;;  %v10869_v51 = vld [vmem:[%s14874_s7 + $0x3b4] ss:$8 sps:$4 sm:$0xff]   ;;  %v10864_v42 = vld [vmem:[%s14874_s7 + $0x2b0] ss:$8 sps:$4 sm:$0xff]  }
 0x559   : > { %7108 = vmatpush1.bf16.msra.mxu0 %v10810_v44  ;;  %7376 = vmatpush1.bf16.msra.mxu1 %v10813_v26  ;;  %v10867_v45 = vld [vmem:[%s14874_s7 + $0x3b0] ss:$8 sps:$4 sm:$0xff]   ;;  %v10872_v21 = vld [vmem:[%s14874_s7 + $0x2c4] ss:$8 sps:$4 sm:$0xff]   ;;  %v10870_v63 = vld [vmem:[%s14874_s7 + $0x2c0] ss:$8 sps:$4 sm:$0xff]  }
 0x55a   : > { %6583 = vmatprep.mubr.bf16.mxu0 %v14319_v15  ;;  %6863 = vmatprep.mubr.bf16.mxu1 %v14319_v15  ;;  %v10875_v19 = vld [vmem:[%s14874_s7 + $0x3c4] ss:$8 sps:$4 sm:$0xff]   ;;  %v10873_v27 = vld [vmem:[%s14874_s7 + $0x3c0] ss:$8 sps:$4 sm:$0xff]   ;;  %v10878_v56 = vld [vmem:[%s14874_s7 + $0x2d4] ss:$8 sps:$4 sm:$0xff]  }
 0x55b   : > { %7109 = vmatprep.subr.bf16.mxu0 %v10818_v22  ;;  %7377 = vmatprep.subr.bf16.mxu1 %v10821_v61  ;;  %v10881_v37 = vld [vmem:[%s14874_s7 + $0x3d4] ss:$8 sps:$4 sm:$0xff]   ;;  %v10876_v8 = vld [vmem:[%s14874_s7 + $0x2d0] ss:$8 sps:$4 sm:$0xff]   ;;  %v10884_v47 = vld [vmem:[%s14874_s7 + $0x2e4] ss:$8 sps:$4 sm:$0xff]  }
 0x55c   : > { %v10879_v24 = vld [vmem:[%s14874_s7 + $0x3d0] ss:$8 sps:$4 sm:$0xff]   ;;  %v10887_v50 = vld [vmem:[%s14874_s7 + $0x3e4] ss:$8 sps:$4 sm:$0xff]   ;;  %v10882_v6 = vld [vmem:[%s14874_s7 + $0x2e0] ss:$8 sps:$4 sm:$0xff]  }
 0x55d   : > { %7110 = vmatpush1.bf16.msra.mxu0 %v10816_v53  ;;  %7378 = vmatpush1.bf16.msra.mxu1 %v10819_v62  ;;  %v10885_v44 = vld [vmem:[%s14874_s7 + $0x3e0] ss:$8 sps:$4 sm:$0xff]   ;;  %v10890_v26 = vld [vmem:[%s14874_s7 + $0x2f4] ss:$8 sps:$4 sm:$0xff]   ;;  %v10888_v61 = vld [vmem:[%s14874_s7 + $0x2f0] ss:$8 sps:$4 sm:$0xff]  }
 0x55e   : > { %7111 = vmatprep.subr.bf16.mxu0 %v10824_v14  ;;  %7379 = vmatprep.subr.bf16.mxu1 %v10827_v3  ;;  %v10893_v22 = vld [vmem:[%s14874_s7 + $0x3f4] ss:$8 sps:$4 sm:$0xff]   ;;  %v10891_v53 = vld [vmem:[%s14874_s7 + $0x3f0] ss:$8 sps:$4 sm:$0xff]   ;;  %v10896_v62 = vld [vmem:[%s14874_s7 + $0x404] ss:$8 sps:$4 sm:$0xff]  }
 0x55f   : > { %v10894_v14 = vld [vmem:[%s14874_s7 + $0x400] ss:$8 sps:$4 sm:$0xff]   ;;  %v10899_v3 = vld [vmem:[%s14874_s7 + $0x414] ss:$8 sps:$4 sm:$0xff]  }
 0x560   : > { %6584 = vmatmul.mubr.bf16.gmra.mrb[92].mxu0 %v14309_v9  ;;  %6864 = vmatmul.mubr.bf16.gmra.mrb[104].mxu1 %v14309_v9 }
 0x561   : > { %7112 = vmatpush1.bf16.msra.mxu0 %v10822_v38  ;;  %7380 = vmatpush1.bf16.msra.mxu1 %v10825_v35  ;;  %v10897_v38 = vld [vmem:[%s14874_s7 + $0x410] ss:$8 sps:$4 sm:$0xff]   ;;  %v10902_v35 = vld [vmem:[%s14874_s7 + $0x424] ss:$8 sps:$4 sm:$0xff]  }
 0x562   : > { %7135 = vmatprep.mubr.bf16.mxu0 %v14262_v52  ;;  %7403 = vmatprep.mubr.bf16.mxu1 %v14262_v52 }
 0x563   : > { %7113 = vmatprep.subr.bf16.mxu0 %v10830_v29  ;;  %7381 = vmatprep.subr.bf16.mxu1 %v10833_v25  ;;  %v10900_v29 = vld [vmem:[%s14874_s7 + $0x420] ss:$8 sps:$4 sm:$0xff]   ;;  %v10905_v25 = vld [vmem:[%s14874_s7 + $0x434] ss:$8 sps:$4 sm:$0xff]  }
 0x565   : > { %7114 = vmatpush1.bf16.msra.mxu0 %v10828_v57  ;;  %7382 = vmatpush1.bf16.msra.mxu1 %v10831_v11  ;;  %v10903_v57 = vld [vmem:[%s14874_s7 + $0x430] ss:$8 sps:$4 sm:$0xff]   ;;  %v10908_v11 = vld [vmem:[%s14874_s7 + $0x444] ss:$8 sps:$4 sm:$0xff]  }
 0x566   : > { %7115 = vmatprep.subr.bf16.mxu0 %v10836_v41  ;;  %7383 = vmatprep.subr.bf16.mxu1 %v10839_v5  ;;  %v10906_v41 = vld [vmem:[%s14874_s7 + $0x440] ss:$8 sps:$4 sm:$0xff]   ;;  %v10911_v5 = vld [vmem:[%s14874_s7 + $0x454] ss:$8 sps:$4 sm:$0xff]  }
 0x569   : > { %7116 = vmatpush1.bf16.msra.mxu0 %v10834_v4  ;;  %7384 = vmatpush1.bf16.msra.mxu1 %v10837_v55  ;;  %v10909_v4 = vld [vmem:[%s14874_s7 + $0x450] ss:$8 sps:$4 sm:$0xff]   ;;  %v10914_v55 = vld [vmem:[%s14874_s7 + $0x464] ss:$8 sps:$4 sm:$0xff]  }
 0x56a   : > { %7117 = vmatprep.subr.bf16.mxu0 %v10842_v59  ;;  %7385 = vmatprep.subr.bf16.mxu1 %v10845_v20  ;;  %v10912_v59 = vld [vmem:[%s14874_s7 + $0x460] ss:$8 sps:$4 sm:$0xff]   ;;  %v10915_v20 = vld [vmem:[%s14874_s7 + $0x470] ss:$8 sps:$4 sm:$0xff]  }
 0x56d   : > { %7118 = vmatpush1.bf16.msra.mxu0 %v10840_v43  ;;  %7386 = vmatpush1.bf16.msra.mxu1 %v10843_v39  ;;  %v10920_v43 = vld [vmem:[%s14874_s7 + $0x484] ss:$8 sps:$4 sm:$0xff]   ;;  %v10918_v39 = vld [vmem:[%s14874_s7 + $0x480] ss:$8 sps:$4 sm:$0xff]  }
 0x56e   : > { %7119 = vmatprep.subr.bf16.mxu0 %v10848_v31  ;;  %7387 = vmatprep.subr.bf16.mxu1 %v10851_v10  ;;  %v10923_v31 = vld [vmem:[%s14874_s7 + $0x494] ss:$8 sps:$4 sm:$0xff]   ;;  %v10921_v10 = vld [vmem:[%s14874_s7 + $0x490] ss:$8 sps:$4 sm:$0xff]  }
 0x571   : > { %7120 = vmatpush1.bf16.msra.mxu0 %v10846_v48  ;;  %7388 = vmatpush1.bf16.msra.mxu1 %v10849_v12  ;;  %v10926_v48 = vld [vmem:[%s14874_s7 + $0x4a4] ss:$8 sps:$4 sm:$0xff]   ;;  %v10924_v12 = vld [vmem:[%s14874_s7 + $0x4a0] ss:$8 sps:$4 sm:$0xff]  }
 0x572   : > { %7121 = vmatprep.subr.bf16.mxu0 %v10854_v32  ;;  %7389 = vmatprep.subr.bf16.mxu1 %v10857_v54  ;;  %v10929_v32 = vld [vmem:[%s14874_s7 + $0x4b4] ss:$8 sps:$4 sm:$0xff]   ;;  %v10927_v54 = vld [vmem:[%s14874_s7 + $0x4b0] ss:$8 sps:$4 sm:$0xff]  }
 0x575   : > { %7122 = vmatpush1.bf16.msra.mxu0 %v10852_v0  ;;  %7390 = vmatpush1.bf16.msra.mxu1 %v10855_v16  ;;  %v10932_v0 = vld [vmem:[%s14874_s7 + $0x4c4] ss:$8 sps:$4 sm:$0xff]   ;;  %v10930_v16 = vld [vmem:[%s14874_s7 + $0x4c0] ss:$8 sps:$4 sm:$0xff]  }
 0x576   : > { %7123 = vmatprep.subr.bf16.mxu0 %v10860_v2  ;;  %7391 = vmatprep.subr.bf16.mxu1 %v10863_v46  ;;  %v10935_v2 = vld [vmem:[%s14874_s7 + $0x4d4] ss:$8 sps:$4 sm:$0xff]   ;;  %v10933_v46 = vld [vmem:[%s14874_s7 + $0x4d0] ss:$8 sps:$4 sm:$0xff]  }
 0x579   : > { %7124 = vmatpush1.bf16.msra.mxu0 %v10858_v7  ;;  %7392 = vmatpush1.bf16.msra.mxu1 %v10861_v58  ;;  %v10938_v7 = vld [vmem:[%s14874_s7 + $0x4e4] ss:$8 sps:$4 sm:$0xff]   ;;  %v10936_v58 = vld [vmem:[%s14874_s7 + $0x4e0] ss:$8 sps:$4 sm:$0xff]  }
 0x57a   : > { %7125 = vmatprep.subr.bf16.mxu0 %v10866_v1  ;;  %7393 = vmatprep.subr.bf16.mxu1 %v10869_v51  ;;  %v10941_v1 = vld [vmem:[%s14874_s7 + $0x4f4] ss:$8 sps:$4 sm:$0xff]   ;;  %v10939_v51 = vld [vmem:[%s14874_s7 + $0x4f0] ss:$8 sps:$4 sm:$0xff]  }
 0x57d   : > { %7126 = vmatpush1.bf16.msra.mxu0 %v10864_v42  ;;  %7394 = vmatpush1.bf16.msra.mxu1 %v10867_v45  ;;  %v10942_v42 = vld [vmem:[%s14876_s9 + $0x40] sm:$0xff]  }
 0x57e   : > { %7127 = vmatprep.subr.bf16.mxu0 %v10872_v21  ;;  %7395 = vmatprep.subr.bf16.mxu1 %v10875_v19  ;;  %v10943_v45 = vld [vmem:[%s14876_s9] sm:$0xff]   ;;  %v10947_v21 = vld [vmem:[%s14876_s9 + $0x10] sm:$0xff]  }
 0x581   : > { %7128 = vmatpush1.bf16.msra.mxu0 %v10870_v63  ;;  %7396 = vmatpush1.bf16.msra.mxu1 %v10873_v27 }
 0x582   : > { %7129 = vmatprep.subr.bf16.mxu0 %v10878_v56  ;;  %7397 = vmatprep.subr.bf16.mxu1 %v10881_v37 }
 0x585   : > { %7130 = vmatpush1.bf16.msra.mxu0 %v10876_v8  ;;  %7398 = vmatpush1.bf16.msra.mxu1 %v10879_v24 }
 0x586   : > { %7131 = vmatprep.subr.bf16.mxu0 %v10884_v47  ;;  %7399 = vmatprep.subr.bf16.mxu1 %v10887_v50 }
 0x589   : > { %7132 = vmatpush1.bf16.msra.mxu0 %v10882_v6  ;;  %7400 = vmatpush1.bf16.msra.mxu1 %v10885_v44  ;;  %v10948_v44 = vld [vmem:[%s14876_s9 + $0x58] sm:$0xff]  }
 0x58a   : > { %7133 = vmatprep.subr.bf16.mxu0 %v10890_v26  ;;  %7401 = vmatprep.subr.bf16.mxu1 %v10893_v22 }
 0x58d   : > { %7134 = vmatpush1.bf16.msra.mxu0 %v10888_v61  ;;  %7402 = vmatpush1.bf16.msra.mxu1 %v10891_v53 }
 0x58e   : > { %7663 = vmatprep.subr.bf16.mxu0 %v10896_v62  ;;  %9607 = vmatprep.subr.bf16.mxu1 %v10942_v42  ;;  %v10949_v62 = vld [vmem:[%s14876_s9 + $0x18] sm:$0xff]  }
 0x590   : > { %7136 = vmatmul.mubr.bf16.vlgmr.msra.gmra.mrb[96].mxu0 %v14275_v33  ;;  %7404 = vmatmul.mubr.bf16.vlgmr.msra.gmra.mrb[108].mxu1 %v14275_v33 }
 0x591   : > { %7145 = vmatprep.mubr.bf16.mxu0 %v14300_v17  ;;  %7413 = vmatprep.mubr.bf16.mxu1 %v14300_v17 }
 0x592   : > { %7664 = vmatpush1.bf16.msra.mxu0 %v10894_v14  ;;  %9608 = vmatpush3.bf16.msra.mxu1 %v10943_v45 }
 0x593   : > { %7665 = vmatprep.subr.bf16.mxu0 %v10899_v3 }
 0x596   : > { %7666 = vmatpush1.bf16.msra.mxu0 %v10897_v38 }
 0x597   : > { %7667 = vmatprep.subr.bf16.mxu0 %v10902_v35 }
 0x598   : > { %7146 = vmatmul.mubr.bf16.gmra.mrb[100].mxu0 %v14297_v60  ;;  %7414 = vmatmul.mubr.bf16.gmra.mrb[112].mxu1 %v14297_v60 }
 0x599   : > { %7155 = vmatprep.mubr.bf16.mxu0 %v14319_v15  ;;  %7423 = vmatprep.mubr.bf16.mxu1 %v14319_v15 }
 0x59a   : > { %7668 = vmatpush1.bf16.msra.mxu0 %v10900_v29 }
 0x59b   : > { %7669 = vmatprep.subr.bf16.mxu0 %v10905_v25 }
 0x59e   : > { %7670 = vmatpush1.bf16.msra.mxu0 %v10903_v57  ;;  %v10950_v57 = vld [vmem:[%s14876_s9 + $0x60] sm:$0xff]  }
 0x59f   : > { %7671 = vmatprep.subr.bf16.mxu0 %v10908_v11 }
 0x5a0   : > { %7156 = vmatmul.mubr.bf16.gmra.mrb[104].mxu0 %v14309_v9  ;;  %7424 = vmatmul.mubr.bf16.gmra.mrb[116].mxu1 %v14309_v9 }
 0x5a1   : > { %7695 = vmatprep.mubr.bf16.mxu0 %v14262_v52  ;;  %v10917_v52 = vld [vmem:[%s14874_s7 + $0x474] ss:$8 sps:$4 sm:$0xff]  }
 0x5a2   : > { %7672 = vmatpush1.bf16.msra.mxu0 %v10906_v41 }
 0x5a3   : > { %7673 = vmatprep.subr.bf16.mxu0 %v10911_v5  ;;  %v10951_v5 = vld [vmem:[%s14876_s9 + $0x20] sm:$0xff]  }
 0x5a6   : > { %7674 = vmatpush1.bf16.msra.mxu0 %v10909_v4 }
 0x5a7   : > { %7675 = vmatprep.subr.bf16.mxu0 %v10914_v55 }
 0x5aa   : > { %7676 = vmatpush1.bf16.msra.mxu0 %v10912_v59 }
 0x5ab   : > { %7677 = vmatprep.subr.bf16.mxu0 %v10917_v52 }
 0x5ae   : > { %7678 = vmatpush1.bf16.msra.mxu0 %v10915_v20 }
 0x5af   : > { %7679 = vmatprep.subr.bf16.mxu0 %v10920_v43 }
 0x5b2   : > { %7680 = vmatpush1.bf16.msra.mxu0 %v10918_v39 }
 0x5b3   : > { %7681 = vmatprep.subr.bf16.mxu0 %v10923_v31 }
 0x5b6   : > { %7682 = vmatpush1.bf16.msra.mxu0 %v10921_v10 }
 0x5b7   : > { %7683 = vmatprep.subr.bf16.mxu0 %v10926_v48 }
 0x5ba   : > { %7684 = vmatpush1.bf16.msra.mxu0 %v10924_v12 }
 0x5bb   : > { %7685 = vmatprep.subr.bf16.mxu0 %v10929_v32 }
 0x5be   : > { %7686 = vmatpush1.bf16.msra.mxu0 %v10927_v54 }
 0x5bf   : > { %7687 = vmatprep.subr.bf16.mxu0 %v10932_v0 }
 0x5c2   : > { %7688 = vmatpush1.bf16.msra.mxu0 %v10930_v16  ;;  %v10952_v16 = vld [vmem:[%s14876_s9 + $0x68] sm:$0xff]  }
 0x5c3   : > { %7689 = vmatprep.subr.bf16.mxu0 %v10935_v2 }
 0x5c6   : > { %7690 = vmatpush1.bf16.msra.mxu0 %v10933_v46 }
 0x5c7   : > { %7691 = vmatprep.subr.bf16.mxu0 %v10938_v7 }
 0x5ca   : > { %7692 = vmatpush1.bf16.msra.mxu0 %v10936_v58 }
 0x5cb   : > { %7693 = vmatprep.subr.bf16.mxu0 %v10941_v1  ;;  %v10953_v1 = vld [vmem:[%s14876_s9 + $0x28] sm:$0xff]  }
 0x5ce   : > { %7694 = vmatpush1.bf16.msra.mxu0 %v10939_v51 }
 0x5d1   : > { %7696 = vmatmul.mubr.bf16.vlgmr.msra.gmra.mrb[108].mxu0 %v14275_v33  ;;  %v10944_v33 = vld [vmem:[%s14876_s9 + $0x48] sm:$0xff]  }
 0x5d2   : > { %7705 = vmatprep.mubr.bf16.mxu0 %v14300_v17  ;;  %9609 = vmatprep.subr.bf16.mxu1 %v10944_v33  ;;  %v10946_v17 = vld [vmem:[%s14876_s9 + $0x50] sm:$0xff]  }
 0x5d9   : > { %7706 = vmatmul.mubr.bf16.gmra.mrb[112].mxu0 %v14297_v60  ;;  %v10945_v60 = vld [vmem:[%s14876_s9 + $0x8] sm:$0xff]  }
 0x5da   : > { %7715 = vmatprep.mubr.bf16.mxu0 %v14319_v15  ;;  %9610 = vmatpush3.bf16.msra.mxu1 %v10945_v60 }
 0x5db   : > { %9611 = vmatprep.subr.bf16.mxu1 %v10946_v17 }
 0x5de   : > { %9612 = vmatpush3.bf16.msra.mxu1 %v10947_v21 }
 0x5df   : > { %9613 = vmatprep.subr.bf16.mxu1 %v10948_v44 }
 0x5e1   : > { %7716 = vmatmul.mubr.bf16.gmra.mrb[116].mxu0 %v14309_v9 }
 0x5e2   : > { %9614 = vmatpush3.bf16.msra.mxu1 %v10949_v62 }
 0x5e3   : > { %9615 = vmatprep.subr.bf16.mxu1 %v10950_v57 }
 0x5e6   : > { %9616 = vmatpush3.bf16.msra.mxu1 %v10951_v5 }
 0x5e7   : > { %9617 = vmatprep.subr.bf16.mxu1 %v10952_v16 }
 0x5ea   : > { %9618 = vmatpush3.bf16.msra.mxu1 %v10953_v1 }
 0x623   : > { %v14612_v9 = vpop.f32.mrb[84].mxu0  ;;  %v14614_v15 = vpop.f32.mrb[96].mxu1 }
 0x624   : > { %v14619_v19 = vpop.f32.mrb[85].mxu0  ;;  %v14621_v63 = vpop.f32.mrb[97].mxu1  ;;  %v6594_v27 = vrot.slane %v14612_v9, 6  ;;  %v6874_v8 = vrot.slane %v14614_v15, 7 }
 0x625   : > { %v6569_v56 = vpop.f32.mrb[86].mxu0  ;;  %v6849_v37 = vpop.f32.mrb[98].mxu1  ;;  %v6595_v26 = vrot.slane %v14619_v19, 6  ;;  %v6875_v22 = vrot.slane %v14621_v63, 7 }
 0x626   : > { %v6596_v24 = vrot.slane %v6569_v56, 6  ;;  %v6876_v47 = vrot.slane %v6849_v37, 7  ;;  %v6571_v50 = vpop.f32.mrb[87].mxu0  ;;  %v6851_v6 = vpop.f32.mrb[99].mxu1  ;;  %v10954_v37 = vld [vmem:[%s14876_s9 + $0x70] sm:$0xff]  }
 0x627   : > { %v6597_v61 = vrot.slane %v6571_v50, 6  ;;  %v6877_v53 = vrot.slane %v6851_v6, 7  ;;  %v10955_v50 = vld [vmem:[%s14876_s9 + $0x30] sm:$0xff]   ;;  %9619 = vmatprep.subr.bf16.mxu1 %v10954_v37 }
 0x628   : > { %v6614_v14 = vsel %vm1115_vm0, %v6594_v27, %v6596_v24  ;;  %v6894_v3 = vsel %vm1651_vm1, %v6874_v8, %v6876_v47  ;;  %9620 = vmatpush3.bf16.msra.mxu1 %v10955_v50 }
 0x629   : > { %v14641_v38 = vadd.f32 %v6894_v3, %v6614_v14  ;;  %v6615_v35 = vsel %vm1115_vm0, %v6595_v26, %v6597_v61  ;;  %v6895_v29 = vsel %vm1651_vm1, %v6875_v22, %v6877_v53 }
 0x62a   : > { %v14651_v25 = vadd.f32 %v6895_v29, %v6615_v35 }
 0x62b   : > { %v6575_v11 = vpop.f32.mrb[88].mxu0  ;;  %v6855_v41 = vpop.f32.mrb[100].mxu1 }
 0x62c   : > { %v6598_v4 = vrot.slane %v6575_v11, 6  ;;  %v6878_v55 = vrot.slane %v6855_v41, 7  ;;  %v6577_v59 = vpop.f32.mrb[89].mxu0  ;;  %v6857_v52 = vpop.f32.mrb[101].mxu1 }
 0x62d   : > { %v6599_v20 = vrot.slane %v6577_v59, 6  ;;  %v6879_v43 = vrot.slane %v6857_v52, 7  ;;  %v6579_v39 = vpop.f32.mrb[90].mxu0  ;;  %v6859_v31 = vpop.f32.mrb[102].mxu1 }
 0x62e   : > { %v6600_v10 = vrot.slane %v6579_v39, 6  ;;  %v6880_v48 = vrot.slane %v6859_v31, 7  ;;  %v6581_v12 = vpop.f32.mrb[91].mxu0  ;;  %v6861_v32 = vpop.f32.mrb[103].mxu1  ;;  %v6612_v54 = vsel %vm1115_vm0, %v6596_v24, %v6598_v4  ;;  %v6892_v0 = vsel %vm1651_vm1, %v6876_v47, %v6878_v55 }
 0x62f   : > { %v6601_v2 = vrot.slane %v6581_v12, 6  ;;  %v6881_v46 = vrot.slane %v6861_v32, 7  ;;  %v14666_v7 = vadd.f32 %v6892_v0, %v6612_v54  ;;  %v6613_v58 = vsel %vm1115_vm0, %v6597_v61, %v6599_v20  ;;  %v10957_v12 = vld [vmem:[%s14876_s9 + $0x38] sm:$0xff]  }
 0x630   : > { %v6893_v51 = vsel %vm1651_vm1, %v6877_v53, %v6879_v43  ;;  %v6610_v42 = vsel %vm1115_vm0, %v6598_v4, %v6600_v10  ;;  %v6890_v45 = vsel %vm1651_vm1, %v6878_v55, %v6880_v48 }
 0x631   : > { %v14679_v33 = vadd.f32 %v6893_v51, %v6613_v58  ;;  %v14681_v60 = vadd.f32 %v6890_v45, %v6610_v42  ;;  %v6611_v17 = vsel %vm1115_vm0, %v6599_v20, %v6601_v2  ;;  %v6891_v21 = vsel %vm1651_vm1, %v6879_v43, %v6881_v46  ;;  %v10956_v43 = vld [vmem:[%s14876_s9 + $0x78] sm:$0xff]  }
 0x632   : > { %v14687_v56 = vadd.f32 %v6891_v21, %v6611_v17  ;;  %9621 = vmatprep.subr.bf16.mxu1 %v10956_v43 }
 0x633   : > { %v6585_v24 = vpop.f32.mrb[92].mxu0  ;;  %v6865_v47 = vpop.f32.mrb[104].mxu1  ;;  %9622 = vmatpush3.bf16.msra.mxu1 %v10957_v12 }
 0x634   : > { %v6602_v6 = vrot.slane %v6585_v24, 6  ;;  %v6882_v44 = vrot.slane %v6865_v47, 7  ;;  %v6587_v61 = vpop.f32.mrb[93].mxu0  ;;  %v6867_v53 = vpop.f32.mrb[105].mxu1 }
 0x635   : > { %v6603_v62 = vrot.slane %v6587_v61, 6  ;;  %v6883_v14 = vrot.slane %v6867_v53, 7  ;;  %v6589_v3 = vpop.f32.mrb[94].mxu0  ;;  %v6869_v35 = vpop.f32.mrb[106].mxu1 }
 0x636   : > { %v6604_v29 = vrot.slane %v6589_v3, 6  ;;  %v6884_v57 = vrot.slane %v6869_v35, 7  ;;  %v6591_v11 = vpop.f32.mrb[95].mxu0  ;;  %v6871_v41 = vpop.f32.mrb[107].mxu1  ;;  %v6608_v5 = vsel %vm1115_vm0, %v6600_v10, %v6602_v6  ;;  %v6888_v4 = vsel %vm1651_vm1, %v6880_v48, %v6882_v44 }
 0x637   : > { %v6605_v55 = vrot.slane %v6591_v11, 6  ;;  %v6885_v59 = vrot.slane %v6871_v41, 7  ;;  %v14699_v52 = vadd.f32 %v6888_v4, %v6608_v5  ;;  %v6609_v20 = vsel %vm1115_vm0, %v6601_v2, %v6603_v62 }
 0x638   : > { %v6616_v39 = vsel %vm1115_vm0, %v6604_v29, %v6594_v27  ;;  %v6896_v31 = vsel %vm1651_vm1, %v6884_v57, %v6874_v8  ;;  %v6889_v10 = vsel %vm1651_vm1, %v6881_v46, %v6883_v14  ;;  %v6606_v48 = vsel %vm1115_vm0, %v6602_v6, %v6604_v29 }
 0x639   : > { %v6898_v32 = vadd.f32 %v6896_v31, %v6616_v39  ;;  %v6617_v9 = vsel %vm1115_vm0, %v6605_v55, %v6595_v26  ;;  %v6897_v15 = vsel %vm1651_vm1, %v6885_v59, %v6875_v22  ;;  %v6907_v27 = vadd.f32 %v6889_v10, %v6609_v20 }
 0x63a   : > { %v6899_v8 = vadd.f32 %v6897_v15, %v6617_v9  ;;  %v6886_v54 = vsel %vm1651_vm1, %v6882_v44, %v6884_v57  ;;  %v6607_v0 = vsel %vm1115_vm0, %v6603_v62, %v6605_v55  ;;  %v6887_v19 = vsel %vm1651_vm1, %v6883_v14, %v6885_v59 }
 0x63b   : > { %v6908_v16 = vadd.f32 %v6886_v54, %v6606_v48  ;;  %v14735_v26 = vadd.f32 %v6887_v19, %v6607_v0 }
 0x663   : > { %v7137_v63 = vpop.f32.mrb[96].mxu0  ;;  %v14737_v2 = vpop.f32.mrb[108].mxu1 }
 0x664   : > { %v7166_v22 = vadd.f32 %v7137_v63, %v6898_v32  ;;  %v7139_v46 = vpop.f32.mrb[97].mxu0  ;;  %v14739_v58 = vpop.f32.mrb[109].mxu1  ;;  %v7434_v45 = vrot.slane %v14737_v2, 1 }
 0x665   : > { %v7167_v1 = vadd.f32 %v7139_v46, %v6899_v8  ;;  %v7141_v51 = vpop.f32.mrb[98].mxu0  ;;  %v7409_v42 = vpop.f32.mrb[110].mxu1  ;;  %v7435_v47 = vrot.slane %v14739_v58, 1 }
 0x666   : > { %v7168_v17 = vadd.f32 %v7141_v51, %v14641_v38  ;;  %v7436_v21 = vrot.slane %v7409_v42, 1  ;;  %v7143_v37 = vpop.f32.mrb[99].mxu0  ;;  %v7411_v24 = vpop.f32.mrb[111].mxu1 }
 0x667   : > { %v7169_v50 = vadd.f32 %v7143_v37, %v14651_v25  ;;  %v7437_v6 = vrot.slane %v7411_v24, 1 }
 0x668   : > { %v7454_v44 = vsel %vm2722_vm2, %v7434_v45, %v7436_v21 }
 0x669   : > { %v14747_v61 = vadd.f32 %v7454_v44, %v7166_v22  ;;  %v7455_v53 = vsel %vm2722_vm2, %v7435_v47, %v7437_v6 }
 0x66a   : > { %v14751_v62 = vadd.f32 %v7455_v53, %v7167_v1 }
 0x66b   : > { %v7147_v14 = vpop.f32.mrb[100].mxu0  ;;  %v7415_v38 = vpop.f32.mrb[112].mxu1 }
 0x66c   : > { %v7170_v3 = vadd.f32 %v7147_v14, %v14666_v7  ;;  %v7438_v35 = vrot.slane %v7415_v38, 1  ;;  %v7149_v29 = vpop.f32.mrb[101].mxu0  ;;  %v7417_v57 = vpop.f32.mrb[113].mxu1 }
 0x66d   : > { %v7171_v25 = vadd.f32 %v7149_v29, %v14679_v33  ;;  %v7439_v11 = vrot.slane %v7417_v57, 1  ;;  %v7151_v41 = vpop.f32.mrb[102].mxu0  ;;  %v7419_v5 = vpop.f32.mrb[114].mxu1 }
 0x66e   : > { %v7452_v4 = vsel %vm2722_vm2, %v7436_v21, %v7438_v35  ;;  %v7172_v55 = vadd.f32 %v7151_v41, %v14681_v60  ;;  %v7440_v59 = vrot.slane %v7419_v5, 1  ;;  %v7153_v20 = vpop.f32.mrb[103].mxu0  ;;  %v7421_v43 = vpop.f32.mrb[115].mxu1 }
 0x66f   : > { %v7460_v39 = vadd.f32 %v7452_v4, %v7168_v17  ;;  %v7453_v7 = vsel %vm2722_vm2, %v7437_v6, %v7439_v11  ;;  %v7173_v31 = vadd.f32 %v7153_v20, %v14687_v56  ;;  %v7441_v10 = vrot.slane %v7421_v43, 1 }
 0x670   : > { %v7461_v48 = vadd.f32 %v7453_v7, %v7169_v50  ;;  %v7450_v33 = vsel %vm2722_vm2, %v7438_v35, %v7440_v59 }
 0x671   : > { %v14763_v12 = vadd.f32 %v7450_v33, %v7170_v3  ;;  %v7451_v32 = vsel %vm2722_vm2, %v7439_v11, %v7441_v10 }
 0x672   : > { %v14767_v60 = vadd.f32 %v7451_v32, %v7171_v25 }
 0x673   : > { %v7157_v9 = vpop.f32.mrb[104].mxu0  ;;  %v7425_v15 = vpop.f32.mrb[116].mxu1 }
 0x674   : > { %v7174_v8 = vadd.f32 %v7157_v9, %v14699_v52  ;;  %v7442_v54 = vrot.slane %v7425_v15, 1  ;;  %v7159_v0 = vpop.f32.mrb[105].mxu0  ;;  %v7427_v19 = vpop.f32.mrb[117].mxu1 }
 0x675   : > { %v7175_v56 = vadd.f32 %v7159_v0, %v6907_v27  ;;  %v7443_v63 = vrot.slane %v7427_v19, 1  ;;  %v7161_v2 = vpop.f32.mrb[106].mxu0  ;;  %v7429_v22 = vpop.f32.mrb[118].mxu1 }
 0x676   : > { %v7448_v46 = vsel %vm2722_vm2, %v7440_v59, %v7442_v54  ;;  %v7176_v58 = vadd.f32 %v7161_v2, %v6908_v16  ;;  %v7444_v1 = vrot.slane %v7429_v22, 1  ;;  %v7163_v51 = vpop.f32.mrb[107].mxu0  ;;  %v7431_v42 = vpop.f32.mrb[119].mxu1 }
 0x677   : > { %v14772_v17 = vadd.f32 %v7448_v46, %v7172_v55  ;;  %v7449_v21 = vsel %vm2722_vm2, %v7441_v10, %v7443_v63  ;;  %v7177_v52 = vadd.f32 %v7163_v51, %v14735_v26  ;;  %v7445_v37 = vrot.slane %v7431_v42, 1 }
 0x678   : > { %v14777_v24 = vadd.f32 %v7449_v21, %v7173_v31  ;;  %v7446_v27 = vsel %vm2722_vm2, %v7442_v54, %v7444_v1  ;;  %v7456_v50 = vsel %vm2722_vm2, %v7444_v1, %v7434_v45  ;;  %v7762_v45 = vld [vmem:[%s14875_s8] sm:$0x3] }
 0x679   : > { %v14783_v16 = vadd.f32 %v7446_v27, %v7174_v8  ;;  %v14785_v6 = vadd.f32 %v7456_v50, %v7176_v58  ;;  %v7447_v44 = vsel %vm2722_vm2, %v7443_v63, %v7445_v37  ;;  %v7457_v53 = vsel %vm2722_vm2, %v7445_v37, %v7435_v47 }
 0x67a   : > { %v14791_v26 = vadd.f32 %v7447_v44, %v7175_v56  ;;  %v14793_v14 = vadd.f32 %v7457_v53, %v7177_v52  ;;  %v7767_v5 = vrot.slane %v7762_v45, %v12538_v18  ;;  %v14808_v59 = vrot.slane %v7762_v45, %v12547_v36 }
 0x6a4   : > { %v7697_v38 = vpop.f32.mrb[108].mxu0 }
 0x6a5   : > { %v14795_v3 = vpop.f32.mrb[109].mxu0  ;;  %v7726_v29 = vrot.slane %v7697_v38, 2 }
 0x6a6   : > { %v7701_v35 = vpop.f32.mrb[110].mxu0  ;;  %v7727_v11 = vrot.slane %v14795_v3, 2 }
 0x6a7   : > { %v7728_v57 = vrot.slane %v7701_v35, 2  ;;  %v7703_v25 = vpop.f32.mrb[111].mxu0 }
 0x6a8   : > { %v7729_v41 = vrot.slane %v7703_v25, 2 }
 0x6a9   : > { %v7746_v47 = vsel %vm3270_vm7, %v7726_v29, %v7728_v57 }
 0x6aa   : > { %v7750_v4 = vadd.f32 %v7746_v47, %v14747_v61  ;;  %v7747_v55 = vsel %vm3270_vm7, %v7727_v11, %v7729_v41 }
 0x6ab   : > { %v7751_v20 = vadd.f32 %v7747_v55, %v14751_v62 }
 0x6ac   : > { %v7707_v43 = vpop.f32.mrb[112].mxu0  ;;  %v7774_v7 = vadd.f32 %v7767_v5, %v7750_v4 }
 0x6ad   : > { %v7730_v31 = vrot.slane %v7707_v43, 2  ;;  %v7709_v10 = vpop.f32.mrb[113].mxu0  ;;  %v7775_v33 = vadd.f32 %v14808_v59, %v7751_v20 }
 0x6ae   : > { %v7731_v32 = vrot.slane %v7709_v10, 2  ;;  %v7711_v9 = vpop.f32.mrb[114].mxu0  ;;  %v7786_v0 = vmax.f32 %v7774_v7, 0.0 }
 0x6af   : > { %v7744_v18 = vsel %vm3270_vm7, %v7728_v57, %v7730_v31  ;;  %v7732_v61 = vrot.slane %v7711_v9, 2  ;;  %v7713_v15 = vpop.f32.mrb[115].mxu0  ;;  %v7787_v22 = vmax.f32 %v7775_v33, 0.0 }
 0x6b0   : > { %v7752_v8 = vadd.f32 %v7744_v18, %v7460_v39  ;;  %v7745_v36 = vsel %vm3270_vm7, %v7729_v41, %v7731_v32  ;;  %v7733_v54 = vrot.slane %v7713_v15, 2  ;;  %v7798_v42 = vmul.f32 %v12624_v40, %v7786_v0 }
 0x6b1   : > { %v7753_v62 = vadd.f32 %v7745_v36, %v7461_v48  ;;  %v7742_v19 = vsel %vm3270_vm7, %v7730_v31, %v7732_v61  ;;  %v7799_v44 = vmul.f32 %v12624_v40, %v7787_v22 }
 0x6b2   : > { %v7776_v56 = vadd.f32 %v7767_v5, %v7752_v8  ;;  %v7754_v63 = vadd.f32 %v7742_v19, %v14763_v12  ;;  %v7743_v2 = vsel %vm3270_vm7, %v7731_v32, %v7733_v54 }
 0x6b3   : > { %v7777_v46 = vadd.f32 %v14808_v59, %v7753_v62  ;;  %v7755_v39 = vadd.f32 %v7743_v2, %v14767_v60 }
 0x6b4   : > { %v7788_v58 = vmax.f32 %v7776_v56, 0.0  ;;  %v7778_v1 = vadd.f32 %v7767_v5, %v7754_v63  ;;  %v7717_v51 = vpop.f32.mrb[116].mxu0 }
 0x6b5   : > { %v7734_v48 = vrot.slane %v7717_v51, 2  ;;  %v7719_v21 = vpop.f32.mrb[117].mxu0  ;;  %v7789_v52 = vmax.f32 %v7777_v46, 0.0  ;;  %v7779_v12 = vadd.f32 %v14808_v59, %v7755_v39 }
 0x6b6   : > { %v7800_v37 = vmul.f32 %v12628_v23, %v7788_v58  ;;  %v7735_v27 = vrot.slane %v7719_v21, 2  ;;  %v7721_v50 = vpop.f32.mrb[118].mxu0  ;;  %v7790_v35 = vmax.f32 %v7778_v1, 0.0 }
 0x6b7   : > { %v7740_v53 = vsel %vm3270_vm7, %v7732_v61, %v7734_v48  ;;  %v7736_v60 = vrot.slane %v7721_v50, 2  ;;  %v7723_v38 = vpop.f32.mrb[119].mxu0  ;;  %v7801_v3 = vmul.f32 %v12628_v23, %v7789_v52  ;;  %v7791_v10 = vmax.f32 %v7779_v12, 0.0 }
 0x6b8   : > { %v7756_v45 = vadd.f32 %v7740_v53, %v14772_v17  ;;  %v7741_v57 = vsel %vm3270_vm7, %v7733_v54, %v7735_v27  ;;  %v7737_v25 = vrot.slane %v7723_v38, 2  ;;  %v7810_v41 = vpack.c.bf16 %v7800_v37, %v7798_v42 }
 0x6b9   : > { %v7757_v47 = vadd.f32 %v7741_v57, %v14777_v24  ;;  %v7738_v40 = vsel %vm3270_vm7, %v7734_v48, %v7736_v60  ;;  %v7748_v4 = vsel %vm3270_vm7, %v7736_v60, %v7726_v29  ;;  %v7811_v55 = vpack.c.bf16 %v7801_v3, %v7799_v44 }
 0x6ba   : > { %v7780_v20 = vadd.f32 %v7767_v5, %v7756_v45  ;;  %v7758_v23 = vadd.f32 %v7738_v40, %v14783_v16  ;;  %v7760_v43 = vadd.f32 %v7748_v4, %v14785_v6  ;;  %v7739_v17 = vsel %vm3270_vm7, %v7735_v27, %v7737_v25 }
 0x6bb   : > { %v7781_v7 = vadd.f32 %v14808_v59, %v7757_v47  ;;  %v7749_v24 = vsel %vm3270_vm7, %v7737_v25, %v7727_v11  ;;  %v7759_v31 = vadd.f32 %v7739_v17, %v14791_v26  ;;  %7983 = vmatprep.mubr.bf16.mxu1 %v7811_v55  ;;  %v7802_v18 = vmul.f32 %v12636_v30, %v7790_v35 }
 0x6bc   : > { %v7782_v33 = vadd.f32 %v7767_v5, %v7758_v23  ;;  %v7784_v29 = vadd.f32 %v7767_v5, %v7760_v43  ;;  %v7761_v32 = vadd.f32 %v7749_v24, %v14793_v14  ;;  %7984 = vmatmul.mubr.bf16.vlgmr.msra.gmra.mrb[120].mxu1 %v7810_v41  ;;  %v7792_v16 = vmax.f32 %v7780_v20, 0.0 }
 0x6bd   : > { %v7783_v6 = vadd.f32 %v14808_v59, %v7759_v31  ;;  %v7793_v9 = vmax.f32 %v7781_v7, 0.0  ;;  %v7803_v8 = vmul.f32 %v12636_v30, %v7791_v10 }
 0x6be   : > { %v7785_v61 = vadd.f32 %v14808_v59, %v7761_v32  ;;  %v7804_v13 = vmul.f32 %v12639_v34, %v7792_v16  ;;  %v7794_v11 = vmax.f32 %v7782_v33, 0.0  ;;  %v7796_v15 = vmax.f32 %v7784_v29, 0.0 }
 0x6bf   : > { %v7795_v26 = vmax.f32 %v7783_v6, 0.0  ;;  %v7805_v5 = vmul.f32 %v12639_v34, %v7793_v9  ;;  %v9588_v34 = vld [vmem:[%s14877_s10] ss:$0 sm:$0xff] }
 0x6c0   : > { %v7797_v36 = vmax.f32 %v7785_v61, 0.0  ;;  %v7812_v14 = vpack.c.bf16 %v7804_v13, %v7802_v18  ;;  %v7806_v54 = vmul.f32 %v12644_v49, %v7794_v11  ;;  %v7808_v0 = vmul.f32 %v12648_v28, %v7796_v15 }
 0x6c1   : > { %v7813_v62 = vpack.c.bf16 %v7805_v5, %v7803_v8  ;;  %v7807_v19 = vmul.f32 %v12644_v49, %v7795_v26 }
 0x6c2   : > { %v7809_v59 = vmul.f32 %v12648_v28, %v7797_v36  ;;  %v7814_v56 = vpack.c.bf16 %v7808_v0, %v7806_v54 }
 0x6c3   : > { %7991 = vmatprep.mubr.bf16.mxu1 %v7813_v62 }
 0x6c4   : > { %7992 = vmatmul.mubr.bf16.gmra.mrb[124].mxu1 %v7812_v14  ;;  %v7815_v63 = vpack.c.bf16 %v7809_v59, %v7807_v19 }
 0x6c6   : > { %7999 = vmatprep.mubr.bf16.mxu1 %v7815_v63 }
 0x6cc   : > { %8000 = vmatmul.mubr.bf16.gmra.mrb[128].mxu1 %v7814_v56 }
 0x78f   : > { %v9623_v30 = vpop.f32.mrb[120].mxu1 }
 0x790   : > { %v9624_v2 = vpop.f32.mrb[121].mxu1 }
 0x791   : > { %v9625_v22 = vadd.f32 %v9624_v2, %v9623_v30  ;;  %v9626_v46 = vpop.f32.mrb[122].mxu1 }
 0x792   : > { %v9627_v39 = vpop.f32.mrb[123].mxu1 }
 0x793   : > { %v9628_v58 = vadd.f32 %v9627_v39, %v9626_v46  ;;  %v7986_v1 = vadd.f32 %v9625_v22, %v9588_v34 }
 0x795   : > { %8008 = vmax.xlane.f32.xlu0 %v7986_v1  ;;  %v7989_v28 = vadd.f32 %v9628_v58, %v9588_v34 }
 0x797   : > { %v9629_v49 = vpop.f32.mrb[124].mxu1 }
 0x798   : > { %v9630_v51 = vpop.f32.mrb[125].mxu1 }
 0x799   : > { %v9631_v42 = vadd.f32 %v9630_v51, %v9629_v49  ;;  %v9632_v48 = vpop.f32.mrb[126].mxu1  ;;  %8010 = vmax.xlane.f32.xlu0 %v7989_v28 }
 0x79a   : > { %v9633_v21 = vpop.f32.mrb[127].mxu1 }
 0x79b   : > { %v9634_v52 = vadd.f32 %v9633_v21, %v9632_v48  ;;  %v7994_v37 = vadd.f32 %v9631_v42, %v9588_v34 }
 0x79d   : > { %8012 = vmax.xlane.f32.xlu1 %v7994_v37  ;;  %v7997_v27 = vadd.f32 %v9634_v52, %v9588_v34 }
 0x79f   : > { %v9635_v12 = vpop.f32.mrb[128].mxu1 }
 0x7a0   : > { %v9636_v50 = vpop.f32.mrb[129].mxu1 }
 0x7a1   : > { %v9637_v44 = vadd.f32 %v9636_v50, %v9635_v12  ;;  %8014 = vmax.xlane.f32.xlu1 %v7997_v27  ;;  %v9638_v53 = vpop.f32.mrb[130].mxu1 }
 0x7a2   : > { %v9639_v60 = vpop.f32.mrb[131].mxu1 }
 0x7a3   : > { %v9640_v38 = vadd.f32 %v9639_v60, %v9638_v53  ;;  %v8002_v3 = vadd.f32 %v9637_v44, %v9588_v34 }
 0x7a5   : > { %8016 = vmax.xlane.f32.xlu0 %v8002_v3  ;;  %v8005_v35 = vadd.f32 %v9640_v38, %v9588_v34 }
 0x7a7   : > { %8018 = vmax.xlane.f32.xlu1 %v8005_v35 }
 0x822   : > { %v8009_v45 = vpop.xlane.xlu0 %8008 }
 0x823   : > { %v8020_v57 = vsub.f32 %v7986_v1, %v8009_v45 }
 0x825   : > { %v8026_v25 = vmul.f32 1.442695, %v8020_v57 }
 0x826   : > { %v8011_v41 = vpop.xlane.xlu0 %8010 }
 0x827   : > { %10958 = vpow2.f32 %v8026_v25  ;;  %v8021_v47 = vsub.f32 %v7989_v28, %v8011_v41 }
 0x829   : > { %v8028_v40 = vmul.f32 1.442695, %v8021_v47 }
 0x82a   : > { %v8013_v4 = vpop.xlane.xlu1 %8012 }
 0x82b   : > { %10960 = vpow2.f32 %v8028_v40  ;;  %v8022_v55 = vsub.f32 %v7994_v37, %v8013_v4 }
 0x82d   : > { %v8030_v20 = vmul.f32 1.442695, %v8022_v55 }
 0x82e   : > { %v8015_v23 = vpop.xlane.xlu1 %8014 }
 0x82f   : > { %10962 = vpow2.f32 %v8030_v20  ;;  %v8023_v43 = vsub.f32 %v7997_v27, %v8015_v23 }
 0x831   : > { %v10959_v17 = vpop.eup %10958  ;;  %v8032_v7 = vmul.f32 1.442695, %v8023_v43 }
 0x832   : > { %8038 = vadd.xlane.f32.xlu0 %v10959_v17  ;;  %v8017_v24 = vpop.xlane.xlu0 %8016 }
 0x833   : > { %10964 = vpow2.f32 %v8032_v7  ;;  %v8024_v31 = vsub.f32 %v8002_v3, %v8017_v24 }
 0x834   : > { %v8019_v10 = vpop.xlane.xlu1 %8018 }
 0x835   : > { %v10961_v33 = vpop.eup %10960  ;;  %v8034_v29 = vmul.f32 1.442695, %v8024_v31  ;;  %v8025_v32 = vsub.f32 %v8005_v35, %v8019_v10 }
 0x836   : > { %8040 = vadd.xlane.f32.xlu1 %v10961_v33 }
 0x837   : > { %10966 = vpow2.f32 %v8034_v29  ;;  %v8036_v16 = vmul.f32 1.442695, %v8025_v32 }
 0x839   : > { %v10963_v6 = vpop.eup %10962  ;;  %10968 = vpow2.f32 %v8036_v16 }
 0x83a   : > { %8042 = vadd.xlane.f32.xlu0 %v10963_v6 }
 0x83d   : > { %v10965_v9 = vpop.eup %10964 }
 0x83e   : > { %8044 = vadd.xlane.f32.xlu1 %v10965_v9 }
 0x841   : > { %v10967_v18 = vpop.eup %10966 }
 0x842   : > { %8046 = vadd.xlane.f32.xlu0 %v10967_v18 }
 0x843   : > { %v10969_v61 = vpop.eup %10968 }
 0x844   : > { %8048 = vadd.xlane.f32.xlu1 %v10969_v61 }
 0x8bf   : > { %v8039_v13 = vpop.xlane.xlu0 %8038 }
 0x8c0   : > { %10970 = vrcp.f32 %v8039_v13 }
 0x8c3   : > { %v8041_v11 = vpop.xlane.xlu1 %8040 }
 0x8c4   : > { %10972 = vrcp.f32 %v8041_v11 }
 0x8c7   : > { %v8043_v15 = vpop.xlane.xlu0 %8042 }
 0x8c8   : > { %10974 = vrcp.f32 %v8043_v15 }
 0x8ca   : > { %v10971_v26 = vpop.eup %10970 }
 0x8cb   : > { %v8056_v8 = vmul.f32 %v10971_v26, %v10959_v17  ;;  %v8045_v5 = vpop.xlane.xlu1 %8044 }
 0x8cc   : > { %10976 = vrcp.f32 %v8045_v5 }
 0x8cd   : > { %8062 = vst [vmem:[%s386_s23] sm:$0xff] %v8056_v8 }
 0x8ce   : > { %v10973_v36 = vpop.eup %10972 }
 0x8cf   : > { %v8057_v14 = vmul.f32 %v10973_v36, %v10961_v33  ;;  %v8047_v54 = vpop.xlane.xlu0 %8046 }
 0x8d0   : > { %10978 = vrcp.f32 %v8047_v54 }
 0x8d1   : > { %8063 = vst [vmem:[%s386_s23 + $0x8] sm:$0xff] %v8057_v14  ;;  %v8049_v0 = vpop.xlane.xlu1 %8048 }
 0x8d2   : > { %v10975_v62 = vpop.eup %10974  ;;  %10980 = vrcp.f32 %v8049_v0 }
 0x8d3   : > { %v8058_v19 = vmul.f32 %v10975_v62, %v10963_v6 }
 0x8d5   : > { %8064 = vst [vmem:[%s386_s23 + $0x10] sm:$0xff] %v8058_v19 }
 0x8d6   : > { %v10977_v59 = vpop.eup %10976 }
 0x8d7   : > { %v8059_v56 = vmul.f32 %v10977_v59, %v10965_v9 }
 0x8d9   : > { %8065 = vst [vmem:[%s386_s23 + $0x18] sm:$0xff] %v8059_v56 }
 0x8da   : > { %v10979_v63 = vpop.eup %10978 }
 0x8db   : > { %v8060_v30 = vmul.f32 %v10979_v63, %v10967_v18 }
 0x8dc   : > { %v10981_v2 = vpop.eup %10980 }
 0x8dd   : > { %8066 = vst [vmem:[%s386_s23 + $0x20] sm:$0xff] %v8060_v30  ;;  %v8061_v34 = vmul.f32 %v10981_v2, %v10969_v61 }
 0x8df   : > { %8067 = vst [vmem:[%s386_s23 + $0x28] sm:$0xff] %v8061_v34 }
 0x8e0 PF: > { %s21_s17 = sadd.s32 1, %s11005_s17  }
 0x8e1   : > { %p18_p4 = scmp.ge.s32.totalorder %s21_s17, 4  }
 0x8e3   :  { %20 = sbr.rel (!%p18_p4) target bundleno = 1 (0x1), region = 110 }

</bundles_post_ra>
